<compile_context>
chip_gen: v5e
topology: v5e:2x2
jax: 0.10.0
libtpu: 0.0.40
codegen_flags: <defaults>
</compile_context>

<pallas_src>
import jax
import jax.numpy as jnp
from jax.experimental import pallas as pl
from jax.experimental.pallas import tpu as pltpu

# ----------------------- model hyper-parameters (small) -----------------------
B           = 2
CHANNELS    = 3
IMAGE       = 16
PATCH       = 4
NUM_PATCHES = (IMAGE // PATCH) ** 2          # 16
PATCH_DIM   = CHANNELS * PATCH * PATCH       # 48
SEQ         = NUM_PATCHES + 1                # 17 (cls token + patches)
SEQ_PAD     = 24                             # pad to a multiple of 8 sublanes
DIM         = 32
DEPTH       = 2
HEADS       = 2
DIM_HEAD    = 16
INNER       = HEADS * DIM_HEAD               # 32
MLP_DIM     = 64
NUM_CLASSES = 10
SCALE       = DIM_HEAD ** -0.5
LN_EPS      = 1e-5                           # torch.nn.LayerNorm default
NEG_BIG     = -1e30                          # additive mask for padded keys
# pool='cls', dropout=0.0, emb_dropout=0.0  ->  dropouts are identities.


# ------------------------------ fused kernel ----------------------------------
def _layernorm(x, g, b):
    # var = E[x^2] - mu^2 : two independent cross-lane reductions (shorter chain)
    mu = jnp.mean(x, axis=-1, keepdims=True)
    var = jnp.mean(x * x, axis=-1, keepdims=True) - mu * mu
    return (x - mu) * jax.lax.rsqrt(var + LN_EPS) * g + b


def vit_fused_kernel(patches_ref, pw_ref, tokb_ref,
                     ln1g_ref, ln1b_ref, wqkv_ref, wo_ref, bo_ref,
                     ln2g_ref, ln2b_ref, w1_ref, b1_ref, w2_ref, b2_ref,
                     hg_ref, hb_ref, hw_ref, hbias_ref,
                     o_ref):
    # patches_ref : (B*SEQ_PAD, PATCH_DIM) bf16; per batch: row0 zeros (cls slot),
    #               rows 1..16 patches, rows 17..23 zeros (padding)
    # pw_ref      : (PATCH_DIM, DIM) bf16
    # tokb_ref    : (B*SEQ_PAD, DIM) f32; per batch: row0 = cls+pos[0],
    #               rows 1..16 = patch_bias+pos[1:], rows 17..23 = 0
    # wqkv_ref    : (DEPTH, DIM, 3*INNER) bf16  (q | k | v, heads along lanes)
    # wo_ref      : (DEPTH, INNER, DIM) bf16
    # o_ref       : (B, NUM_CLASSES) f32

    # ---- patch embedding (+ cls token + positional embedding folded in) ----
    x = jnp.dot(patches_ref[...], pw_ref[...],
                preferred_element_type=jnp.float32) + tokb_ref[...]   # (48, 32) f32

    # additive key mask: columns >= SEQ (padded tokens) get a huge negative bias
    key_pos = jax.lax.broadcasted_iota(jnp.int32, (1, 1, SEQ_PAD), 2)
    key_mask = jnp.where(key_pos < SEQ, 0.0, NEG_BIG).astype(jnp.float32)

    # ---------------------- transformer layers (static) ----------------------
    for l in range(DEPTH):                                    # DEPTH = 2 unroll
        # --- PreNorm multi-head self-attention + residual ---
        xn = _layernorm(x, ln1g_ref[l], ln1b_ref[l])          # (48, 32) f32
        qkv = jnp.dot(xn.astype(jnp.bfloat16), wqkv_ref[l],
                      preferred_element_type=jnp.float32)     # (48, 96) f32

        # split q/k/v + heads with static lane/sublane slices, stack into one
        # leading (B*HEADS) batch dim so scores/softmax/AV run as one region.
        def bh_stack(base):
            return jnp.stack(
                [qkv[b * SEQ_PAD:(b + 1) * SEQ_PAD,
                     base + h * DIM_HEAD: base + (h + 1) * DIM_HEAD]
                 for b in range(B) for h in range(HEADS)]
            ).astype(jnp.bfloat16)                            # (B*HEADS, 24, 16)

        q = bh_stack(0)
        k = bh_stack(INNER)
        v = bh_stack(2 * INNER)

        s = jnp.einsum('nqd,nkd->nqk', q, k,
                       preferred_element_type=jnp.float32) * SCALE + key_mask
        s = s - jnp.max(s, axis=-1, keepdims=True)
        p = jnp.exp(s)
        # TODO(synk): approx reciprocal (EUP) -> logits won't bit-match an exact softmax.
        p = p * pl.reciprocal(jnp.sum(p, axis=-1, keepdims=True), approx=True)

        oh = jnp.einsum('nqk,nkd->nqd', p.astype(jnp.bfloat16), v,
                        preferred_element_type=jnp.float32)   # (B*HEADS, 24, 16)

        # lay heads along lanes -> (B*SEQ_PAD, INNER) slab, then one projection
        oh_flat = jnp.concatenate(
            [jnp.concatenate([oh[b * HEADS + h] for h in range(HEADS)], axis=-1)
             for b in range(B)], axis=0)                       # (48, 32) f32
        attn = jnp.dot(oh_flat.astype(jnp.bfloat16), wo_ref[l],
                       preferred_element_type=jnp.float32) + bo_ref[l]
        x = x + attn

        # --- PreNorm MLP + residual ---
        xn2 = _layernorm(x, ln2g_ref[l], ln2b_ref[l])
        h1 = jnp.dot(xn2.astype(jnp.bfloat16), w1_ref[l],
                     preferred_element_type=jnp.float32) + b1_ref[l]
        # TODO(synk): PyTorch nn.GELU defaults to exact erf GELU; tanh approximation
        # is used here for robust Mosaic lowering.
        h1 = jax.nn.gelu(h1, approximate=True)
        h2 = jnp.dot(h1.astype(jnp.bfloat16), w2_ref[l],
                     preferred_element_type=jnp.float32) + b2_ref[l]
        x = x + h2

    # ------------- head: cls pooling -> LayerNorm -> Linear (one pass) -------
    cls_rows = jnp.concatenate(
        [x[b * SEQ_PAD: b * SEQ_PAD + 1, :] for b in range(B)], axis=0)  # (B, DIM)
    cn = _layernorm(cls_rows, hg_ref[...], hb_ref[...])
    o_ref[...] = jnp.dot(cn.astype(jnp.bfloat16), hw_ref[...],
                         preferred_element_type=jnp.float32) + hbias_ref[...]


# ----------------------------- wrapper / glue ----------------------------------
def _prepare_kernel_params(params):
    """Stack per-layer weights over DEPTH; cast matmul weights to bf16."""
    layers = params["layers"]
    bf = jnp.bfloat16

    def stk(name, dtype=jnp.float32):
        return jnp.stack([lyr[name] for lyr in layers], axis=0).astype(dtype)

    return (stk("ln1_g"), stk("ln1_b"),
            stk("wqkv", bf), stk("wo", bf), stk("bo"),
            stk("ln2_g"), stk("ln2_b"),
            stk("w1", bf), stk("b1"), stk("w2", bf), stk("b2"),
            params["head_g"], params["head_b"],
            params["head_w"].astype(bf), params["head_bias"])


def vit_forward(img, params):
    bsz, c, hh, ww = img.shape
    assert bsz == B
    hp, wp = hh // PATCH, ww // PATCH
    # glue: Rearrange('b c (h p1) (w p2) -> b (h w) (p1 p2 c)')
    x = img.reshape(bsz, c, hp, PATCH, wp, PATCH)
    x = jnp.transpose(x, (0, 2, 4, 3, 5, 1))                  # b h w p1 p2 c
    patches = x.reshape(bsz, hp * wp, PATCH_DIM)

    # one (B*SEQ_PAD, PATCH_DIM) slab: per batch [zero cls row | 16 patches | 7 zero pads]
    patches_ext = jnp.zeros((bsz, SEQ_PAD, PATCH_DIM), jnp.float32)
    patches_ext = patches_ext.at[:, 1:SEQ, :].set(patches)
    patches_slab = patches_ext.reshape(bsz * SEQ_PAD, PATCH_DIM).astype(jnp.bfloat16)

    # per-row token bias: row0 = cls + pos[0]; rows 1..16 = patch_b + pos[1:]; pads = 0
    tok_bias = jnp.zeros((SEQ_PAD, DIM), jnp.float32)
    tok_bias = tok_bias.at[0:1].set(params["cls"] + params["pos"][0:1])
    tok_bias = tok_bias.at[1:SEQ].set(params["patch_b"] + params["pos"][1:SEQ])
    tok_slab = jnp.tile(tok_bias, (bsz, 1))                   # (B*SEQ_PAD, DIM)

    pw = params["patch_w"].astype(jnp.bfloat16)
    kernel_params = _prepare_kernel_params(params)

    n_inputs = 3 + len(kernel_params)
    vmem_spec = pl.BlockSpec(memory_space=pltpu.MemorySpace.VMEM)

    # Single fused pallas_call: no grid, every operand fully resident in VMEM
    # (total footprint well under 1 MiB on v5e/v6e/v7x).
    return pl.pallas_call(
        vit_fused_kernel,
        out_shape=jax.ShapeDtypeStruct((bsz, NUM_CLASSES), jnp.float32),
        in_specs=[vmem_spec] * n_inputs,
        out_specs=vmem_spec,
        compiler_params=pltpu.CompilerParams(vmem_limit_bytes=32 * 1024 * 1024),
    )(patches_slab, pw, tok_slab, *kernel_params)


# --------------------------- parameter construction ---------------------------
def init_params(key):
    keys = iter(jax.random.split(key, 64))

    def nrm(shape, scale=0.02):
        return (scale * jax.random.normal(next(keys), shape)).astype(jnp.float32)

    params = {
        "patch_w": nrm((PATCH_DIM, DIM)),
        "patch_b": jnp.zeros((1, DIM), jnp.float32),
        "cls": nrm((1, DIM)),
        "pos": nrm((SEQ, DIM)),
        "head_g": jnp.ones((1, DIM), jnp.float32),
        "head_b": jnp.zeros((1, DIM), jnp.float32),
        "head_w": nrm((DIM, NUM_CLASSES)),
        "head_bias": jnp.zeros((1, NUM_CLASSES), jnp.float32),
        "layers": [],
    }
    for _ in range(DEPTH):
        params["layers"].append({
            "ln1_g": jnp.ones((1, DIM), jnp.float32),
            "ln1_b": jnp.zeros((1, DIM), jnp.float32),
            "wqkv": nrm((DIM, 3 * INNER)),        # to_qkv has no bias
            "wo": nrm((INNER, DIM)),
            "bo": jnp.zeros((1, DIM), jnp.float32),
            "ln2_g": jnp.ones((1, DIM), jnp.float32),
            "ln2_b": jnp.zeros((1, DIM), jnp.float32),
            "w1": nrm((DIM, MLP_DIM)),
            "b1": jnp.zeros((1, MLP_DIM), jnp.float32),
            "w2": nrm((MLP_DIM, DIM)),
            "b2": jnp.zeros((1, DIM), jnp.float32),
        })
    return params


if __name__ == "__main__":
    key = jax.random.PRNGKey(0)
    k_img, k_par = jax.random.split(key)
    img = jax.random.normal(k_img, (B, CHANNELS, IMAGE, IMAGE), jnp.float32)
    params = init_params(k_par)

    fwd = jax.jit(vit_forward)
    logits = jax.block_until_ready(fwd(img, params))
    assert logits.shape == (B, NUM_CLASSES) and logits.dtype == jnp.float32
    assert bool(jnp.all(jnp.isfinite(logits)))
    print("KERNEL_OK")
</pallas_src>

<mosaic_0001>
module attributes {stable_mosaic.version = 11 : i64} {
  func.func @vit_fused_kernel(%arg0: memref<48x48xbf16, #tpu.memory_space<vmem>>, %arg1: memref<48x32xbf16, #tpu.memory_space<vmem>>, %arg2: memref<48x32xf32, #tpu.memory_space<vmem>>, %arg3: memref<2x1x32xf32, #tpu.memory_space<vmem>>, %arg4: memref<2x1x32xf32, #tpu.memory_space<vmem>>, %arg5: memref<2x32x96xbf16, #tpu.memory_space<vmem>>, %arg6: memref<2x32x32xbf16, #tpu.memory_space<vmem>>, %arg7: memref<2x1x32xf32, #tpu.memory_space<vmem>>, %arg8: memref<2x1x32xf32, #tpu.memory_space<vmem>>, %arg9: memref<2x1x32xf32, #tpu.memory_space<vmem>>, %arg10: memref<2x32x64xbf16, #tpu.memory_space<vmem>>, %arg11: memref<2x1x64xf32, #tpu.memory_space<vmem>>, %arg12: memref<2x64x32xbf16, #tpu.memory_space<vmem>>, %arg13: memref<2x1x32xf32, #tpu.memory_space<vmem>>, %arg14: memref<1x32xf32, #tpu.memory_space<vmem>>, %arg15: memref<1x32xf32, #tpu.memory_space<vmem>>, %arg16: memref<32x10xbf16, #tpu.memory_space<vmem>>, %arg17: memref<1x10xf32, #tpu.memory_space<vmem>>, %arg18: memref<2x10xf32, #tpu.memory_space<vmem>>) attributes {dimension_semantics = [], scalar_prefetch = 0 : i64, scratch_operands = 0 : i64, tpu.core_type = #tpu.core_type<tc>} {
    %c0 = arith.constant 0 : index
    %c0_0 = arith.constant 0 : index
    %0 = vector.load %arg0[%c0, %c0_0] : memref<48x48xbf16, #tpu.memory_space<vmem>>, vector<48x48xbf16>
    %c0_1 = arith.constant 0 : index
    %c0_2 = arith.constant 0 : index
    %1 = vector.load %arg1[%c0_1, %c0_2] : memref<48x32xbf16, #tpu.memory_space<vmem>>, vector<48x32xbf16>
    %cst = arith.constant dense<0.000000e+00> : vector<48x32xf32>
    %2 = tpu.matmul %0, %1, %cst {dimension_numbers = #tpu.dot_dimension_numbers<[1], [0], [0], [1], [0, 0, 1, 1], [], []>} : vector<48x48xbf16>, vector<48x32xbf16>, vector<48x32xf32> -> vector<48x32xf32>
    %c0_3 = arith.constant 0 : index
    %c0_4 = arith.constant 0 : index
    %3 = vector.load %arg2[%c0_3, %c0_4] : memref<48x32xf32, #tpu.memory_space<vmem>>, vector<48x32xf32>
    %4 = arith.addf %2, %3 : vector<48x32xf32>
    %5 = tpu.iota {dimensions = array<i32: 2>} : vector<1x1x24xi32>
    %c17_i32 = arith.constant 17 : i32
    %6 = vector.broadcast %c17_i32 : i32 to vector<1x1x24xi32>
    %7 = arith.cmpi slt, %5, %6 : vector<1x1x24xi32>
    %cst_5 = arith.constant 0.000000e+00 : f32
    %cst_6 = arith.constant -1.000000e+30 : f32
    %8 = vector.broadcast %cst_5 : f32 to vector<1x1x24xf32>
    %9 = vector.broadcast %cst_6 : f32 to vector<1x1x24xf32>
    %10 = arith.select %7, %8, %9 : vector<1x1x24xi1>, vector<1x1x24xf32>
    %c0_7 = arith.constant 0 : index
    %c0_8 = arith.constant 0 : index
    %c0_9 = arith.constant 0 : index
    %11 = vector.load %arg3[%c0_7, %c0_8, %c0_9] : memref<2x1x32xf32, #tpu.memory_space<vmem>>, vector<1x1x32xf32>
    %12 = vector.shape_cast %11 : vector<1x1x32xf32> to vector<1x32xf32>
    %c0_10 = arith.constant 0 : index
    %c0_11 = arith.constant 0 : index
    %c0_12 = arith.constant 0 : index
    %13 = vector.load %arg4[%c0_10, %c0_11, %c0_12] : memref<2x1x32xf32, #tpu.memory_space<vmem>>, vector<1x1x32xf32>
    %14 = vector.shape_cast %13 : vector<1x1x32xf32> to vector<1x32xf32>
    %cst_13 = arith.constant dense<0.000000e+00> : vector<48xf32>
    %15 = vector.multi_reduction <add>, %4, %cst_13 [1] : vector<48x32xf32> to vector<48xf32>
    %16 = vector.shape_cast %15 : vector<48xf32> to vector<48x1xf32>
    %cst_14 = arith.constant 3.200000e+01 : f32
    %17 = vector.broadcast %cst_14 : f32 to vector<48x1xf32>
    %18 = arith.divf %16, %17 : vector<48x1xf32>
    %19 = arith.mulf %4, %4 : vector<48x32xf32>
    %cst_15 = arith.constant dense<0.000000e+00> : vector<48xf32>
    %20 = vector.multi_reduction <add>, %19, %cst_15 [1] : vector<48x32xf32> to vector<48xf32>
    %21 = vector.shape_cast %20 : vector<48xf32> to vector<48x1xf32>
    %cst_16 = arith.constant 3.200000e+01 : f32
    %22 = vector.broadcast %cst_16 : f32 to vector<48x1xf32>
    %23 = arith.divf %21, %22 : vector<48x1xf32>
    %24 = arith.mulf %18, %18 : vector<48x1xf32>
    %25 = arith.subf %23, %24 : vector<48x1xf32>
    %26 = vector.broadcast %18 : vector<48x1xf32> to vector<48x32xf32>
    %27 = arith.subf %4, %26 : vector<48x32xf32>
    %cst_17 = arith.constant 9.99999974E-6 : f32
    %28 = vector.broadcast %cst_17 : f32 to vector<48x1xf32>
    %29 = arith.addf %25, %28 : vector<48x1xf32>
    %30 = math.rsqrt %29 : vector<48x1xf32>
    %31 = vector.broadcast %30 : vector<48x1xf32> to vector<48x32xf32>
    %32 = arith.mulf %27, %31 : vector<48x32xf32>
    %33 = vector.broadcast %12 : vector<1x32xf32> to vector<48x32xf32>
    %34 = arith.mulf %32, %33 : vector<48x32xf32>
    %35 = vector.broadcast %14 : vector<1x32xf32> to vector<48x32xf32>
    %36 = arith.addf %34, %35 : vector<48x32xf32>
    %37 = arith.truncf %36 : vector<48x32xf32> to vector<48x32xbf16>
    %c0_18 = arith.constant 0 : index
    %c0_19 = arith.constant 0 : index
    %c0_20 = arith.constant 0 : index
    %38 = vector.load %arg5[%c0_18, %c0_19, %c0_20] : memref<2x32x96xbf16, #tpu.memory_space<vmem>>, vector<1x32x96xbf16>
    %39 = vector.shape_cast %38 : vector<1x32x96xbf16> to vector<32x96xbf16>
    %cst_21 = arith.constant dense<0.000000e+00> : vector<48x96xf32>
    %40 = tpu.matmul %37, %39, %cst_21 {dimension_numbers = #tpu.dot_dimension_numbers<[1], [0], [0], [1], [0, 0, 1, 1], [], []>} : vector<48x32xbf16>, vector<32x96xbf16>, vector<48x96xf32> -> vector<48x96xf32>
    %41 = vector.extract_strided_slice %40 {offsets = [0, 0], sizes = [24, 16], strides = [1, 1]} : vector<48x96xf32> to vector<24x16xf32>
    %42 = vector.extract_strided_slice %40 {offsets = [0, 16], sizes = [24, 16], strides = [1, 1]} : vector<48x96xf32> to vector<24x16xf32>
    %43 = vector.extract_strided_slice %40 {offsets = [24, 0], sizes = [24, 16], strides = [1, 1]} : vector<48x96xf32> to vector<24x16xf32>
    %44 = vector.extract_strided_slice %40 {offsets = [24, 16], sizes = [24, 16], strides = [1, 1]} : vector<48x96xf32> to vector<24x16xf32>
    %45 = vector.shape_cast %41 : vector<24x16xf32> to vector<1x24x16xf32>
    %46 = vector.shape_cast %42 : vector<24x16xf32> to vector<1x24x16xf32>
    %47 = vector.shape_cast %43 : vector<24x16xf32> to vector<1x24x16xf32>
    %48 = vector.shape_cast %44 : vector<24x16xf32> to vector<1x24x16xf32>
    %49 = tpu.concatenate %45, %46, %47, %48 in 0 : vector<1x24x16xf32>, vector<1x24x16xf32>, vector<1x24x16xf32>, vector<1x24x16xf32> -> vector<4x24x16xf32>
    %50 = arith.truncf %49 : vector<4x24x16xf32> to vector<4x24x16xbf16>
    %51 = vector.extract_strided_slice %40 {offsets = [0, 32], sizes = [24, 16], strides = [1, 1]} : vector<48x96xf32> to vector<24x16xf32>
    %52 = vector.extract_strided_slice %40 {offsets = [0, 48], sizes = [24, 16], strides = [1, 1]} : vector<48x96xf32> to vector<24x16xf32>
    %53 = vector.extract_strided_slice %40 {offsets = [24, 32], sizes = [24, 16], strides = [1, 1]} : vector<48x96xf32> to vector<24x16xf32>
    %54 = vector.extract_strided_slice %40 {offsets = [24, 48], sizes = [24, 16], strides = [1, 1]} : vector<48x96xf32> to vector<24x16xf32>
    %55 = vector.shape_cast %51 : vector<24x16xf32> to vector<1x24x16xf32>
    %56 = vector.shape_cast %52 : vector<24x16xf32> to vector<1x24x16xf32>
    %57 = vector.shape_cast %53 : vector<24x16xf32> to vector<1x24x16xf32>
    %58 = vector.shape_cast %54 : vector<24x16xf32> to vector<1x24x16xf32>
    %59 = tpu.concatenate %55, %56, %57, %58 in 0 : vector<1x24x16xf32>, vector<1x24x16xf32>, vector<1x24x16xf32>, vector<1x24x16xf32> -> vector<4x24x16xf32>
    %60 = arith.truncf %59 : vector<4x24x16xf32> to vector<4x24x16xbf16>
    %61 = vector.extract_strided_slice %40 {offsets = [0, 64], sizes = [24, 16], strides = [1, 1]} : vector<48x96xf32> to vector<24x16xf32>
    %62 = vector.extract_strided_slice %40 {offsets = [0, 80], sizes = [24, 16], strides = [1, 1]} : vector<48x96xf32> to vector<24x16xf32>
    %63 = vector.extract_strided_slice %40 {offsets = [24, 64], sizes = [24, 16], strides = [1, 1]} : vector<48x96xf32> to vector<24x16xf32>
    %64 = vector.extract_strided_slice %40 {offsets = [24, 80], sizes = [24, 16], strides = [1, 1]} : vector<48x96xf32> to vector<24x16xf32>
    %65 = vector.shape_cast %61 : vector<24x16xf32> to vector<1x24x16xf32>
    %66 = vector.shape_cast %62 : vector<24x16xf32> to vector<1x24x16xf32>
    %67 = vector.shape_cast %63 : vector<24x16xf32> to vector<1x24x16xf32>
    %68 = vector.shape_cast %64 : vector<24x16xf32> to vector<1x24x16xf32>
    %69 = tpu.concatenate %65, %66, %67, %68 in 0 : vector<1x24x16xf32>, vector<1x24x16xf32>, vector<1x24x16xf32>, vector<1x24x16xf32> -> vector<4x24x16xf32>
    %70 = arith.truncf %69 : vector<4x24x16xf32> to vector<4x24x16xbf16>
    "tpu.trace_start"() <{level = 10 : i32, message = "nqd,nkd->nqk"}> : () -> ()
    %cst_22 = arith.constant dense<0.000000e+00> : vector<4x24x24xf32>
    %71 = tpu.matmul %50, %60, %cst_22 {dimension_numbers = #tpu.dot_dimension_numbers<[2], [2], [1], [1], [0, 0, 0, 1, 1, 1], [0], [0]>} : vector<4x24x16xbf16>, vector<4x24x16xbf16>, vector<4x24x24xf32> -> vector<4x24x24xf32>
    "tpu.trace_stop"() : () -> ()
    %cst_23 = arith.constant 2.500000e-01 : f32
    %72 = vector.broadcast %cst_23 : f32 to vector<4x24x24xf32>
    %73 = arith.mulf %71, %72 : vector<4x24x24xf32>
    %74 = vector.broadcast %10 : vector<1x1x24xf32> to vector<4x24x24xf32>
    %75 = arith.addf %73, %74 : vector<4x24x24xf32>
    %cst_24 = arith.constant dense<0xFF800000> : vector<4x24xf32>
    %76 = vector.multi_reduction <maximumf>, %75, %cst_24 [2] : vector<4x24x24xf32> to vector<4x24xf32>
    %77 = vector.shape_cast %76 : vector<4x24xf32> to vector<4x24x1xf32>
    %78 = vector.broadcast %77 : vector<4x24x1xf32> to vector<4x24x24xf32>
    %79 = arith.subf %75, %78 : vector<4x24x24xf32>
    %80 = math.exp %79 : vector<4x24x24xf32>
    %cst_25 = arith.constant dense<0.000000e+00> : vector<4x24xf32>
    %81 = vector.multi_reduction <add>, %80, %cst_25 [2] : vector<4x24x24xf32> to vector<4x24xf32>
    %82 = vector.shape_cast %81 : vector<4x24xf32> to vector<4x24x1xf32>
    %83 = tpu.reciprocal %82 {approx = true} : vector<4x24x1xf32> -> vector<4x24x1xf32>
    %84 = vector.broadcast %83 : vector<4x24x1xf32> to vector<4x24x24xf32>
    %85 = arith.mulf %80, %84 : vector<4x24x24xf32>
    %86 = arith.truncf %85 : vector<4x24x24xf32> to vector<4x24x24xbf16>
    "tpu.trace_start"() <{level = 10 : i32, message = "nqk,nkd->nqd"}> : () -> ()
    %cst_26 = arith.constant dense<0.000000e+00> : vector<4x24x16xf32>
    %87 = tpu.matmul %86, %70, %cst_26 {dimension_numbers = #tpu.dot_dimension_numbers<[2], [1], [1], [2], [0, 0, 0, 1, 1, 2], [0], [0]>} : vector<4x24x24xbf16>, vector<4x24x16xbf16>, vector<4x24x16xf32> -> vector<4x24x16xf32>
    "tpu.trace_stop"() : () -> ()
    %88 = vector.extract_strided_slice %87 {offsets = [0, 0, 0], sizes = [1, 24, 16], strides = [1, 1, 1]} : vector<4x24x16xf32> to vector<1x24x16xf32>
    %89 = vector.shape_cast %88 : vector<1x24x16xf32> to vector<24x16xf32>
    %90 = vector.extract_strided_slice %87 {offsets = [1, 0, 0], sizes = [1, 24, 16], strides = [1, 1, 1]} : vector<4x24x16xf32> to vector<1x24x16xf32>
    %91 = vector.shape_cast %90 : vector<1x24x16xf32> to vector<24x16xf32>
    %92 = tpu.concatenate %89, %91 in 1 : vector<24x16xf32>, vector<24x16xf32> -> vector<24x32xf32>
    %93 = vector.extract_strided_slice %87 {offsets = [2, 0, 0], sizes = [1, 24, 16], strides = [1, 1, 1]} : vector<4x24x16xf32> to vector<1x24x16xf32>
    %94 = vector.shape_cast %93 : vector<1x24x16xf32> to vector<24x16xf32>
    %95 = vector.extract_strided_slice %87 {offsets = [3, 0, 0], sizes = [1, 24, 16], strides = [1, 1, 1]} : vector<4x24x16xf32> to vector<1x24x16xf32>
    %96 = vector.shape_cast %95 : vector<1x24x16xf32> to vector<24x16xf32>
    %97 = tpu.concatenate %94, %96 in 1 : vector<24x16xf32>, vector<24x16xf32> -> vector<24x32xf32>
    %98 = tpu.concatenate %92, %97 in 0 : vector<24x32xf32>, vector<24x32xf32> -> vector<48x32xf32>
    %99 = arith.truncf %98 : vector<48x32xf32> to vector<48x32xbf16>
    %c0_27 = arith.constant 0 : index
    %c0_28 = arith.constant 0 : index
    %c0_29 = arith.constant 0 : index
    %100 = vector.load %arg6[%c0_27, %c0_28, %c0_29] : memref<2x32x32xbf16, #tpu.memory_space<vmem>>, vector<1x32x32xbf16>
    %101 = vector.shape_cast %100 : vector<1x32x32xbf16> to vector<32x32xbf16>
    %cst_30 = arith.constant dense<0.000000e+00> : vector<48x32xf32>
    %102 = tpu.matmul %99, %101, %cst_30 {dimension_numbers = #tpu.dot_dimension_numbers<[1], [0], [0], [1], [0, 0, 1, 1], [], []>} : vector<48x32xbf16>, vector<32x32xbf16>, vector<48x32xf32> -> vector<48x32xf32>
    %c0_31 = arith.constant 0 : index
    %c0_32 = arith.constant 0 : index
    %c0_33 = arith.constant 0 : index
    %103 = vector.load %arg7[%c0_31, %c0_32, %c0_33] : memref<2x1x32xf32, #tpu.memory_space<vmem>>, vector<1x1x32xf32>
    %104 = vector.shape_cast %103 : vector<1x1x32xf32> to vector<1x32xf32>
    %105 = vector.broadcast %104 : vector<1x32xf32> to vector<48x32xf32>
    %106 = arith.addf %102, %105 : vector<48x32xf32>
    %107 = arith.addf %4, %106 : vector<48x32xf32>
    %c0_34 = arith.constant 0 : index
    %c0_35 = arith.constant 0 : index
    %c0_36 = arith.constant 0 : index
    %108 = vector.load %arg8[%c0_34, %c0_35, %c0_36] : memref<2x1x32xf32, #tpu.memory_space<vmem>>, vector<1x1x32xf32>
    %109 = vector.shape_cast %108 : vector<1x1x32xf32> to vector<1x32xf32>
    %c0_37 = arith.constant 0 : index
    %c0_38 = arith.constant 0 : index
    %c0_39 = arith.constant 0 : index
    %110 = vector.load %arg9[%c0_37, %c0_38, %c0_39] : memref<2x1x32xf32, #tpu.memory_space<vmem>>, vector<1x1x32xf32>
    %111 = vector.shape_cast %110 : vector<1x1x32xf32> to vector<1x32xf32>
    %cst_40 = arith.constant dense<0.000000e+00> : vector<48xf32>
    %112 = vector.multi_reduction <add>, %107, %cst_40 [1] : vector<48x32xf32> to vector<48xf32>
    %113 = vector.shape_cast %112 : vector<48xf32> to vector<48x1xf32>
    %cst_41 = arith.constant 3.200000e+01 : f32
    %114 = vector.broadcast %cst_41 : f32 to vector<48x1xf32>
    %115 = arith.divf %113, %114 : vector<48x1xf32>
    %116 = arith.mulf %107, %107 : vector<48x32xf32>
    %cst_42 = arith.constant dense<0.000000e+00> : vector<48xf32>
    %117 = vector.multi_reduction <add>, %116, %cst_42 [1] : vector<48x32xf32> to vector<48xf32>
    %118 = vector.shape_cast %117 : vector<48xf32> to vector<48x1xf32>
    %cst_43 = arith.constant 3.200000e+01 : f32
    %119 = vector.broadcast %cst_43 : f32 to vector<48x1xf32>
    %120 = arith.divf %118, %119 : vector<48x1xf32>
    %121 = arith.mulf %115, %115 : vector<48x1xf32>
    %122 = arith.subf %120, %121 : vector<48x1xf32>
    %123 = vector.broadcast %115 : vector<48x1xf32> to vector<48x32xf32>
    %124 = arith.subf %107, %123 : vector<48x32xf32>
    %cst_44 = arith.constant 9.99999974E-6 : f32
    %125 = vector.broadcast %cst_44 : f32 to vector<48x1xf32>
    %126 = arith.addf %122, %125 : vector<48x1xf32>
    %127 = math.rsqrt %126 : vector<48x1xf32>
    %128 = vector.broadcast %127 : vector<48x1xf32> to vector<48x32xf32>
    %129 = arith.mulf %124, %128 : vector<48x32xf32>
    %130 = vector.broadcast %109 : vector<1x32xf32> to vector<48x32xf32>
    %131 = arith.mulf %129, %130 : vector<48x32xf32>
    %132 = vector.broadcast %111 : vector<1x32xf32> to vector<48x32xf32>
    %133 = arith.addf %131, %132 : vector<48x32xf32>
    %134 = arith.truncf %133 : vector<48x32xf32> to vector<48x32xbf16>
    %c0_45 = arith.constant 0 : index
    %c0_46 = arith.constant 0 : index
    %c0_47 = arith.constant 0 : index
    %135 = vector.load %arg10[%c0_45, %c0_46, %c0_47] : memref<2x32x64xbf16, #tpu.memory_space<vmem>>, vector<1x32x64xbf16>
    %136 = vector.shape_cast %135 : vector<1x32x64xbf16> to vector<32x64xbf16>
    %cst_48 = arith.constant dense<0.000000e+00> : vector<48x64xf32>
    %137 = tpu.matmul %134, %136, %cst_48 {dimension_numbers = #tpu.dot_dimension_numbers<[1], [0], [0], [1], [0, 0, 1, 1], [], []>} : vector<48x32xbf16>, vector<32x64xbf16>, vector<48x64xf32> -> vector<48x64xf32>
    %c0_49 = arith.constant 0 : index
    %c0_50 = arith.constant 0 : index
    %c0_51 = arith.constant 0 : index
    %138 = vector.load %arg11[%c0_49, %c0_50, %c0_51] : memref<2x1x64xf32, #tpu.memory_space<vmem>>, vector<1x1x64xf32>
    %139 = vector.shape_cast %138 : vector<1x1x64xf32> to vector<1x64xf32>
    %140 = vector.broadcast %139 : vector<1x64xf32> to vector<48x64xf32>
    %141 = arith.addf %137, %140 : vector<48x64xf32>
    %142 = arith.mulf %141, %141 : vector<48x64xf32>
    %143 = arith.mulf %141, %142 : vector<48x64xf32>
    %cst_52 = arith.constant 4.471500e-02 : f32
    %144 = vector.broadcast %cst_52 : f32 to vector<48x64xf32>
    %145 = arith.mulf %144, %143 : vector<48x64xf32>
    %146 = arith.addf %141, %145 : vector<48x64xf32>
    %cst_53 = arith.constant 0.797884583 : f32
    %147 = vector.broadcast %cst_53 : f32 to vector<48x64xf32>
    %148 = arith.mulf %147, %146 : vector<48x64xf32>
    %149 = math.tanh %148 : vector<48x64xf32>
    %cst_54 = arith.constant 1.000000e+00 : f32
    %150 = vector.broadcast %cst_54 : f32 to vector<48x64xf32>
    %151 = arith.addf %150, %149 : vector<48x64xf32>
    %cst_55 = arith.constant 5.000000e-01 : f32
    %152 = vector.broadcast %cst_55 : f32 to vector<48x64xf32>
    %153 = arith.mulf %152, %151 : vector<48x64xf32>
    %154 = arith.mulf %141, %153 : vector<48x64xf32>
    %155 = arith.truncf %154 : vector<48x64xf32> to vector<48x64xbf16>
    %c0_56 = arith.constant 0 : index
    %c0_57 = arith.constant 0 : index
    %c0_58 = arith.constant 0 : index
    %156 = vector.load %arg12[%c0_56, %c0_57, %c0_58] : memref<2x64x32xbf16, #tpu.memory_space<vmem>>, vector<1x64x32xbf16>
    %157 = vector.shape_cast %156 : vector<1x64x32xbf16> to vector<64x32xbf16>
    %cst_59 = arith.constant dense<0.000000e+00> : vector<48x32xf32>
    %158 = tpu.matmul %155, %157, %cst_59 {dimension_numbers = #tpu.dot_dimension_numbers<[1], [0], [0], [1], [0, 0, 1, 1], [], []>} : vector<48x64xbf16>, vector<64x32xbf16>, vector<48x32xf32> -> vector<48x32xf32>
    %c0_60 = arith.constant 0 : index
    %c0_61 = arith.constant 0 : index
    %c0_62 = arith.constant 0 : index
    %159 = vector.load %arg13[%c0_60, %c0_61, %c0_62] : memref<2x1x32xf32, #tpu.memory_space<vmem>>, vector<1x1x32xf32>
    %160 = vector.shape_cast %159 : vector<1x1x32xf32> to vector<1x32xf32>
    %161 = vector.broadcast %160 : vector<1x32xf32> to vector<48x32xf32>
    %162 = arith.addf %158, %161 : vector<48x32xf32>
    %163 = arith.addf %107, %162 : vector<48x32xf32>
    %c1 = arith.constant 1 : index
    %c0_63 = arith.constant 0 : index
    %c0_64 = arith.constant 0 : index
    %164 = vector.load %arg3[%c1, %c0_63, %c0_64] : memref<2x1x32xf32, #tpu.memory_space<vmem>>, vector<1x1x32xf32>
    %165 = vector.shape_cast %164 : vector<1x1x32xf32> to vector<1x32xf32>
    %c1_65 = arith.constant 1 : index
    %c0_66 = arith.constant 0 : index
    %c0_67 = arith.constant 0 : index
    %166 = vector.load %arg4[%c1_65, %c0_66, %c0_67] : memref<2x1x32xf32, #tpu.memory_space<vmem>>, vector<1x1x32xf32>
    %167 = vector.shape_cast %166 : vector<1x1x32xf32> to vector<1x32xf32>
    %cst_68 = arith.constant dense<0.000000e+00> : vector<48xf32>
    %168 = vector.multi_reduction <add>, %163, %cst_68 [1] : vector<48x32xf32> to vector<48xf32>
    %169 = vector.shape_cast %168 : vector<48xf32> to vector<48x1xf32>
    %cst_69 = arith.constant 3.200000e+01 : f32
    %170 = vector.broadcast %cst_69 : f32 to vector<48x1xf32>
    %171 = arith.divf %169, %170 : vector<48x1xf32>
    %172 = arith.mulf %163, %163 : vector<48x32xf32>
    %cst_70 = arith.constant dense<0.000000e+00> : vector<48xf32>
    %173 = vector.multi_reduction <add>, %172, %cst_70 [1] : vector<48x32xf32> to vector<48xf32>
    %174 = vector.shape_cast %173 : vector<48xf32> to vector<48x1xf32>
    %cst_71 = arith.constant 3.200000e+01 : f32
    %175 = vector.broadcast %cst_71 : f32 to vector<48x1xf32>
    %176 = arith.divf %174, %175 : vector<48x1xf32>
    %177 = arith.mulf %171, %171 : vector<48x1xf32>
    %178 = arith.subf %176, %177 : vector<48x1xf32>
    %179 = vector.broadcast %171 : vector<48x1xf32> to vector<48x32xf32>
    %180 = arith.subf %163, %179 : vector<48x32xf32>
    %cst_72 = arith.constant 9.99999974E-6 : f32
    %181 = vector.broadcast %cst_72 : f32 to vector<48x1xf32>
    %182 = arith.addf %178, %181 : vector<48x1xf32>
    %183 = math.rsqrt %182 : vector<48x1xf32>
    %184 = vector.broadcast %183 : vector<48x1xf32> to vector<48x32xf32>
    %185 = arith.mulf %180, %184 : vector<48x32xf32>
    %186 = vector.broadcast %165 : vector<1x32xf32> to vector<48x32xf32>
    %187 = arith.mulf %185, %186 : vector<48x32xf32>
    %188 = vector.broadcast %167 : vector<1x32xf32> to vector<48x32xf32>
    %189 = arith.addf %187, %188 : vector<48x32xf32>
    %190 = arith.truncf %189 : vector<48x32xf32> to vector<48x32xbf16>
    %c1_73 = arith.constant 1 : index
    %c0_74 = arith.constant 0 : index
    %c0_75 = arith.constant 0 : index
    %191 = vector.load %arg5[%c1_73, %c0_74, %c0_75] : memref<2x32x96xbf16, #tpu.memory_space<vmem>>, vector<1x32x96xbf16>
    %192 = vector.shape_cast %191 : vector<1x32x96xbf16> to vector<32x96xbf16>
    %cst_76 = arith.constant dense<0.000000e+00> : vector<48x96xf32>
    %193 = tpu.matmul %190, %192, %cst_76 {dimension_numbers = #tpu.dot_dimension_numbers<[1], [0], [0], [1], [0, 0, 1, 1], [], []>} : vector<48x32xbf16>, vector<32x96xbf16>, vector<48x96xf32> -> vector<48x96xf32>
    %194 = vector.extract_strided_slice %193 {offsets = [0, 0], sizes = [24, 16], strides = [1, 1]} : vector<48x96xf32> to vector<24x16xf32>
    %195 = vector.extract_strided_slice %193 {offsets = [0, 16], sizes = [24, 16], strides = [1, 1]} : vector<48x96xf32> to vector<24x16xf32>
    %196 = vector.extract_strided_slice %193 {offsets = [24, 0], sizes = [24, 16], strides = [1, 1]} : vector<48x96xf32> to vector<24x16xf32>
    %197 = vector.extract_strided_slice %193 {offsets = [24, 16], sizes = [24, 16], strides = [1, 1]} : vector<48x96xf32> to vector<24x16xf32>
    %198 = vector.shape_cast %194 : vector<24x16xf32> to vector<1x24x16xf32>
    %199 = vector.shape_cast %195 : vector<24x16xf32> to vector<1x24x16xf32>
    %200 = vector.shape_cast %196 : vector<24x16xf32> to vector<1x24x16xf32>
    %201 = vector.shape_cast %197 : vector<24x16xf32> to vector<1x24x16xf32>
    %202 = tpu.concatenate %198, %199, %200, %201 in 0 : vector<1x24x16xf32>, vector<1x24x16xf32>, vector<1x24x16xf32>, vector<1x24x16xf32> -> vector<4x24x16xf32>
    %203 = arith.truncf %202 : vector<4x24x16xf32> to vector<4x24x16xbf16>
    %204 = vector.extract_strided_slice %193 {offsets = [0, 32], sizes = [24, 16], strides = [1, 1]} : vector<48x96xf32> to vector<24x16xf32>
    %205 = vector.extract_strided_slice %193 {offsets = [0, 48], sizes = [24, 16], strides = [1, 1]} : vector<48x96xf32> to vector<24x16xf32>
    %206 = vector.extract_strided_slice %193 {offsets = [24, 32], sizes = [24, 16], strides = [1, 1]} : vector<48x96xf32> to vector<24x16xf32>
    %207 = vector.extract_strided_slice %193 {offsets = [24, 48], sizes = [24, 16], strides = [1, 1]} : vector<48x96xf32> to vector<24x16xf32>
    %208 = vector.shape_cast %204 : vector<24x16xf32> to vector<1x24x16xf32>
    %209 = vector.shape_cast %205 : vector<24x16xf32> to vector<1x24x16xf32>
    %210 = vector.shape_cast %206 : vector<24x16xf32> to vector<1x24x16xf32>
    %211 = vector.shape_cast %207 : vector<24x16xf32> to vector<1x24x16xf32>
    %212 = tpu.concatenate %208, %209, %210, %211 in 0 : vector<1x24x16xf32>, vector<1x24x16xf32>, vector<1x24x16xf32>, vector<1x24x16xf32> -> vector<4x24x16xf32>
    %213 = arith.truncf %212 : vector<4x24x16xf32> to vector<4x24x16xbf16>
    %214 = vector.extract_strided_slice %193 {offsets = [0, 64], sizes = [24, 16], strides = [1, 1]} : vector<48x96xf32> to vector<24x16xf32>
    %215 = vector.extract_strided_slice %193 {offsets = [0, 80], sizes = [24, 16], strides = [1, 1]} : vector<48x96xf32> to vector<24x16xf32>
    %216 = vector.extract_strided_slice %193 {offsets = [24, 64], sizes = [24, 16], strides = [1, 1]} : vector<48x96xf32> to vector<24x16xf32>
    %217 = vector.extract_strided_slice %193 {offsets = [24, 80], sizes = [24, 16], strides = [1, 1]} : vector<48x96xf32> to vector<24x16xf32>
    %218 = vector.shape_cast %214 : vector<24x16xf32> to vector<1x24x16xf32>
    %219 = vector.shape_cast %215 : vector<24x16xf32> to vector<1x24x16xf32>
    %220 = vector.shape_cast %216 : vector<24x16xf32> to vector<1x24x16xf32>
    %221 = vector.shape_cast %217 : vector<24x16xf32> to vector<1x24x16xf32>
    %222 = tpu.concatenate %218, %219, %220, %221 in 0 : vector<1x24x16xf32>, vector<1x24x16xf32>, vector<1x24x16xf32>, vector<1x24x16xf32> -> vector<4x24x16xf32>
    %223 = arith.truncf %222 : vector<4x24x16xf32> to vector<4x24x16xbf16>
    "tpu.trace_start"() <{level = 10 : i32, message = "nqd,nkd->nqk"}> : () -> ()
    %cst_77 = arith.constant dense<0.000000e+00> : vector<4x24x24xf32>
    %224 = tpu.matmul %203, %213, %cst_77 {dimension_numbers = #tpu.dot_dimension_numbers<[2], [2], [1], [1], [0, 0, 0, 1, 1, 1], [0], [0]>} : vector<4x24x16xbf16>, vector<4x24x16xbf16>, vector<4x24x24xf32> -> vector<4x24x24xf32>
    "tpu.trace_stop"() : () -> ()
    %cst_78 = arith.constant 2.500000e-01 : f32
    %225 = vector.broadcast %cst_78 : f32 to vector<4x24x24xf32>
    %226 = arith.mulf %224, %225 : vector<4x24x24xf32>
    %227 = vector.broadcast %10 : vector<1x1x24xf32> to vector<4x24x24xf32>
    %228 = arith.addf %226, %227 : vector<4x24x24xf32>
    %cst_79 = arith.constant dense<0xFF800000> : vector<4x24xf32>
    %229 = vector.multi_reduction <maximumf>, %228, %cst_79 [2] : vector<4x24x24xf32> to vector<4x24xf32>
    %230 = vector.shape_cast %229 : vector<4x24xf32> to vector<4x24x1xf32>
    %231 = vector.broadcast %230 : vector<4x24x1xf32> to vector<4x24x24xf32>
    %232 = arith.subf %228, %231 : vector<4x24x24xf32>
    %233 = math.exp %232 : vector<4x24x24xf32>
    %cst_80 = arith.constant dense<0.000000e+00> : vector<4x24xf32>
    %234 = vector.multi_reduction <add>, %233, %cst_80 [2] : vector<4x24x24xf32> to vector<4x24xf32>
    %235 = vector.shape_cast %234 : vector<4x24xf32> to vector<4x24x1xf32>
    %236 = tpu.reciprocal %235 {approx = true} : vector<4x24x1xf32> -> vector<4x24x1xf32>
    %237 = vector.broadcast %236 : vector<4x24x1xf32> to vector<4x24x24xf32>
    %238 = arith.mulf %233, %237 : vector<4x24x24xf32>
    %239 = arith.truncf %238 : vector<4x24x24xf32> to vector<4x24x24xbf16>
    "tpu.trace_start"() <{level = 10 : i32, message = "nqk,nkd->nqd"}> : () -> ()
    %cst_81 = arith.constant dense<0.000000e+00> : vector<4x24x16xf32>
    %240 = tpu.matmul %239, %223, %cst_81 {dimension_numbers = #tpu.dot_dimension_numbers<[2], [1], [1], [2], [0, 0, 0, 1, 1, 2], [0], [0]>} : vector<4x24x24xbf16>, vector<4x24x16xbf16>, vector<4x24x16xf32> -> vector<4x24x16xf32>
    "tpu.trace_stop"() : () -> ()
    %241 = vector.extract_strided_slice %240 {offsets = [0, 0, 0], sizes = [1, 24, 16], strides = [1, 1, 1]} : vector<4x24x16xf32> to vector<1x24x16xf32>
    %242 = vector.shape_cast %241 : vector<1x24x16xf32> to vector<24x16xf32>
    %243 = vector.extract_strided_slice %240 {offsets = [1, 0, 0], sizes = [1, 24, 16], strides = [1, 1, 1]} : vector<4x24x16xf32> to vector<1x24x16xf32>
    %244 = vector.shape_cast %243 : vector<1x24x16xf32> to vector<24x16xf32>
    %245 = tpu.concatenate %242, %244 in 1 : vector<24x16xf32>, vector<24x16xf32> -> vector<24x32xf32>
    %246 = vector.extract_strided_slice %240 {offsets = [2, 0, 0], sizes = [1, 24, 16], strides = [1, 1, 1]} : vector<4x24x16xf32> to vector<1x24x16xf32>
    %247 = vector.shape_cast %246 : vector<1x24x16xf32> to vector<24x16xf32>
    %248 = vector.extract_strided_slice %240 {offsets = [3, 0, 0], sizes = [1, 24, 16], strides = [1, 1, 1]} : vector<4x24x16xf32> to vector<1x24x16xf32>
    %249 = vector.shape_cast %248 : vector<1x24x16xf32> to vector<24x16xf32>
    %250 = tpu.concatenate %247, %249 in 1 : vector<24x16xf32>, vector<24x16xf32> -> vector<24x32xf32>
    %251 = tpu.concatenate %245, %250 in 0 : vector<24x32xf32>, vector<24x32xf32> -> vector<48x32xf32>
    %252 = arith.truncf %251 : vector<48x32xf32> to vector<48x32xbf16>
    %c1_82 = arith.constant 1 : index
    %c0_83 = arith.constant 0 : index
    %c0_84 = arith.constant 0 : index
    %253 = vector.load %arg6[%c1_82, %c0_83, %c0_84] : memref<2x32x32xbf16, #tpu.memory_space<vmem>>, vector<1x32x32xbf16>
    %254 = vector.shape_cast %253 : vector<1x32x32xbf16> to vector<32x32xbf16>
    %cst_85 = arith.constant dense<0.000000e+00> : vector<48x32xf32>
    %255 = tpu.matmul %252, %254, %cst_85 {dimension_numbers = #tpu.dot_dimension_numbers<[1], [0], [0], [1], [0, 0, 1, 1], [], []>} : vector<48x32xbf16>, vector<32x32xbf16>, vector<48x32xf32> -> vector<48x32xf32>
    %c1_86 = arith.constant 1 : index
    %c0_87 = arith.constant 0 : index
    %c0_88 = arith.constant 0 : index
    %256 = vector.load %arg7[%c1_86, %c0_87, %c0_88] : memref<2x1x32xf32, #tpu.memory_space<vmem>>, vector<1x1x32xf32>
    %257 = vector.shape_cast %256 : vector<1x1x32xf32> to vector<1x32xf32>
    %258 = vector.broadcast %257 : vector<1x32xf32> to vector<48x32xf32>
    %259 = arith.addf %255, %258 : vector<48x32xf32>
    %260 = arith.addf %163, %259 : vector<48x32xf32>
    %c1_89 = arith.constant 1 : index
    %c0_90 = arith.constant 0 : index
    %c0_91 = arith.constant 0 : index
    %261 = vector.load %arg8[%c1_89, %c0_90, %c0_91] : memref<2x1x32xf32, #tpu.memory_space<vmem>>, vector<1x1x32xf32>
    %262 = vector.shape_cast %261 : vector<1x1x32xf32> to vector<1x32xf32>
    %c1_92 = arith.constant 1 : index
    %c0_93 = arith.constant 0 : index
    %c0_94 = arith.constant 0 : index
    %263 = vector.load %arg9[%c1_92, %c0_93, %c0_94] : memref<2x1x32xf32, #tpu.memory_space<vmem>>, vector<1x1x32xf32>
    %264 = vector.shape_cast %263 : vector<1x1x32xf32> to vector<1x32xf32>
    %cst_95 = arith.constant dense<0.000000e+00> : vector<48xf32>
    %265 = vector.multi_reduction <add>, %260, %cst_95 [1] : vector<48x32xf32> to vector<48xf32>
    %266 = vector.shape_cast %265 : vector<48xf32> to vector<48x1xf32>
    %cst_96 = arith.constant 3.200000e+01 : f32
    %267 = vector.broadcast %cst_96 : f32 to vector<48x1xf32>
    %268 = arith.divf %266, %267 : vector<48x1xf32>
    %269 = arith.mulf %260, %260 : vector<48x32xf32>
    %cst_97 = arith.constant dense<0.000000e+00> : vector<48xf32>
    %270 = vector.multi_reduction <add>, %269, %cst_97 [1] : vector<48x32xf32> to vector<48xf32>
    %271 = vector.shape_cast %270 : vector<48xf32> to vector<48x1xf32>
    %cst_98 = arith.constant 3.200000e+01 : f32
    %272 = vector.broadcast %cst_98 : f32 to vector<48x1xf32>
    %273 = arith.divf %271, %272 : vector<48x1xf32>
    %274 = arith.mulf %268, %268 : vector<48x1xf32>
    %275 = arith.subf %273, %274 : vector<48x1xf32>
    %276 = vector.broadcast %268 : vector<48x1xf32> to vector<48x32xf32>
    %277 = arith.subf %260, %276 : vector<48x32xf32>
    %cst_99 = arith.constant 9.99999974E-6 : f32
    %278 = vector.broadcast %cst_99 : f32 to vector<48x1xf32>
    %279 = arith.addf %275, %278 : vector<48x1xf32>
    %280 = math.rsqrt %279 : vector<48x1xf32>
    %281 = vector.broadcast %280 : vector<48x1xf32> to vector<48x32xf32>
    %282 = arith.mulf %277, %281 : vector<48x32xf32>
    %283 = vector.broadcast %262 : vector<1x32xf32> to vector<48x32xf32>
    %284 = arith.mulf %282, %283 : vector<48x32xf32>
    %285 = vector.broadcast %264 : vector<1x32xf32> to vector<48x32xf32>
    %286 = arith.addf %284, %285 : vector<48x32xf32>
    %287 = arith.truncf %286 : vector<48x32xf32> to vector<48x32xbf16>
    %c1_100 = arith.constant 1 : index
    %c0_101 = arith.constant 0 : index
    %c0_102 = arith.constant 0 : index
    %288 = vector.load %arg10[%c1_100, %c0_101, %c0_102] : memref<2x32x64xbf16, #tpu.memory_space<vmem>>, vector<1x32x64xbf16>
    %289 = vector.shape_cast %288 : vector<1x32x64xbf16> to vector<32x64xbf16>
    %cst_103 = arith.constant dense<0.000000e+00> : vector<48x64xf32>
    %290 = tpu.matmul %287, %289, %cst_103 {dimension_numbers = #tpu.dot_dimension_numbers<[1], [0], [0], [1], [0, 0, 1, 1], [], []>} : vector<48x32xbf16>, vector<32x64xbf16>, vector<48x64xf32> -> vector<48x64xf32>
    %c1_104 = arith.constant 1 : index
    %c0_105 = arith.constant 0 : index
    %c0_106 = arith.constant 0 : index
    %291 = vector.load %arg11[%c1_104, %c0_105, %c0_106] : memref<2x1x64xf32, #tpu.memory_space<vmem>>, vector<1x1x64xf32>
    %292 = vector.shape_cast %291 : vector<1x1x64xf32> to vector<1x64xf32>
    %293 = vector.broadcast %292 : vector<1x64xf32> to vector<48x64xf32>
    %294 = arith.addf %290, %293 : vector<48x64xf32>
    %295 = arith.mulf %294, %294 : vector<48x64xf32>
    %296 = arith.mulf %294, %295 : vector<48x64xf32>
    %cst_107 = arith.constant 4.471500e-02 : f32
    %297 = vector.broadcast %cst_107 : f32 to vector<48x64xf32>
    %298 = arith.mulf %297, %296 : vector<48x64xf32>
    %299 = arith.addf %294, %298 : vector<48x64xf32>
    %cst_108 = arith.constant 0.797884583 : f32
    %300 = vector.broadcast %cst_108 : f32 to vector<48x64xf32>
    %301 = arith.mulf %300, %299 : vector<48x64xf32>
    %302 = math.tanh %301 : vector<48x64xf32>
    %cst_109 = arith.constant 1.000000e+00 : f32
    %303 = vector.broadcast %cst_109 : f32 to vector<48x64xf32>
    %304 = arith.addf %303, %302 : vector<48x64xf32>
    %cst_110 = arith.constant 5.000000e-01 : f32
    %305 = vector.broadcast %cst_110 : f32 to vector<48x64xf32>
    %306 = arith.mulf %305, %304 : vector<48x64xf32>
    %307 = arith.mulf %294, %306 : vector<48x64xf32>
    %308 = arith.truncf %307 : vector<48x64xf32> to vector<48x64xbf16>
    %c1_111 = arith.constant 1 : index
    %c0_112 = arith.constant 0 : index
    %c0_113 = arith.constant 0 : index
    %309 = vector.load %arg12[%c1_111, %c0_112, %c0_113] : memref<2x64x32xbf16, #tpu.memory_space<vmem>>, vector<1x64x32xbf16>
    %310 = vector.shape_cast %309 : vector<1x64x32xbf16> to vector<64x32xbf16>
    %cst_114 = arith.constant dense<0.000000e+00> : vector<48x32xf32>
    %311 = tpu.matmul %308, %310, %cst_114 {dimension_numbers = #tpu.dot_dimension_numbers<[1], [0], [0], [1], [0, 0, 1, 1], [], []>} : vector<48x64xbf16>, vector<64x32xbf16>, vector<48x32xf32> -> vector<48x32xf32>
    %c1_115 = arith.constant 1 : index
    %c0_116 = arith.constant 0 : index
    %c0_117 = arith.constant 0 : index
    %312 = vector.load %arg13[%c1_115, %c0_116, %c0_117] : memref<2x1x32xf32, #tpu.memory_space<vmem>>, vector<1x1x32xf32>
    %313 = vector.shape_cast %312 : vector<1x1x32xf32> to vector<1x32xf32>
    %314 = vector.broadcast %313 : vector<1x32xf32> to vector<48x32xf32>
    %315 = arith.addf %311, %314 : vector<48x32xf32>
    %316 = arith.addf %260, %315 : vector<48x32xf32>
    %317 = vector.extract_strided_slice %316 {offsets = [0, 0], sizes = [1, 32], strides = [1, 1]} : vector<48x32xf32> to vector<1x32xf32>
    %318 = vector.extract_strided_slice %316 {offsets = [24, 0], sizes = [1, 32], strides = [1, 1]} : vector<48x32xf32> to vector<1x32xf32>
    %319 = tpu.concatenate %317, %318 in 0 : vector<1x32xf32>, vector<1x32xf32> -> vector<2x32xf32>
    %c0_118 = arith.constant 0 : index
    %c0_119 = arith.constant 0 : index
    %320 = vector.load %arg14[%c0_118, %c0_119] : memref<1x32xf32, #tpu.memory_space<vmem>>, vector<1x32xf32>
    %c0_120 = arith.constant 0 : index
    %c0_121 = arith.constant 0 : index
    %321 = vector.load %arg15[%c0_120, %c0_121] : memref<1x32xf32, #tpu.memory_space<vmem>>, vector<1x32xf32>
    %cst_122 = arith.constant dense<0.000000e+00> : vector<2xf32>
    %322 = vector.multi_reduction <add>, %319, %cst_122 [1] : vector<2x32xf32> to vector<2xf32>
    %323 = vector.shape_cast %322 : vector<2xf32> to vector<2x1xf32>
    %cst_123 = arith.constant 3.200000e+01 : f32
    %324 = vector.broadcast %cst_123 : f32 to vector<2x1xf32>
    %325 = arith.divf %323, %324 : vector<2x1xf32>
    %326 = arith.mulf %319, %319 : vector<2x32xf32>
    %cst_124 = arith.constant dense<0.000000e+00> : vector<2xf32>
    %327 = vector.multi_reduction <add>, %326, %cst_124 [1] : vector<2x32xf32> to vector<2xf32>
    %328 = vector.shape_cast %327 : vector<2xf32> to vector<2x1xf32>
    %cst_125 = arith.constant 3.200000e+01 : f32
    %329 = vector.broadcast %cst_125 : f32 to vector<2x1xf32>
    %330 = arith.divf %328, %329 : vector<2x1xf32>
    %331 = arith.mulf %325, %325 : vector<2x1xf32>
    %332 = arith.subf %330, %331 : vector<2x1xf32>
    %333 = vector.broadcast %325 : vector<2x1xf32> to vector<2x32xf32>
    %334 = arith.subf %319, %333 : vector<2x32xf32>
    %cst_126 = arith.constant 9.99999974E-6 : f32
    %335 = vector.broadcast %cst_126 : f32 to vector<2x1xf32>
    %336 = arith.addf %332, %335 : vector<2x1xf32>
    %337 = math.rsqrt %336 : vector<2x1xf32>
    %338 = vector.broadcast %337 : vector<2x1xf32> to vector<2x32xf32>
    %339 = arith.mulf %334, %338 : vector<2x32xf32>
    %340 = vector.broadcast %320 : vector<1x32xf32> to vector<2x32xf32>
    %341 = arith.mulf %339, %340 : vector<2x32xf32>
    %342 = vector.broadcast %321 : vector<1x32xf32> to vector<2x32xf32>
    %343 = arith.addf %341, %342 : vector<2x32xf32>
    %344 = arith.truncf %343 : vector<2x32xf32> to vector<2x32xbf16>
    %c0_127 = arith.constant 0 : index
    %c0_128 = arith.constant 0 : index
    %345 = vector.load %arg16[%c0_127, %c0_128] : memref<32x10xbf16, #tpu.memory_space<vmem>>, vector<32x10xbf16>
    %cst_129 = arith.constant dense<0.000000e+00> : vector<2x10xf32>
    %346 = tpu.matmul %344, %345, %cst_129 {dimension_numbers = #tpu.dot_dimension_numbers<[1], [0], [0], [1], [0, 0, 1, 1], [], []>} : vector<2x32xbf16>, vector<32x10xbf16>, vector<2x10xf32> -> vector<2x10xf32>
    %c0_130 = arith.constant 0 : index
    %c0_131 = arith.constant 0 : index
    %347 = vector.load %arg17[%c0_130, %c0_131] : memref<1x10xf32, #tpu.memory_space<vmem>>, vector<1x10xf32>
    %348 = vector.broadcast %347 : vector<1x10xf32> to vector<2x10xf32>
    %349 = arith.addf %346, %348 : vector<2x10xf32>
    %c0_132 = arith.constant 0 : index
    %c0_133 = arith.constant 0 : index
    %350 = vector.load %arg18[%c0_132, %c0_133] : memref<2x10xf32, #tpu.memory_space<vmem>>, vector<2x10xf32>
    tpu.vector_store %arg18[%c0_132, %c0_133], %349 {strides = array<i32>} : memref<2x10xf32, #tpu.memory_space<vmem>>, vector<2x10xf32>,
    return
  }
}

</mosaic_0001>

<bundles_post_ra>
// kernel: vit_forward.1
= control target key start
LH: loop header
LB: loop body
LE: loop exit
PB: predicated region body
PF: predicated region fallthrough
CT: control target
= control target key end

     0   :  { %s4215_s0 = inlined_call_operand.vmem [shape: bf16[48,48], index: 0, kind: input, shape index: {}]   ;;  %s4216_s1 = inlined_call_operand.vmem [shape: bf16[48,32], index: 1, kind: input, shape index: {}]   ;;  %s4217_s2 = inlined_call_operand.vmem [shape: f32[48,32], index: 2, kind: input, shape index: {}]   ;;  %s4218_s3 = inlined_call_operand.vmem [shape: f32[2,1,32], index: 3, kind: input, shape index: {}]   ;;  %s4219_s4 = inlined_call_operand.vmem [shape: f32[2,1,32], index: 4, kind: input, shape index: {}]   ;;  %s4220_s5 = inlined_call_operand.vmem [shape: bf16[2,32,96], index: 5, kind: input, shape index: {}]   ;;  %s4221_s6 = inlined_call_operand.vmem [shape: bf16[2,32,32], index: 6, kind: input, shape index: {}]   ;;  %s4222_s7 = inlined_call_operand.vmem [shape: f32[2,1,32], index: 7, kind: input, shape index: {}]   ;;  %s4223_s8 = inlined_call_operand.vmem [shape: f32[2,1,32], index: 8, kind: input, shape index: {}]   ;;  %s4224_s9 = inlined_call_operand.vmem [shape: f32[2,1,32], index: 9, kind: input, shape index: {}]   ;;  %s4225_s10 = inlined_call_operand.vmem [shape: bf16[2,32,64], index: 10, kind: input, shape index: {}]   ;;  %s4226_s11 = inlined_call_operand.vmem [shape: f32[2,1,64], index: 11, kind: input, shape index: {}]   ;;  %s4227_s12 = inlined_call_operand.vmem [shape: bf16[2,64,32], index: 12, kind: input, shape index: {}]   ;;  %s4228_s13 = inlined_call_operand.vmem [shape: f32[2,1,32], index: 13, kind: input, shape index: {}]   ;;  %s4229_s14 = inlined_call_operand.vmem [shape: f32[1,32], index: 14, kind: input, shape index: {}]   ;;  %s4230_s15 = inlined_call_operand.vmem [shape: f32[1,32], index: 15, kind: input, shape index: {}]   ;;  %s4231_s16 = inlined_call_operand.vmem [shape: bf16[32,10], index: 16, kind: input, shape index: {}]   ;;  %s4232_s17 = inlined_call_operand.vmem [shape: f32[1,10], index: 17, kind: input, shape index: {}]   ;;  %s4233_s18 = inlined_call_operand.hbm [shape: f32[2,10], index: 18, kind: output, shape index: {}]  }
   0x1   :  { %4237 = sst [smem:[#allocation5_spill]] %s4215_s0 }
   0x2   :  { %4238 = sst [smem:[#allocation6_spill]] %s4216_s1 }
   0x3   :  { %4239 = sst [smem:[#allocation7_spill]] %s4217_s2 }
   0x4   :  { %s4240_s29 = sld [smem:[#allocation6_spill]] }
   0xa   :  { %v2848_v0 = vld [vmem:[%s4240_s29 + $0x10] sm:$0xff]  ;;  %v2847_v1 = vld [vmem:[%s4240_s29 + $0x8] sm:$0xff]  ;;  %v2846_v2 = vld [vmem:[%s4240_s29] sm:$0xff] }
   0xb   :  { %127 = vmatpush.bf16.msra.mxu0 %v2848_v0 }
   0xf   :  { %128 = vmatpush.bf16.msra.mxu0 %v2847_v1 }
  0x10   :  { %23 = vsyncpa [#allocation3], 0  ;;  %s4241_s22 = sld [smem:[#allocation5_spill]]  ;;  %vm112_vm0 = vcmask 392192   ;;  %vm152_vm1 = vcmask 261120   ;;  %v3145_v42 = vmov 32.0  }
  0x11   :  { %s4242_s28 = sld [smem:[#allocation7_spill]]  ;;  %2947 = vrcp.f32 %v3145_v42  ;;  %v2850_v52 = vld [vmem:[%s4220_s5 + $0x8] sm:$0xff]  ;;  %v2849_v56 = vld [vmem:[%s4220_s5] sm:$0xff]  ;;  %s3146_s19 = smov 112  }
  0x12   :  { %356 = vmatpush.bf16.msra.mxu1 %v2850_v52  ;;  %s3147_s1 = smov 96   ;;  %s3148_s20 = smov 64  }
  0x13   :  { %129 = vmatpush.bf16.msra.mxu0 %v2846_v2  ;;  %s3150_s21 = smov 16   ;;  %s2635_s23 = sshll.u32 %s4233_s18, 4  ;;  %s2636_s23 = int_to_ptr.hbm [resolvable:$true] %s2635_s23 }
  0x16   :  { %v2843_v3 = vld [vmem:[%s4241_s22] sm:$0xff]  ;;  %v2844_v4 = vld [vmem:[%s4241_s22 + $0x8] sm:$0xff]  ;;  %v2845_v5 = vld [vmem:[%s4241_s22 + $0x10] sm:$0xff]  ;;  %357 = vmatpush.bf16.msra.mxu1 %v2849_v56 }
  0x17   :  { %2668 = vmatmul.msk.bf16.vlgmr.msra.gmra.mxu0 %vm112_vm0, %v2843_v3  ;;  %v73_v6 = vld [vmem:[%s4242_s28] sm:$0xff]  ;;  %v74_v12 = vld [vmem:[%s4242_s28 + $0x8] sm:$0xff]  ;;  %v75_v18 = vld [vmem:[%s4242_s28 + $0x10] sm:$0xff]  ;;  %v2948_v43 = vpop.eup %2947 }
  0x18   :  { %v76_v24 = vld [vmem:[%s4242_s28 + $0x18] sm:$0xff]  ;;  %v77_v30 = vld [vmem:[%s4242_s28 + $0x20] sm:$0xff]  ;;  %v78_v36 = vld [vmem:[%s4242_s28 + $0x28] sm:$0xff]  ;;  %v172_v44 = vmul.f32 32.0, %v2948_v43  ;;  %vm176_vm2 = vweird.f32 %v2948_v43 }
  0x1a   :  { %v173_v45 = vsub.f32 1.0, %v172_v44 }
  0x1c   :  { %v174_v46 = vmul.f32 %v2948_v43, %v173_v45 }
  0x1e   :  { %v175_v47 = vadd.f32 %v2948_v43, %v174_v46 }
  0x20   :  { %v3325_v48 = vsel %vm176_vm2, %v2948_v43, %v175_v47 }
  0x27   :  { %2669 = vmatmul.msk.bf16.gmra.mxu0 %vm112_vm0, %v2844_v4 }
  0x37   :  { %2670 = vmatmul.msk.bf16.gmra.mxu0 %vm112_vm0, %v2845_v5 }
  0x94   :  { %v131_v7 = vpop.f32.mrf.mxu0 }
  0x95   :  { %v3268_v8 = vadd.f32 %v131_v7, %v73_v6 }
  0x97   :  { %v153_v9 = vsel %vm152_vm1, %v3268_v8, 0.0  ;;  %v184_v10 = vmul.f32 %v3268_v8, %v3268_v8 }
  0x98   :  { %154 = vadd.xlane.f32.xlu0 %v153_v9 }
  0x99   :  { %v190_v11 = vsel %vm152_vm1, %v184_v10, 0.0 }
  0x9a   :  { %191 = vadd.xlane.f32.xlu1 %v190_v11 }
  0x9c   :  { %v133_v13 = vpop.f32.mrf.mxu0 }
  0x9d   :  { %v3278_v14 = vadd.f32 %v133_v13, %v74_v12 }
  0x9f   :  { %v156_v15 = vsel %vm152_vm1, %v3278_v14, 0.0  ;;  %v185_v16 = vmul.f32 %v3278_v14, %v3278_v14 }
  0xa0   :  { %157 = vadd.xlane.f32.xlu0 %v156_v15 }
  0xa1   :  { %v193_v17 = vsel %vm152_vm1, %v185_v16, 0.0 }
  0xa2   :  { %194 = vadd.xlane.f32.xlu1 %v193_v17 }
  0xa4   :  { %v136_v19 = vpop.f32.mrf.mxu0 }
  0xa5   :  { %v3288_v20 = vadd.f32 %v136_v19, %v75_v18 }
  0xa7   :  { %v159_v21 = vsel %vm152_vm1, %v3288_v20, 0.0  ;;  %v186_v22 = vmul.f32 %v3288_v20, %v3288_v20 }
  0xa8   :  { %160 = vadd.xlane.f32.xlu2 %v159_v21 }
  0xa9   :  { %v196_v23 = vsel %vm152_vm1, %v186_v22, 0.0 }
  0xaa   :  { %197 = vadd.xlane.f32.xlu0 %v196_v23 }
  0xac   :  { %v138_v25 = vpop.f32.mrf.mxu0 }
  0xad   :  { %v3298_v26 = vadd.f32 %v138_v25, %v76_v24 }
  0xaf   :  { %v162_v27 = vsel %vm152_vm1, %v3298_v26, 0.0  ;;  %v187_v28 = vmul.f32 %v3298_v26, %v3298_v26 }
  0xb0   :  { %163 = vadd.xlane.f32.xlu2 %v162_v27 }
  0xb1   :  { %v199_v29 = vsel %vm152_vm1, %v187_v28, 0.0 }
  0xb2   :  { %200 = vadd.xlane.f32.xlu1 %v199_v29 }
  0xb4   :  { %v141_v31 = vpop.f32.mrf.mxu0 }
  0xb5   :  { %v3308_v32 = vadd.f32 %v141_v31, %v77_v30 }
  0xb7   :  { %v165_v33 = vsel %vm152_vm1, %v3308_v32, 0.0  ;;  %v188_v34 = vmul.f32 %v3308_v32, %v3308_v32 }
  0xb8   :  { %166 = vadd.xlane.f32.xlu2 %v165_v33 }
  0xb9   :  { %v202_v35 = vsel %vm152_vm1, %v188_v34, 0.0 }
  0xba   :  { %203 = vadd.xlane.f32.xlu1 %v202_v35  ;;  %v3353_v35 = vld [vmem:[%s4218_s3] ss:$0 sm:$0xff] }
  0xbc   :  { %v143_v37 = vpop.f32.mrf.mxu0 }
  0xbd   :  { %v3318_v38 = vadd.f32 %v143_v37, %v78_v36 }
  0xbf   :  { %v168_v39 = vsel %vm152_vm1, %v3318_v38, 0.0  ;;  %v189_v40 = vmul.f32 %v3318_v38, %v3318_v38 }
  0xc0   :  { %169 = vadd.xlane.f32.xlu0 %v168_v39 }
  0xc1   :  { %v205_v41 = vsel %vm152_vm1, %v189_v40, 0.0 }
  0xc2   :  { %206 = vadd.xlane.f32.xlu2 %v205_v41 }
 0x10b   :  { %v155_v49 = vpop.xlane.xlu0 %154 }
 0x10c   :  { %v178_v50 = vmul.f32 %v3325_v48, %v155_v49 }
 0x10d   :  { %v192_v51 = vpop.xlane.xlu1 %191 }
 0x10e   :  { %v214_v53 = vmul.f32 %v178_v50, %v178_v50  ;;  %v208_v54 = vmul.f32 %v192_v51, %v3325_v48  ;;  %v226_v28 = vsub.f32 %v3268_v8, %v178_v50  ;;  %v3366_v50 = vld [vmem:[%s4219_s4] ss:$0 sm:$0xff] }
 0x110   :  { %v220_v55 = vsub.f32 %v208_v54, %v214_v53 }
 0x112   :  { %v232_v57 = vadd.f32 1e-05, %v220_v55 }
 0x113   :  { %v158_v58 = vpop.xlane.xlu0 %157 }
 0x114   :  { %2949 = vrsqrt.f32 %v232_v57  ;;  %v179_v59 = vmul.f32 %v3325_v48, %v158_v58  ;;  %vm244_vm4 = vweird.f32 %v232_v57 }
 0x115   :  { %v195_v60 = vpop.xlane.xlu1 %194 }
 0x116   :  { %v215_v61 = vmul.f32 %v179_v59, %v179_v59  ;;  %v209_v62 = vmul.f32 %v195_v60, %v3325_v48  ;;  %v227_v40 = vsub.f32 %v3278_v14, %v179_v59 }
 0x118   :  { %v221_v63 = vsub.f32 %v209_v62, %v215_v61 }
 0x11a   :  { %v2950_v0 = vpop.eup %2949  ;;  %v233_v1 = vadd.f32 1e-05, %v221_v63 }
 0x11b   :  { %v239_v2 = vmul.f32 %v2950_v0, %v232_v57  ;;  %v161_v3 = vpop.xlane.xlu2 %160  ;;  %vm245_vm3 = vweird.f32 %v2950_v0 }
 0x11c   :  { %2951 = vrsqrt.f32 %v233_v1  ;;  %v3338_v4 = vmul.f32 %v3325_v48, %v161_v3  ;;  %vm246_vm5 = vmor %vm244_vm4, %vm245_vm3  ;;  %vm254_vm7 = vweird.f32 %v233_v1 }
 0x11d   :  { %v240_v5 = vmul.f32 %v2950_v0, %v239_v2  ;;  %v198_v6 = vpop.xlane.xlu0 %197 }
 0x11e   :  { %v216_v7 = vmul.f32 %v3338_v4, %v3338_v4  ;;  %v210_v9 = vmul.f32 %v198_v6, %v3325_v48 }
 0x11f   :  { %v241_v10 = vmul.f32 0.5, %v240_v5 }
 0x120   :  { %v222_v11 = vsub.f32 %v210_v9, %v216_v7  ;;  %v228_v7 = vsub.f32 %v3288_v20, %v3338_v4 }
 0x121   :  { %v242_v12 = vsub.f32 1.5, %v241_v10 }
 0x122   :  { %v2952_v13 = vpop.eup %2951  ;;  %v234_v15 = vadd.f32 1e-05, %v222_v11 }
 0x123   :  { %v243_v16 = vmul.f32 %v2950_v0, %v242_v12  ;;  %v249_v17 = vmul.f32 %v2952_v13, %v233_v1  ;;  %v164_v18 = vpop.xlane.xlu2 %163  ;;  %vm255_vm6 = vweird.f32 %v2952_v13 }
 0x124   :  { %2953 = vrsqrt.f32 %v234_v15  ;;  %v3344_v19 = vmul.f32 %v3325_v48, %v164_v18  ;;  %vm256_vm8 = vmor %vm254_vm7, %vm255_vm6  ;;  %vm264_vm10 = vweird.f32 %v234_v15  ;;  %vm422_vm6 = vcmask 130048  }
 0x125   :  { %v250_v21 = vmul.f32 %v2952_v13, %v249_v17  ;;  %v201_v22 = vpop.xlane.xlu1 %200  ;;  %v247_v25 = vsel %vm246_vm5, %v2950_v0, %v243_v16 }
 0x126   :  { %v217_v23 = vmul.f32 %v3344_v19, %v3344_v19  ;;  %v211_v24 = vmul.f32 %v201_v22, %v3325_v48  ;;  %v298_v34 = vmul.f32 %v247_v25, %v226_v28  ;;  %v229_v17 = vsub.f32 %v3298_v26, %v3344_v19 }
 0x127   :  { %v251_v27 = vmul.f32 0.5, %v250_v21 }
 0x128   :  { %v223_v29 = vsub.f32 %v211_v24, %v217_v23  ;;  %v307_v49 = vmul.f32 %v3353_v35, %v298_v34 }
 0x129   :  { %v252_v30 = vsub.f32 1.5, %v251_v27 }
 0x12a   :  { %v2954_v31 = vpop.eup %2953  ;;  %v235_v33 = vadd.f32 1e-05, %v223_v29  ;;  %v316_v57 = vadd.f32 %v3366_v50, %v307_v49 }
 0x12b   :  { %v253_v36 = vmul.f32 %v2952_v13, %v252_v30  ;;  %v259_v37 = vmul.f32 %v2954_v31, %v234_v15  ;;  %v167_v39 = vpop.xlane.xlu2 %166  ;;  %vm265_vm9 = vweird.f32 %v2954_v31 }
 0x12c   :  { %2955 = vrsqrt.f32 %v235_v33  ;;  %v3357_v41 = vmul.f32 %v3325_v48, %v167_v39  ;;  %vm266_vm11 = vmor %vm264_vm10, %vm265_vm9  ;;  %vm274_vm13 = vweird.f32 %v235_v33  ;;  %vm767_vm9 = vcmask 1043456  }
 0x12d   :  { %v257_v42 = vsel %vm256_vm8, %v2952_v13, %v253_v36  ;;  %v260_v43 = vmul.f32 %v2954_v31, %v259_v37  ;;  %v204_v44 = vpop.xlane.xlu1 %203  ;;  %vm603_vm8 = vcmask 195584  }
 0x12e   :  { %v218_v45 = vmul.f32 %v3357_v41, %v3357_v41  ;;  %v212_v46 = vmul.f32 %v204_v44, %v3325_v48  ;;  %v299_v47 = vmul.f32 %v257_v42, %v227_v40  ;;  %v230_v37 = vsub.f32 %v3308_v32, %v3357_v41 }
 0x12f   :  { %v261_v51 = vmul.f32 0.5, %v260_v43 }
 0x130   :  { %v224_v52 = vsub.f32 %v212_v46, %v218_v45  ;;  %v308_v53 = vmul.f32 %v3353_v35, %v299_v47 }
 0x131   :  { %v262_v54 = vsub.f32 1.5, %v261_v51 }
 0x132   :  { %v2956_v55 = vpop.eup %2955  ;;  %v236_v56 = vadd.f32 1e-05, %v224_v52  ;;  %v317_v58 = vadd.f32 %v3366_v50, %v308_v53 }
 0x133   :  { %v263_v59 = vmul.f32 %v2954_v31, %v262_v54  ;;  %v269_v60 = vmul.f32 %v2956_v55, %v235_v33  ;;  %v170_v61 = vpop.xlane.xlu0 %169  ;;  %vm275_vm12 = vweird.f32 %v2956_v55 }
 0x134   :  { %2957 = vrsqrt.f32 %v236_v56  ;;  %v183_v62 = vmul.f32 %v3325_v48, %v170_v61  ;;  %v322_v63 = vpack.c.bf16 %v317_v58, %v316_v57  ;;  %vm276_vm14 = vmor %vm274_vm13, %vm275_vm12  ;;  %vm284_vm0 = vweird.f32 %v236_v56 }
 0x135   :  { %v270_v0 = vmul.f32 %v2956_v55, %v269_v60  ;;  %v207_v1 = vpop.xlane.xlu2 %206  ;;  %v267_v5 = vsel %vm266_vm11, %v2954_v31, %v263_v59 }
 0x136   :  { %v219_v2 = vmul.f32 %v183_v62, %v183_v62  ;;  %v213_v3 = vmul.f32 %v207_v1, %v3325_v48  ;;  %2679 = vmatmul.msk.bf16.vlgmr.msra.gmra.mxu1 %vm152_vm1, %v322_v63  ;;  %v300_v13 = vmul.f32 %v267_v5, %v228_v7  ;;  %v231_v43 = vsub.f32 %v3318_v38, %v183_v62 }
 0x137   :  { %v271_v6 = vmul.f32 0.5, %v270_v0 }
 0x138   :  { %v225_v9 = vsub.f32 %v213_v3, %v219_v2  ;;  %v309_v23 = vmul.f32 %v3353_v35, %v300_v13 }
 0x139   :  { %v272_v10 = vsub.f32 1.5, %v271_v6 }
 0x13a   :  { %v2958_v11 = vpop.eup %2957  ;;  %v237_v12 = vadd.f32 1e-05, %v225_v9  ;;  %v318_v28 = vadd.f32 %v3366_v50, %v309_v23 }
 0x13b   :  { %v273_v15 = vmul.f32 %v2956_v55, %v272_v10  ;;  %v279_v16 = vmul.f32 %v2958_v11, %v236_v56  ;;  %vm285_vm15 = vweird.f32 %v2958_v11 }
 0x13c   :  { %2959 = vrsqrt.f32 %v237_v12  ;;  %vm286_vm2 = vmor %vm284_vm0, %vm285_vm15  ;;  %vm294_vm4 = vweird.f32 %v237_v12 }
 0x13d   :  { %v277_v18 = vsel %vm276_vm14, %v2956_v55, %v273_v15  ;;  %v280_v21 = vmul.f32 %v2958_v11, %v279_v16 }
 0x13e   :  { %v301_v22 = vmul.f32 %v277_v18, %v229_v17 }
 0x13f   :  { %v281_v4 = vmul.f32 0.5, %v280_v21 }
 0x140   :  { %v310_v24 = vmul.f32 %v3353_v35, %v301_v22 }
 0x141   :  { %v282_v25 = vsub.f32 1.5, %v281_v4 }
 0x142   :  { %v2960_v27 = vpop.eup %2959  ;;  %v319_v29 = vadd.f32 %v3366_v50, %v310_v24 }
 0x143   :  { %v283_v30 = vmul.f32 %v2958_v11, %v282_v25  ;;  %v289_v31 = vmul.f32 %v2960_v27, %v237_v12  ;;  %vm295_vm3 = vweird.f32 %v2960_v27 }
 0x144   :  { %v323_v19 = vpack.c.bf16 %v319_v29, %v318_v28  ;;  %vm296_vm5 = vmor %vm294_vm4, %vm295_vm3 }
 0x145   :  { %v290_v33 = vmul.f32 %v2960_v27, %v289_v31  ;;  %v287_v34 = vsel %vm286_vm2, %v2958_v11, %v283_v30 }
 0x146   :  { %2680 = vmatmul.msk.bf16.gmra.mxu1 %vm152_vm1, %v323_v19  ;;  %v302_v40 = vmul.f32 %v287_v34, %v230_v37 }
 0x147   :  { %v291_v36 = vmul.f32 0.5, %v290_v33 }
 0x148   :  { %v311_v46 = vmul.f32 %v3353_v35, %v302_v40 }
 0x149   :  { %v292_v39 = vsub.f32 1.5, %v291_v36 }
 0x14a   :  { %v320_v49 = vadd.f32 %v3366_v50, %v311_v46 }
 0x14b   :  { %v293_v42 = vmul.f32 %v2960_v27, %v292_v39 }
 0x14d   :  { %v297_v44 = vsel %vm296_vm5, %v2960_v27, %v293_v42 }
 0x14e   :  { %v303_v45 = vmul.f32 %v297_v44, %v231_v43 }
 0x150   :  { %v312_v47 = vmul.f32 %v3353_v35, %v303_v45 }
 0x152   :  { %v321_v51 = vadd.f32 %v3366_v50, %v312_v47 }
 0x154   :  { %v324_v52 = vpack.c.bf16 %v321_v51, %v320_v49  ;;  %v146_v51 = vlaneseq }
 0x156   :  { %2681 = vmatmul.msk.bf16.gmra.mxu1 %vm152_vm1, %v324_v52 }
 0x1b3   :  { %v359_v41 = vpop.f32.mrf.mxu1 }
 0x1b4   :  { %v398_v59 = vpack.c.bf16 %v359_v41, %v359_v41 }
 0x1b6   :  { %v413_v61 = vunpack.c.l.b16 %v398_v59 }
 0x1bb   :  { %v361_v53 = vpop.f32.mrf.mxu1 }
 0x1bc   :  { %v2880_v54 = vpack.i.bf16 %v361_v53, %v359_v41  ;;  %v399_v58 = vpack.c.bf16 %v361_v53, %v361_v53  ;;  %v147_v53 = vand.u32 127, %v146_v51 }
 0x1be   :  { %2881 = vrot.lane.b32.xlu1 %v2880_v54, %s3146_s19  ;;  %v414_v60 = vunpack.c.l.b16 %v399_v58  ;;  %vm148_vm7 = vcmp.lt.s32.totalorder %v147_v53, 17 }
 0x1c0   :  { %v3397_v62 = vpack.c.b16 %v414_v60, %v413_v61 }
 0x1c3   :  { %v364_v55 = vpop.f32.mrf.mxu1 }
 0x1c4   :  { %v400_v56 = vpack.c.bf16 %v364_v55, %v364_v55  ;;  %381 = vrot.lane.b32.xlu0 %v364_v55, %s3146_s19 }
 0x1c6   :  { %v415_v57 = vunpack.c.l.b16 %v400_v56 }
 0x1c8   :  { %v3393_v35 = vpack.c.b16 %v415_v57, %v415_v57  ;;  %v3149_v57 = vmov -1e+30  }
 0x1c9   :  { %v3436_v58 = vsel %vm148_vm7, 0.0, %v3149_v57 }
 0x1ca   :  { %420 = vrot.lane.b32.xlu2 %v3393_v35, %s3147_s1 }
 0x1cb   :  { %v366_v50 = vpop.f32.mrf.mxu1 }
 0x1cc   :  { %v404_v42 = vpack.c.bf16 %v366_v50, %v366_v50 }
 0x1ce   :  { %v498_v44 = vunpack.c.l.b16 %v404_v42 }
 0x1d2   :  { %418 = vrot.lane.b32.xlu2 %v3397_v62, %s3147_s1 }
 0x1d3   :  { %v369_v63 = vpop.f32.mrf.mxu1 }
 0x1d4   :  { %v2885_v0 = vpack.i.bf16 %v369_v63, %v366_v50  ;;  %v405_v39 = vpack.c.bf16 %v369_v63, %v369_v63 }
 0x1d6   :  { %2886 = vrot.lane.b32.xlu1 %v2885_v0, %s3146_s19  ;;  %v499_v43 = vunpack.c.l.b16 %v405_v39 }
 0x1d8   :  { %v3428_v45 = vpack.c.b16 %v499_v43, %v498_v44 }
 0x1db   :  { %v371_v1 = vpop.f32.mrf.mxu1 }
 0x1dc   :  { %393 = vrot.lane.b32.xlu0 %v371_v1, %s3146_s19  ;;  %v406_v17 = vpack.c.bf16 %v371_v1, %v371_v1 }
 0x1de   :  { %v500_v23 = vunpack.c.l.b16 %v406_v17 }
 0x1e0   :  { %v3414_v24 = vpack.c.b16 %v500_v23, %v500_v23 }
 0x224   :  { %v421_v2 = vpop.permute.xlu2 %420 }
 0x225   :  { %v433_v3 = vsel %vm422_vm6, %v421_v2, 0 }
 0x226   :  { %441 = vmatpush.bf16.xpose.msra.mxu2 %v433_v3  ;;  %2871 = vmatpush.bf16.xpose.msra.mxu3 %v433_v3 }
 0x22c   :  { %v419_v5 = vpop.permute.xlu2 %418 }
 0x22d   :  { %v430_v6 = vsel %vm422_vm6, %v419_v5, 0 }
 0x22e   :  { %442 = vmatpush.bf16.xpose.msra.mxu2 %v430_v6  ;;  %2872 = vmatpush.bf16.xpose.msra.mxu3 %v430_v6 }
 0x230   :  { %v2882_v7 = vpop.permute.xlu1 %2881 }
 0x231   :  { %v2884_v9 = vunpack.i.h.bf16 %v2882_v7  ;;  %v2883_v10 = vunpack.i.l.bf16 %v2882_v7 }
 0x233   :  { %v402_v11 = vpack.c.bf16 %v2884_v9, %v2884_v9  ;;  %v401_v12 = vpack.c.bf16 %v2883_v10, %v2883_v10 }
 0x235   :  { %v457_v13 = vunpack.c.l.b16 %v402_v11  ;;  %v456_v15 = vunpack.c.l.b16 %v401_v12  ;;  %2682 = vmatmul.msk.bf16.vlgmr.msra.gmra.mxu2 %vm422_vm6, %v3397_v62  ;;  %2683 = vmatmul.msk.bf16.vlgmr.msra.gmra.mxu3 %vm422_vm6, %v3393_v35 }
 0x236   :  { %v382_v16 = vpop.permute.xlu0 %381 }
 0x237   :  { %v403_v18 = vpack.c.bf16 %v382_v16, %v382_v16  ;;  %v459_v21 = vpack.c.b16 %v457_v13, %v456_v15 }
 0x239   :  { %v458_v22 = vunpack.c.l.b16 %v403_v18  ;;  %461 = vrot.lane.b32.xlu2 %v459_v21, %s3147_s1 }
 0x23b   :  { %v3410_v4 = vpack.c.b16 %v458_v22, %v458_v22 }
 0x23d   :  { %463 = vrot.lane.b32.xlu0 %v3410_v4, %s3147_s1 }
 0x241   :  { %505 = vrot.lane.b32.xlu2 %v3414_v24, %s3147_s1 }
 0x248   :  { %v2887_v25 = vpop.permute.xlu1 %2886 }
 0x249   :  { %v2889_v27 = vunpack.i.h.bf16 %v2887_v25  ;;  %v2888_v28 = vunpack.i.l.bf16 %v2887_v25 }
 0x24b   :  { %v408_v29 = vpack.c.bf16 %v2889_v27, %v2889_v27  ;;  %v407_v30 = vpack.c.bf16 %v2888_v28, %v2888_v28 }
 0x24d   :  { %v541_v31 = vunpack.c.l.b16 %v408_v29  ;;  %v540_v19 = vunpack.c.l.b16 %v407_v30 }
 0x24e   :  { %v394_v33 = vpop.permute.xlu0 %393 }
 0x24f   :  { %v409_v34 = vpack.c.bf16 %v394_v33, %v394_v33  ;;  %v3418_v36 = vpack.c.b16 %v541_v31, %v540_v19 }
 0x251   :  { %v542_v37 = vunpack.c.l.b16 %v409_v34  ;;  %545 = vrot.lane.b32.xlu0 %v3418_v36, %s3147_s1 }
 0x253   :  { %v3422_v40 = vpack.c.b16 %v542_v37, %v542_v37 }
 0x255   :  { %547 = vrot.lane.b32.xlu1 %v3422_v40, %s3147_s1 }
 0x259   :  { %799 = vrot.lane.b32.xlu0 %v3410_v4, %s3148_s20 }
 0x25d   :  { %503 = vrot.lane.b32.xlu1 %v3428_v45, %s3147_s1 }
 0x265   :  { %797 = vrot.lane.b32.xlu1 %v459_v21, %s3148_s20 }
 0x293   :  { %v462_v46 = vpop.permute.xlu2 %461 }
 0x294   :  { %v472_v56 = vsel %vm422_vm6, %v462_v46, 0 }
 0x29b   :  { %v506_v47 = vpop.permute.xlu2 %505 }
 0x29c   :  { %v517_v49 = vsel %vm422_vm6, %v506_v47, 0 }
 0x29d   :  { %525 = vmatpush.bf16.xpose.msrb.mxu2 %v517_v49 }
 0x2af   :  { %v464_v52 = vpop.permute.xlu0 %463 }
 0x2b0   :  { %v475_v41 = vsel %vm422_vm6, %v464_v52, 0 }
 0x2b1   :  { %483 = vmatpush.bf16.xpose.msrb.mxu3 %v475_v41 }
 0x2b8   :  { %v444_v54 = vpop.f32.mrf.mxu2  ;;  %v449_v55 = vpop.f32.mrf.mxu3 }
 0x2b9   :  { %v579_v59 = vmul.f32 0.25, %v444_v54  ;;  %v581_v50 = vmul.f32 0.25, %v449_v55  ;;  %484 = vmatpush.bf16.xpose.msrb.mxu3 %v472_v56 }
 0x2bb   :  { %v3439_v60 = vadd.f32 %v581_v50, %v3436_v58  ;;  %v3442_v61 = vadd.f32 %v579_v59, %v3436_v58 }
 0x2bd   :  { %v610_v63 = vsel %vm603_vm8, %v3439_v60, -inf  ;;  %v604_v0 = vsel %vm603_vm8, %v3442_v61, -inf }
 0x2be   :  { %611 = vmax.xlane.f32.xlu2 %v610_v63  ;;  %605 = vmax.xlane.f32.xlu0 %v604_v0 }
 0x2c0   :  { %v446_v1 = vpop.f32.mrf.mxu2  ;;  %v451_v2 = vpop.f32.mrf.mxu3  ;;  %2684 = vmatmul.msk.bf16.vlgmr.msrb.gmra.mxu3 %vm422_vm6, %v459_v21 }
 0x2c1   :  { %v580_v3 = vmul.f32 0.25, %v446_v1 }
 0x2c3   :  { %v546_v5 = vpop.permute.xlu0 %545  ;;  %v592_v6 = vadd.f32 %v580_v3, %v3436_v58 }
 0x2c4   :  { %v556_v15 = vsel %vm422_vm6, %v546_v5, 0 }
 0x2c5   :  { %v607_v7 = vsel %vm603_vm8, %v592_v6, -inf }
 0x2c6   :  { %608 = vmax.xlane.f32.xlu2 %v607_v7 }
 0x2c7   :  { %v548_v9 = vpop.permute.xlu1 %547 }
 0x2c8   :  { %v559_v10 = vsel %vm422_vm6, %v548_v9, 0 }
 0x2c9   :  { %567 = vmatpush.bf16.xpose.msra.mxu3 %v559_v10 }
 0x2cb   :  { %v800_v11 = vpop.permute.xlu0 %799 }
 0x2cc   :  { %v809_v12 = vsel %vm767_vm9, %v800_v11, 0 }
 0x2cd   :  { %817 = vmatpush.bf16.msrb.mxu0 %v809_v12 }
 0x2cf   :  { %v504_v13 = vpop.permute.xlu1 %503 }
 0x2d0   :  { %2685 = vmatmul.msk.bf16.gmra.mxu3 %vm422_vm6, %v3410_v4  ;;  %v514_v16 = vsel %vm422_vm6, %v504_v13, 0 }
 0x2d1   :  { %526 = vmatpush.bf16.xpose.msrb.mxu2 %v514_v16  ;;  %568 = vmatpush.bf16.xpose.msra.mxu3 %v556_v15 }
 0x2d7   :  { %v798_v17 = vpop.permute.xlu1 %797 }
 0x2d8   :  { %2686 = vmatmul.msk.bf16.vlgmr.msrb.gmra.mxu2 %vm422_vm6, %v3428_v45  ;;  %818 = vmatpush.bf16.msrb.mxu0 %v798_v17 }
 0x2e0   :  { %2688 = vmatmul.msk.bf16.vlgmr.msra.gmra.mxu3 %vm422_vm6, %v3418_v36 }
 0x2e8   :  { %2687 = vmatmul.msk.bf16.gmra.mxu2 %vm422_vm6, %v3414_v24 }
 0x2f0   :  { %2689 = vmatmul.msk.bf16.gmra.mxu3 %vm422_vm6, %v3422_v40 }
 0x331   :  { %v3470_v30 = vpop.xlane.xlu2 %611  ;;  %v606_v11 = vpop.xlane.xlu0 %605 }
 0x332   :  { %v640_v12 = vsub.f32 %v3442_v61, %v606_v11 }
 0x334   :  { %v652_v13 = vmul.f32 1.442695, %v640_v12 }
 0x339   :  { %v609_v49 = vpop.xlane.xlu2 %608 }
 0x33a   :  { %v641_v54 = vsub.f32 %v592_v6, %v609_v49 }
 0x33c   :  { %v654_v50 = vmul.f32 1.442695, %v641_v54 }
 0x33e   :  { %2961 = vpow2.f32 %v654_v50 }
 0x33f   :  { %2963 = vpow2.f32 %v652_v13 }
 0x343   :  { %v486_v18 = vpop.f32.mrf.mxu3 }
 0x344   :  { %v582_v55 = vmul.f32 0.25, %v486_v18  ;;  %v3490_v5 = vpop.eup %2961 }
 0x345   :  { %v679_v7 = vsel %vm603_vm8, %v3490_v5, 0.0  ;;  %v3501_v16 = vpop.eup %2963 }
 0x346   :  { %v594_v1 = vadd.f32 %v582_v55, %v3436_v58  ;;  %v676_v18 = vsel %vm603_vm8, %v3501_v16, 0.0 }
 0x348   :  { %v613_v2 = vsel %vm603_vm8, %v594_v1, -inf }
 0x34b   :  { %v488_v21 = vpop.f32.mrf.mxu3 }
 0x34c   :  { %v583_v28 = vmul.f32 0.25, %v488_v21 }
 0x34e   :  { %v595_v34 = vadd.f32 %v583_v28, %v3436_v58 }
 0x350   :  { %v616_v43 = vsel %vm603_vm8, %v595_v34, -inf }
 0x353   :  { %v491_v22 = vpop.f32.mrf.mxu3 }
 0x354   :  { %v584_v39 = vmul.f32 0.25, %v491_v22 }
 0x356   :  { %v596_v52 = vadd.f32 %v584_v39, %v3436_v58 }
 0x358   :  { %v619_v57 = vsel %vm603_vm8, %v596_v52, -inf }
 0x35b   :  { %v493_v23 = vpop.f32.mrf.mxu3  ;;  %v528_v4 = vpop.f32.mrf.mxu2 }
 0x35c   :  { %v585_v25 = vmul.f32 0.25, %v528_v4 }
 0x35e   :  { %v3466_v27 = vadd.f32 %v585_v25, %v3436_v58 }
 0x360   :  { %v622_v29 = vsel %vm603_vm8, %v3466_v27, -inf }
 0x361   :  { %623 = vmax.xlane.f32.xlu2 %v622_v29 }
 0x363   :  { %v530_v31 = vpop.f32.mrf.mxu2  ;;  %v570_v19 = vpop.f32.mrf.mxu3 }
 0x364   :  { %v586_v33 = vmul.f32 0.25, %v530_v31  ;;  %v588_v44 = vmul.f32 0.25, %v570_v19 }
 0x366   :  { %v3474_v37 = vadd.f32 %v586_v33, %v3436_v58  ;;  %v600_v41 = vadd.f32 %v588_v44, %v3436_v58 }
 0x368   :  { %v625_v42 = vsel %vm603_vm8, %v3474_v37, -inf  ;;  %v631_v59 = vsel %vm603_vm8, %v600_v41, -inf }
 0x369   :  { %626 = vmax.xlane.f32.xlu1 %v625_v42  ;;  %617 = vmax.xlane.f32.xlu2 %v616_v43 }
 0x36b   :  { %v533_v46 = vpop.f32.mrf.mxu2  ;;  %v572_v47 = vpop.f32.mrf.mxu3 }
 0x36c   :  { %v587_v51 = vmul.f32 0.25, %v533_v46  ;;  %v589_v6 = vmul.f32 0.25, %v572_v47 }
 0x36e   :  { %v3482_v53 = vadd.f32 %v587_v51, %v3436_v58  ;;  %v601_v9 = vadd.f32 %v589_v6, %v3436_v58 }
 0x370   :  { %v628_v56 = vsel %vm603_vm8, %v3482_v53, -inf  ;;  %v634_v10 = vsel %vm603_vm8, %v601_v9, -inf }
 0x371   :  { %629 = vmax.xlane.f32.xlu0 %v628_v56  ;;  %620 = vmax.xlane.f32.xlu2 %v619_v57 }
 0x372   :  { %632 = vmax.xlane.f32.xlu1 %v631_v59 }
 0x373   :  { %v535_v63 = vpop.f32.mrf.mxu2  ;;  %v575_v0 = vpop.f32.mrf.mxu3 }
 0x374   :  { %v590_v15 = vmul.f32 0.25, %v575_v0 }
 0x376   :  { %v3504_v17 = vadd.f32 %v590_v15, %v3436_v58 }
 0x379   :  { %614 = vmax.xlane.f32.xlu0 %v613_v2 }
 0x37b   :  { %v577_v3 = vpop.f32.mrf.mxu3 }
 0x381   :  { %680 = vadd.xlane.f32.xlu0 %v679_v7 }
 0x389   :  { %877 = vrot.lane.b32.xlu2 %v3418_v36, %s3148_s20  ;;  %635 = vmax.xlane.f32.xlu0 %v634_v10  ;;  %v637_v36 = vsel %vm603_vm8, %v3504_v17, -inf }
 0x38b   :  { %879 = vrot.lane.b32.xlu1 %v3422_v40, %s3148_s20 }
 0x3b2   :  { %677 = vadd.xlane.f32.xlu2 %v676_v18 }
 0x3b5   :  { %638 = vmax.xlane.f32.xlu1 %v637_v36 }
 0x3d4   :  { %v624_v40 = vpop.xlane.xlu2 %623 }
 0x3dc   :  { %v627_v21 = vpop.xlane.xlu1 %626  ;;  %v618_v22 = vpop.xlane.xlu2 %617 }
 0x3dd   :  { %v644_v61 = vsub.f32 %v595_v34, %v618_v22  ;;  %v647_v50 = vsub.f32 %v3474_v37, %v627_v21  ;;  %v646_v37 = vsub.f32 %v3466_v27, %v624_v40 }
 0x3df   :  { %v660_v23 = vmul.f32 1.442695, %v644_v61  ;;  %v664_v7 = vmul.f32 1.442695, %v646_v37 }
 0x3e1   :  { %2965 = vpow2.f32 %v660_v23 }
 0x3e4   :  { %v621_v4 = vpop.xlane.xlu2 %620  ;;  %v3510_v25 = vpop.xlane.xlu0 %629 }
 0x3e5   :  { %v645_v28 = vsub.f32 %v596_v52, %v621_v4  ;;  %v633_v29 = vpop.xlane.xlu1 %632 }
 0x3e6   :  { %v649_v19 = vsub.f32 %v600_v41, %v633_v29 }
 0x3e7   :  { %v662_v31 = vmul.f32 1.442695, %v645_v28  ;;  %v3512_v33 = vpop.eup %2965 }
 0x3e8   :  { %v688_v39 = vsel %vm603_vm8, %v3512_v33, 0.0  ;;  %v670_v42 = vmul.f32 1.442695, %v649_v19 }
 0x3e9   :  { %2967 = vpow2.f32 %v662_v31  ;;  %689 = vadd.xlane.f32.xlu0 %v688_v39  ;;  %v642_v31 = vsub.f32 %v3439_v60, %v3470_v30 }
 0x3ea   :  { %2969 = vpow2.f32 %v670_v42 }
 0x3ec   :  { %v615_v43 = vpop.xlane.xlu0 %614  ;;  %v878_v0 = vpop.permute.xlu2 %877 }
 0x3ed   :  { %v643_v44 = vsub.f32 %v594_v1, %v615_v43  ;;  %v666_v1 = vmul.f32 1.442695, %v647_v50 }
 0x3ef   :  { %v3516_v34 = vpop.eup %2967  ;;  %v658_v46 = vmul.f32 1.442695, %v643_v44 }
 0x3f0   :  { %v691_v47 = vsel %vm603_vm8, %v3516_v34, 0.0  ;;  %v3520_v51 = vpop.eup %2969 }
 0x3f1   :  { %2971 = vpow2.f32 %v658_v46  ;;  %692 = vadd.xlane.f32.xlu2 %v691_v47  ;;  %v703_v41 = vsel %vm603_vm8, %v3520_v51, 0.0 }
 0x3f4   :  { %v681_v49 = vpop.xlane.xlu0 %680 }
 0x3f7   :  { %v3522_v52 = vpop.eup %2971 }
 0x3f8   :  { %v685_v54 = vsel %vm603_vm8, %v3522_v52, 0.0 }
 0x3f9   :  { %704 = vadd.xlane.f32.xlu2 %v703_v41  ;;  %686 = vadd.xlane.f32.xlu1 %v685_v54 }
 0x3fc   :  { %v636_v55 = vpop.xlane.xlu0 %635 }
 0x3fd   :  { %v880_v56 = vpop.permute.xlu1 %879  ;;  %v650_v57 = vsub.f32 %v601_v9, %v636_v55  ;;  %758 = vrot.lane.b32.xlu0 %v3393_v35, %s3148_s20 }
 0x3fe   :  { %v889_v59 = vsel %vm767_vm9, %v880_v56, 0 }
 0x3ff   :  { %v672_v63 = vmul.f32 1.442695, %v650_v57  ;;  %897 = vmatpush.bf16.msrb.mxu3 %v889_v59 }
 0x401   :  { %2973 = vpow2.f32 %v672_v63 }
 0x402   :  { %2975 = vpow2.f32 %v666_v1 }
 0x403   :  { %898 = vmatpush.bf16.msrb.mxu3 %v878_v0  ;;  %2977 = vpow2.f32 %v664_v7 }
 0x404   :  { %2979 = vrcp.f32 %v681_v49 }
 0x407   :  { %v3532_v2 = vpop.eup %2973 }
 0x408   :  { %v706_v3 = vsel %vm603_vm8, %v3532_v2, 0.0  ;;  %v3536_v6 = vpop.eup %2975 }
 0x409   :  { %707 = vadd.xlane.f32.xlu2 %v706_v3  ;;  %v697_v35 = vsel %vm603_vm8, %v3536_v6, 0.0  ;;  %v3541_v9 = vpop.eup %2977 }
 0x40a   :  { %v2980_v11 = vpop.eup %2979  ;;  %v694_v12 = vsel %vm603_vm8, %v3541_v9, 0.0 }
 0x40b   :  { %v725_v15 = vmul.f32 %v2980_v11, %v3490_v5 }
 0x40d   :  { %v737_v40 = vpack.c.bf16 %v725_v15, %v725_v15 }
 0x40f   :  { %v3550_v61 = vunpack.c.l.b16 %v737_v40 }
 0x411   :  { %698 = vadd.xlane.f32.xlu2 %v697_v35 }
 0x425   :  { %v678_v10 = vpop.xlane.xlu2 %677 }
 0x426   :  { %2981 = vrcp.f32 %v678_v10 }
 0x427   :  { %695 = vadd.xlane.f32.xlu0 %v694_v12 }
 0x428   :  { %v639_v13 = vpop.xlane.xlu1 %638 }
 0x429   :  { %v651_v18 = vsub.f32 %v3504_v17, %v639_v13  ;;  %839 = vrot.lane.b32.xlu2 %v3414_v24, %s3148_s20  ;;  %v648_v24 = vsub.f32 %v3482_v53, %v3510_v25 }
 0x42b   :  { %v674_v27 = vmul.f32 1.442695, %v651_v18 }
 0x42c   :  { %v2982_v36 = vpop.eup %2981 }
 0x42d   :  { %v724_v21 = vmul.f32 %v2982_v36, %v3501_v16  ;;  %2983 = vpow2.f32 %v674_v27  ;;  %v668_v16 = vmul.f32 1.442695, %v648_v24 }
 0x42f   :  { %v736_v22 = vpack.c.bf16 %v724_v21, %v724_v21  ;;  %2985 = vpow2.f32 %v668_v16 }
 0x431   :  { %v3552_v23 = vunpack.c.l.b16 %v736_v22 }
 0x433   :  { %v3554_v4 = vpop.eup %2983  ;;  %v754_v5 = vpack.c.b16 %v3550_v61, %v3552_v23 }
 0x434   :  { %v709_v17 = vsel %vm603_vm8, %v3554_v4, 0.0 }
 0x435   :  { %710 = vadd.xlane.f32.xlu1 %v709_v17  ;;  %v3564_v28 = vpop.eup %2985 }
 0x436   :  { %v700_v29 = vsel %vm603_vm8, %v3564_v28, 0.0 }
 0x43b   :  { %837 = vrot.lane.b32.xlu0 %v3428_v45, %s3148_s20  ;;  %v656_v45 = vmul.f32 1.442695, %v642_v31 }
 0x44e   :  { %756 = vrot.lane.b32.xlu1 %v3397_v62, %s3148_s20 }
 0x452   :  { %701 = vadd.xlane.f32.xlu2 %v700_v29 }
 0x45c   :  { %v690_v19 = vpop.xlane.xlu0 %689 }
 0x45d   :  { %2987 = vrcp.f32 %v690_v19 }
 0x45e   :  { %2989 = vpow2.f32 %v656_v45 }
 0x463   :  { %v2988_v53 = vpop.eup %2987 }
 0x464   :  { %v693_v39 = vpop.xlane.xlu2 %692  ;;  %v728_v43 = vmul.f32 %v2988_v53, %v3512_v33  ;;  %v3574_v44 = vpop.eup %2989 }
 0x465   :  { %v682_v41 = vsel %vm603_vm8, %v3574_v44, 0.0 }
 0x466   :  { %v740_v49 = vpack.c.bf16 %v728_v43, %v728_v43 }
 0x468   :  { %v793_v54 = vunpack.c.l.b16 %v740_v49 }
 0x46c   :  { %v687_v42 = vpop.xlane.xlu1 %686  ;;  %v705_v47 = vpop.xlane.xlu2 %704 }
 0x46d   :  { %2991 = vrcp.f32 %v687_v42 }
 0x46e   :  { %2993 = vrcp.f32 %v693_v39 }
 0x46f   :  { %v759_v25 = vpop.permute.xlu0 %758  ;;  %2995 = vrcp.f32 %v705_v47 }
 0x470   :  { %v769_v62 = vsel %vm767_vm9, %v759_v25, 0 }
 0x471   :  { %777 = vmatpush.bf16.msrb.mxu1 %v769_v62 }
 0x473   :  { %v2992_v46 = vpop.eup %2991 }
 0x474   :  { %v727_v60 = vmul.f32 %v2992_v46, %v3522_v52  ;;  %v2994_v56 = vpop.eup %2993 }
 0x475   :  { %v2996_v59 = vpop.eup %2995  ;;  %v729_v50 = vmul.f32 %v2994_v56, %v3516_v34 }
 0x476   :  { %v739_v30 = vpack.c.bf16 %v727_v60, %v727_v60  ;;  %v733_v52 = vmul.f32 %v2996_v59, %v3520_v51  ;;  %v2852_v59 = vld [vmem:[%s4221_s6 + $0x8] sm:$0xff] }
 0x477   :  { %v741_v0 = vpack.c.bf16 %v729_v50, %v729_v50 }
 0x478   :  { %683 = vadd.xlane.f32.xlu1 %v682_v41  ;;  %v792_v55 = vunpack.c.l.b16 %v739_v30  ;;  %v745_v1 = vpack.c.bf16 %v733_v52, %v733_v52 }
 0x479   :  { %v794_v7 = vunpack.c.l.b16 %v741_v0 }
 0x47a   :  { %v795_v33 = vpack.c.b16 %v793_v54, %v792_v55  ;;  %v872_v10 = vunpack.c.l.b16 %v745_v1  ;;  %v2851_v1 = vld [vmem:[%s4221_s6] sm:$0xff] }
 0x47b   :  { %v796_v13 = vpack.c.b16 %v794_v7, %v794_v7 }
 0x47c   :  { %v708_v57 = vpop.xlane.xlu2 %707  ;;  %2692 = vmatmul.msk.bf16.vlgmr.msrb.gmra.mxu0 %vm603_vm8, %v795_v33 }
 0x47d   :  { %2997 = vrcp.f32 %v708_v57 }
 0x483   :  { %v2998_v63 = vpop.eup %2997 }
 0x484   :  { %v734_v3 = vmul.f32 %v2998_v63, %v3532_v2  ;;  %v699_v35 = vpop.xlane.xlu2 %698 }
 0x486   :  { %v746_v37 = vpack.c.bf16 %v734_v3, %v734_v3 }
 0x488   :  { %v873_v11 = vunpack.c.l.b16 %v746_v37 }
 0x48a   :  { %v875_v12 = vpack.c.b16 %v873_v11, %v872_v10 }
 0x48c   :  { %2696 = vmatmul.msk.bf16.vlgmr.msrb.gmra.mxu3 %vm603_vm8, %v875_v12  ;;  %v840_v15 = vpop.permute.xlu2 %839  ;;  %2693 = vmatmul.msk.bf16.gmra.mxu0 %vm603_vm8, %v796_v13 }
 0x48d   :  { %v849_v18 = vsel %vm767_vm9, %v840_v15, 0 }
 0x48e   :  { %857 = vmatpush.bf16.msra.mxu2 %v849_v18 }
 0x49a   :  { %v696_v34 = vpop.xlane.xlu0 %695 }
 0x49b   :  { %2999 = vrcp.f32 %v696_v34 }
 0x49c   :  { %3001 = vrcp.f32 %v699_v35 }
 0x4a1   :  { %v3000_v51 = vpop.eup %2999 }
 0x4a2   :  { %v3002_v2 = vpop.eup %3001  ;;  %v730_v27 = vmul.f32 %v3000_v51, %v3541_v9 }
 0x4a3   :  { %v731_v36 = vmul.f32 %v3002_v2, %v3536_v6 }
 0x4a4   :  { %v742_v40 = vpack.c.bf16 %v730_v27, %v730_v27 }
 0x4a5   :  { %v743_v22 = vpack.c.bf16 %v731_v36, %v731_v36 }
 0x4a6   :  { %v832_v17 = vunpack.c.l.b16 %v742_v40 }
 0x4a7   :  { %v833_v24 = vunpack.c.l.b16 %v743_v22 }
 0x4a8   :  { %v711_v21 = vpop.xlane.xlu1 %710 }
 0x4a9   :  { %3003 = vrcp.f32 %v711_v21  ;;  %v835_v31 = vpack.c.b16 %v833_v24, %v832_v17 }
 0x4ad   :  { %v838_v16 = vpop.permute.xlu0 %837 }
 0x4ae   :  { %858 = vmatpush.bf16.msra.mxu2 %v838_v16 }
 0x4af   :  { %v3004_v29 = vpop.eup %3003 }
 0x4b0   :  { %v735_v19 = vmul.f32 %v3004_v29, %v3554_v4 }
 0x4b1   :  { %2694 = vmatmul.msk.bf16.vlgmr.msra.gmra.mxu2 %vm603_vm8, %v835_v31 }
 0x4b2   :  { %v747_v45 = vpack.c.bf16 %v735_v19, %v735_v19  ;;  %v2932_v19 = vld [vmem:[%s4222_s7] ss:$0 sm:$0xff] }
 0x4b4   :  { %v874_v39 = vunpack.c.l.b16 %v747_v45 }
 0x4b6   :  { %v876_v42 = vpack.c.b16 %v874_v39, %v874_v39 }
 0x4b8   :  { %2697 = vmatmul.msk.bf16.gmra.mxu3 %vm603_vm8, %v876_v42 }
 0x4c0   :  { %v757_v6 = vpop.permute.xlu1 %756 }
 0x4c1   :  { %778 = vmatpush.bf16.msrb.mxu1 %v757_v6 }
 0x4c4   :  { %2690 = vmatmul.msk.bf16.vlgmr.msrb.gmra.mxu1 %vm603_vm8, %v754_v5 }
 0x4c5   :  { %v702_v9 = vpop.xlane.xlu2 %701  ;;  %977 = vmatpush.bf16.msra.mxu1 %v2852_v59 }
 0x4c6   :  { %3005 = vrcp.f32 %v702_v9 }
 0x4c9   :  { %978 = vmatpush.bf16.msra.mxu1 %v2851_v1 }
 0x4cc   :  { %v3006_v53 = vpop.eup %3005 }
 0x4cd   :  { %v732_v25 = vmul.f32 %v3006_v53, %v3564_v28 }
 0x4cf   :  { %v744_v4 = vpack.c.bf16 %v732_v25, %v732_v25 }
 0x4d1   :  { %v834_v43 = vunpack.c.l.b16 %v744_v4 }
 0x4d3   :  { %v836_v62 = vpack.c.b16 %v834_v43, %v834_v43 }
 0x4d5   :  { %2695 = vmatmul.msk.bf16.gmra.mxu2 %vm603_vm8, %v836_v62 }
 0x4eb   :  { %v684_v46 = vpop.xlane.xlu1 %683 }
 0x4ec   :  { %3007 = vrcp.f32 %v684_v46 }
 0x4f2   :  { %v3008_v47 = vpop.eup %3007 }
 0x4f3   :  { %v726_v49 = vmul.f32 %v3008_v47, %v3574_v44 }
 0x4f5   :  { %v738_v60 = vpack.c.bf16 %v726_v49, %v726_v49 }
 0x4f7   :  { %v753_v30 = vunpack.c.l.b16 %v738_v60 }
 0x4f9   :  { %v755_v61 = vpack.c.b16 %v753_v30, %v753_v30  ;;  %v820_v23 = vpop.f32.mrf.mxu0 }
 0x4fb   :  { %2691 = vmatmul.msk.bf16.gmra.mxu1 %vm603_vm8, %v755_v61 }
 0x501   :  { %v822_v5 = vpop.f32.mrf.mxu0 }
 0x502   :  { %v2890_v41 = vpack.i.bf16 %v822_v5, %v820_v23 }
 0x504   :  { %2891 = vrot.lane.b32.xlu1 %v2890_v41, %s3150_s21 }
 0x509   :  { %v825_v28 = vpop.f32.mrf.mxu0 }
 0x50f   :  { %v900_v54 = vpop.f32.mrf.mxu3 }
 0x510   :  { %v2895_v55 = vpack.i.bf16 %v900_v54, %v825_v28 }
 0x511   :  { %v827_v33 = vpop.f32.mrf.mxu0 }
 0x512   :  { %2896 = vrot.lane.b32.xlu0 %v2895_v55, %s3150_s21 }
 0x517   :  { %v902_v56 = vpop.f32.mrf.mxu3 }
 0x534   :  { %v860_v52 = vpop.f32.mrf.mxu2 }
 0x53b   :  { %v905_v57 = vpop.f32.mrf.mxu3 }
 0x53c   :  { %v2900_v44 = vpack.i.bf16 %v905_v57, %v902_v56  ;;  %v862_v63 = vpop.f32.mrf.mxu2 }
 0x53e   :  { %2901 = vrot.lane.b32.xlu0 %v2900_v44, %s3150_s21 }
 0x541   :  { %v780_v35 = vpop.f32.mrf.mxu1 }
 0x543   :  { %v907_v50 = vpop.f32.mrf.mxu3 }
 0x549   :  { %v782_v37 = vpop.f32.mrf.mxu1 }
 0x558   :  { %v865_v0 = vpop.f32.mrf.mxu2 }
 0x560   :  { %v867_v3 = vpop.f32.mrf.mxu2 }
 0x576   :  { %v2892_v7 = vpop.permute.xlu1 %2891 }
 0x577   :  { %v2894_v10 = vunpack.i.h.bf16 %v2892_v7  ;;  %v2893_v11 = vunpack.i.l.bf16 %v2892_v7 }
 0x578   :  { %v785_v12 = vpop.f32.mrf.mxu1 }
 0x579   :  { %v921_v13 = vsel %vm422_vm6, %v780_v35, %v2893_v11  ;;  %v922_v15 = vsel %vm422_vm6, %v782_v37, %v2894_v10 }
 0x57a   :  { %v939_v18 = vpack.c.bf16 %v922_v15, %v921_v13 }
 0x57c   :  { %2706 = vmatmul.msk.bf16.vlgmr.msra.gmra.mxu1 %vm152_vm1, %v939_v18 }
 0x580   :  { %v787_v34 = vpop.f32.mrf.mxu1 }
 0x584   :  { %v2897_v51 = vpop.permute.xlu0 %2896 }
 0x585   :  { %v2899_v2 = vunpack.i.h.bf16 %v2897_v51  ;;  %v2898_v27 = vunpack.i.l.bf16 %v2897_v51 }
 0x587   :  { %v923_v36 = vsel %vm422_vm6, %v785_v12, %v2898_v27  ;;  %v936_v40 = vsel %vm422_vm6, %v860_v52, %v2899_v2  ;;  %v2853_v12 = vld [vmem:[%s4225_s10] sm:$0xff] }
 0x588   :  { %v940_v21 = vpack.c.bf16 %v936_v40, %v923_v36 }
 0x58c   :  { %2707 = vmatmul.msk.bf16.gmra.mxu1 %vm152_vm1, %v940_v21 }
 0x5b0   :  { %v2902_v22 = vpop.permute.xlu0 %2901 }
 0x5b1   :  { %v2904_v17 = vunpack.i.h.bf16 %v2902_v22  ;;  %v2903_v24 = vunpack.i.l.bf16 %v2902_v22 }
 0x5b3   :  { %v937_v16 = vsel %vm422_vm6, %v862_v63, %v2903_v24  ;;  %v938_v29 = vsel %vm422_vm6, %v865_v0, %v2904_v17 }
 0x5b4   :  { %v941_v31 = vpack.c.bf16 %v938_v29, %v937_v16 }
 0x5b6   :  { %2708 = vmatmul.msk.bf16.gmra.mxu1 %vm152_vm1, %v941_v31 }
 0x5f9   :  { %v980_v45 = vpop.f32.mrf.mxu1 }
 0x5fa   :  { %v981_v39 = vadd.f32 %v2932_v19, %v980_v45 }
 0x5fc   :  { %v3621_v42 = vadd.f32 %v981_v39, %v3268_v8 }
 0x5fe   :  { %v1003_v6 = vsel %vm152_vm1, %v3621_v42, 0.0  ;;  %v1027_v9 = vmul.f32 %v3621_v42, %v3621_v42 }
 0x5ff   :  { %1004 = vadd.xlane.f32.xlu0 %v1003_v6 }
 0x600   :  { %v1033_v53 = vsel %vm152_vm1, %v1027_v9, 0.0 }
 0x601   :  { %v982_v25 = vpop.f32.mrf.mxu1  ;;  %1034 = vadd.xlane.f32.xlu2 %v1033_v53 }
 0x602   :  { %v983_v4 = vadd.f32 %v2932_v19, %v982_v25 }
 0x604   :  { %v3629_v43 = vadd.f32 %v983_v4, %v3278_v14 }
 0x606   :  { %v1006_v62 = vsel %vm152_vm1, %v3629_v43, 0.0  ;;  %v1028_v8 = vmul.f32 %v3629_v43, %v3629_v43 }
 0x607   :  { %1007 = vadd.xlane.f32.xlu1 %v1006_v62 }
 0x608   :  { %v1036_v46 = vsel %vm152_vm1, %v1028_v8, 0.0 }
 0x609   :  { %1037 = vadd.xlane.f32.xlu2 %v1036_v46  ;;  %v985_v47 = vpop.f32.mrf.mxu1 }
 0x60a   :  { %v986_v49 = vadd.f32 %v2932_v19, %v985_v47  ;;  %v3685_v47 = vld [vmem:[%s4223_s8] ss:$0 sm:$0xff] }
 0x60c   :  { %v3637_v60 = vadd.f32 %v986_v49, %v3288_v20 }
 0x60e   :  { %v1009_v30 = vsel %vm152_vm1, %v3637_v60, 0.0  ;;  %v1029_v20 = vmul.f32 %v3637_v60, %v3637_v60 }
 0x610   :  { %v1039_v54 = vsel %vm152_vm1, %v1029_v20, 0.0 }
 0x611   :  { %v987_v14 = vpop.f32.mrf.mxu1  ;;  %1010 = vadd.xlane.f32.xlu2 %v1009_v30 }
 0x612   :  { %v988_v61 = vadd.f32 %v2932_v19, %v987_v14 }
 0x614   :  { %v3642_v23 = vadd.f32 %v988_v61, %v3298_v26 }
 0x616   :  { %v1030_v5 = vmul.f32 %v3642_v23, %v3642_v23  ;;  %v1012_v28 = vsel %vm152_vm1, %v3642_v23, 0.0 }
 0x618   :  { %v1042_v41 = vsel %vm152_vm1, %v1030_v5, 0.0 }
 0x619   :  { %1043 = vadd.xlane.f32.xlu0 %v1042_v41  ;;  %1013 = vadd.xlane.f32.xlu2 %v1012_v28 }
 0x621   :  { %1040 = vadd.xlane.f32.xlu2 %v1039_v54 }
 0x633   :  { %v990_v55 = vpop.f32.mrf.mxu1 }
 0x634   :  { %v991_v33 = vadd.f32 %v2932_v19, %v990_v55 }
 0x636   :  { %v3653_v26 = vadd.f32 %v991_v33, %v3308_v32 }
 0x638   :  { %v1015_v56 = vsel %vm152_vm1, %v3653_v26, 0.0  ;;  %v1031_v57 = vmul.f32 %v3653_v26, %v3653_v26 }
 0x639   :  { %1016 = vadd.xlane.f32.xlu2 %v1015_v56  ;;  %v3693_v56 = vld [vmem:[%s4224_s9] ss:$0 sm:$0xff] }
 0x63a   :  { %v1045_v44 = vsel %vm152_vm1, %v1031_v57, 0.0 }
 0x63b   :  { %v992_v59 = vpop.f32.mrf.mxu1  ;;  %1046 = vadd.xlane.f32.xlu0 %v1045_v44 }
 0x63c   :  { %v993_v50 = vadd.f32 %v2932_v19, %v992_v59 }
 0x63e   :  { %v3661_v52 = vadd.f32 %v993_v50, %v3318_v38  ;;  %v2854_v38 = vld [vmem:[%s4225_s10 + $0x8] sm:$0xff] }
 0x63f   :  { %1203 = vmatpush.bf16.msra.mxu0 %v2854_v38 }
 0x640   :  { %v1018_v63 = vsel %vm152_vm1, %v3661_v52, 0.0  ;;  %v1032_v32 = vmul.f32 %v3661_v52, %v3661_v52 }
 0x641   :  { %1019 = vadd.xlane.f32.xlu1 %v1018_v63 }
 0x642   :  { %v1048_v0 = vsel %vm152_vm1, %v1032_v32, 0.0 }
 0x643   :  { %1049 = vadd.xlane.f32.xlu2 %v1048_v0  ;;  %1204 = vmatpush.bf16.msra.mxu0 %v2853_v12 }
 0x672   :  { %v1005_v1 = vpop.xlane.xlu0 %1004 }
 0x673   :  { %v1021_v3 = vmul.f32 %v1005_v1, %v3325_v48 }
 0x674   :  { %v1035_v35 = vpop.xlane.xlu2 %1034 }
 0x675   :  { %v1057_v37 = vmul.f32 %v1021_v3, %v1021_v3  ;;  %v1051_v7 = vmul.f32 %v1035_v35, %v3325_v48  ;;  %v1069_v25 = vsub.f32 %v3621_v42, %v1021_v3 }
 0x677   :  { %v1063_v10 = vsub.f32 %v1051_v7, %v1057_v37 }
 0x679   :  { %v1075_v11 = vadd.f32 1e-05, %v1063_v10 }
 0x67a   :  { %v1008_v13 = vpop.xlane.xlu1 %1007 }
 0x67b   :  { %3009 = vrsqrt.f32 %v1075_v11  ;;  %v1022_v15 = vmul.f32 %v1008_v13, %v3325_v48  ;;  %vm1087_vm11 = vweird.f32 %v1075_v11 }
 0x67c   :  { %v1038_v18 = vpop.xlane.xlu2 %1037 }
 0x67d   :  { %v1058_v34 = vmul.f32 %v1022_v15, %v1022_v15  ;;  %v1052_v51 = vmul.f32 %v1038_v18, %v3325_v48  ;;  %v1070_v61 = vsub.f32 %v3629_v43, %v1022_v15 }
 0x67f   :  { %v1064_v2 = vsub.f32 %v1052_v51, %v1058_v34 }
 0x681   :  { %v3010_v27 = vpop.eup %3009  ;;  %v1076_v36 = vadd.f32 1e-05, %v1064_v2 }
 0x682   :  { %v1082_v40 = vmul.f32 %v3010_v27, %v1075_v11  ;;  %vm1088_vm10 = vweird.f32 %v3010_v27 }
 0x683   :  { %3011 = vrsqrt.f32 %v1076_v36  ;;  %vm1089_vm12 = vmor %vm1087_vm11, %vm1088_vm10  ;;  %vm1097_vm14 = vweird.f32 %v1076_v36 }
 0x684   :  { %v1083_v21 = vmul.f32 %v3010_v27, %v1082_v40  ;;  %v1011_v22 = vpop.xlane.xlu2 %1010 }
 0x685   :  { %v1023_v46 = vmul.f32 %v1011_v22, %v3325_v48 }
 0x686   :  { %v1084_v17 = vmul.f32 0.5, %v1083_v21 }
 0x687   :  { %v1059_v28 = vmul.f32 %v1023_v46, %v1023_v46  ;;  %v1071_v2 = vsub.f32 %v3637_v60, %v1023_v46 }
 0x688   :  { %v1085_v24 = vsub.f32 1.5, %v1084_v17 }
 0x689   :  { %v3012_v16 = vpop.eup %3011 }
 0x68a   :  { %v1086_v29 = vmul.f32 %v3010_v27, %v1085_v24  ;;  %v1092_v31 = vmul.f32 %v3012_v16, %v1076_v36  ;;  %vm1098_vm13 = vweird.f32 %v3012_v16 }
 0x68b   :  { %vm1099_vm15 = vmor %vm1097_vm14, %vm1098_vm13 }
 0x68c   :  { %v1093_v19 = vmul.f32 %v3012_v16, %v1092_v31  ;;  %v1044_v45 = vpop.xlane.xlu0 %1043  ;;  %v1014_v39 = vpop.xlane.xlu2 %1013  ;;  %v1090_v9 = vsel %vm1089_vm12, %v3010_v27, %v1086_v29 }
 0x68d   :  { %v1024_v6 = vmul.f32 %v1014_v39, %v3325_v48  ;;  %v1054_v4 = vmul.f32 %v1044_v45, %v3325_v48  ;;  %v1141_v49 = vmul.f32 %v1090_v9, %v1069_v25 }
 0x68e   :  { %v1094_v53 = vmul.f32 0.5, %v1093_v19 }
 0x68f   :  { %v1060_v62 = vmul.f32 %v1024_v6, %v1024_v6  ;;  %v1150_v54 = vmul.f32 %v3685_v47, %v1141_v49  ;;  %v1072_v15 = vsub.f32 %v3642_v23, %v1024_v6 }
 0x690   :  { %v1095_v8 = vsub.f32 1.5, %v1094_v53 }
 0x691   :  { %v1066_v30 = vsub.f32 %v1054_v4, %v1060_v62  ;;  %v1159_v50 = vadd.f32 %v3693_v56, %v1150_v54 }
 0x692   :  { %v1096_v14 = vmul.f32 %v3012_v16, %v1095_v8 }
 0x693   :  { %v1078_v5 = vadd.f32 1e-05, %v1066_v30 }
 0x694   :  { %v1100_v41 = vsel %vm1099_vm15, %v3012_v16, %v1096_v14  ;;  %v1041_v20 = vpop.xlane.xlu2 %1040 }
 0x695   :  { %v1142_v55 = vmul.f32 %v1100_v41, %v1070_v61  ;;  %3013 = vrsqrt.f32 %v1078_v5  ;;  %v1053_v33 = vmul.f32 %v1041_v20, %v3325_v48  ;;  %vm1117_vm2 = vweird.f32 %v1078_v5 }
 0x697   :  { %v1151_v57 = vmul.f32 %v3685_v47, %v1142_v55  ;;  %v1065_v44 = vsub.f32 %v1053_v33, %v1059_v28 }
 0x699   :  { %v1077_v59 = vadd.f32 1e-05, %v1065_v44  ;;  %v1160_v63 = vadd.f32 %v3693_v56, %v1151_v57 }
 0x69b   :  { %v3014_v32 = vpop.eup %3013  ;;  %3015 = vrsqrt.f32 %v1077_v59  ;;  %v1165_v0 = vpack.c.bf16 %v1160_v63, %v1159_v50  ;;  %vm1107_vm5 = vweird.f32 %v1077_v59 }
 0x69c   :  { %v1112_v1 = vmul.f32 %v3014_v32, %v1078_v5  ;;  %vm1118_vm0 = vweird.f32 %v3014_v32 }
 0x69d   :  { %2717 = vmatmul.msk.bf16.vlgmr.msra.gmra.mxu0 %vm152_vm1, %v1165_v0  ;;  %vm1119_vm3 = vmor %vm1117_vm2, %vm1118_vm0  ;;  %vm1314_vm0 = vcmask 523264  }
 0x69e   :  { %v1113_v3 = vmul.f32 %v3014_v32, %v1112_v1 }
 0x6a0   :  { %v1114_v35 = vmul.f32 0.5, %v1113_v3 }
 0x6a1   :  { %v3016_v37 = vpop.eup %3015 }
 0x6a2   :  { %v1115_v7 = vsub.f32 1.5, %v1114_v35  ;;  %v1102_v38 = vmul.f32 %v3016_v37, %v1077_v59  ;;  %vm1108_vm4 = vweird.f32 %v3016_v37 }
 0x6a3   :  { %vm1109_vm7 = vmor %vm1107_vm5, %vm1108_vm4 }
 0x6a4   :  { %v1116_v10 = vmul.f32 %v3014_v32, %v1115_v7  ;;  %v1103_v11 = vmul.f32 %v3016_v37, %v1102_v38  ;;  %v2858_v38 = vld [vmem:[%s4227_s12 + $0x18] sm:$0xff] }
 0x6a5   :  { %1328 = vmatpush.bf16.msrb.mxu2 %v2858_v38 }
 0x6a6   :  { %v1120_v12 = vsel %vm1119_vm3, %v3014_v32, %v1116_v10  ;;  %v1104_v13 = vmul.f32 0.5, %v1103_v11  ;;  %v2857_v10 = vld [vmem:[%s4227_s12 + $0x10] sm:$0xff] }
 0x6a7   :  { %v1144_v34 = vmul.f32 %v1120_v12, %v1072_v15  ;;  %v2855_v12 = vld [vmem:[%s4227_s12] sm:$0xff] }
 0x6a8   :  { %v1105_v18 = vsub.f32 1.5, %v1104_v13 }
 0x6a9   :  { %v1153_v21 = vmul.f32 %v3685_v47, %v1144_v34  ;;  %1329 = vmatpush.bf16.msrb.mxu2 %v2857_v10 }
 0x6aa   :  { %v1106_v51 = vmul.f32 %v3016_v37, %v1105_v18 }
 0x6ab   :  { %v1162_v45 = vadd.f32 %v3693_v56, %v1153_v21 }
 0x6ac   :  { %v1017_v27 = vpop.xlane.xlu2 %1016  ;;  %v1110_v36 = vsel %vm1109_vm7, %v3016_v37, %v1106_v51 }
 0x6ad   :  { %v1025_v40 = vmul.f32 %v1017_v27, %v3325_v48  ;;  %v1143_v17 = vmul.f32 %v1110_v36, %v1071_v2 }
 0x6ae   :  { %v1047_v22 = vpop.xlane.xlu0 %1046 }
 0x6af   :  { %v1061_v24 = vmul.f32 %v1025_v40, %v1025_v40  ;;  %v1055_v16 = vmul.f32 %v1047_v22, %v3325_v48  ;;  %v1152_v29 = vmul.f32 %v3685_v47, %v1143_v17  ;;  %v1073_v57 = vsub.f32 %v3653_v26, %v1025_v40 }
 0x6b1   :  { %v1067_v31 = vsub.f32 %v1055_v16, %v1061_v24  ;;  %v1161_v19 = vadd.f32 %v3693_v56, %v1152_v29 }
 0x6b3   :  { %v1079_v39 = vadd.f32 1e-05, %v1067_v31  ;;  %v1166_v9 = vpack.c.bf16 %v1162_v45, %v1161_v19 }
 0x6b4   :  { %v1020_v6 = vpop.xlane.xlu1 %1019 }
 0x6b5   :  { %3017 = vrsqrt.f32 %v1079_v39  ;;  %v1026_v53 = vmul.f32 %v1020_v6, %v3325_v48  ;;  %2718 = vmatmul.msk.bf16.gmra.mxu0 %vm152_vm1, %v1166_v9  ;;  %vm1127_vm11 = vweird.f32 %v1079_v39 }
 0x6b6   :  { %v1050_v25 = vpop.xlane.xlu2 %1049 }
 0x6b7   :  { %v1062_v4 = vmul.f32 %v1026_v53, %v1026_v53  ;;  %v1056_v62 = vmul.f32 %v1050_v25, %v3325_v48  ;;  %v1074_v63 = vsub.f32 %v3661_v52, %v1026_v53 }
 0x6b9   :  { %v1068_v8 = vsub.f32 %v1056_v62, %v1062_v4 }
 0x6bb   :  { %v3018_v46 = vpop.eup %3017  ;;  %v1080_v49 = vadd.f32 1e-05, %v1068_v8 }
 0x6bc   :  { %v1122_v30 = vmul.f32 %v3018_v46, %v1079_v39  ;;  %vm1128_vm10 = vweird.f32 %v3018_v46 }
 0x6bd   :  { %3019 = vrsqrt.f32 %v1080_v49  ;;  %vm1129_vm12 = vmor %vm1127_vm11, %vm1128_vm10  ;;  %vm1137_vm14 = vweird.f32 %v1080_v49 }
 0x6be   :  { %v1123_v14 = vmul.f32 %v3018_v46, %v1122_v30 }
 0x6c0   :  { %v1124_v61 = vmul.f32 0.5, %v1123_v14 }
 0x6c2   :  { %v1125_v5 = vsub.f32 1.5, %v1124_v61 }
 0x6c3   :  { %v3020_v41 = vpop.eup %3019 }
 0x6c4   :  { %v1126_v28 = vmul.f32 %v3018_v46, %v1125_v5  ;;  %v1132_v20 = vmul.f32 %v3020_v41, %v1080_v49  ;;  %vm1138_vm13 = vweird.f32 %v3020_v41 }
 0x6c5   :  { %vm1139_vm15 = vmor %vm1137_vm14, %vm1138_vm13 }
 0x6c6   :  { %v1133_v54 = vmul.f32 %v3020_v41, %v1132_v20  ;;  %v1130_v55 = vsel %vm1129_vm12, %v3018_v46, %v1126_v28 }
 0x6c7   :  { %v1145_v59 = vmul.f32 %v1130_v55, %v1073_v57 }
 0x6c8   :  { %v1134_v33 = vmul.f32 0.5, %v1133_v54 }
 0x6c9   :  { %v1154_v1 = vmul.f32 %v3685_v47, %v1145_v59 }
 0x6ca   :  { %v1135_v44 = vsub.f32 1.5, %v1134_v33 }
 0x6cb   :  { %v1163_v35 = vadd.f32 %v3693_v56, %v1154_v1 }
 0x6cc   :  { %v1136_v50 = vmul.f32 %v3020_v41, %v1135_v44 }
 0x6ce   :  { %v1140_v32 = vsel %vm1139_vm15, %v3020_v41, %v1136_v50 }
 0x6cf   :  { %v1146_v0 = vmul.f32 %v1140_v32, %v1074_v63 }
 0x6d1   :  { %v1155_v3 = vmul.f32 %v3685_v47, %v1146_v0  ;;  %v2856_v47 = vld [vmem:[%s4227_s12 + $0x8] sm:$0xff] }
 0x6d2   :  { %1330 = vmatpush.bf16.msrb.mxu2 %v2856_v47 }
 0x6d3   :  { %v1164_v37 = vadd.f32 %v3693_v56, %v1155_v3  ;;  %v3729_v56 = vld [vmem:[%s4226_s11] ss:$0 sm:$0xff] }
 0x6d5   :  { %v1167_v7 = vpack.c.bf16 %v1164_v37, %v1163_v35 }
 0x6d6   :  { %1331 = vmatpush.bf16.msrb.mxu2 %v2855_v12 }
 0x6d7   :  { %2719 = vmatmul.msk.bf16.gmra.mxu0 %vm152_vm1, %v1167_v7 }
 0x71a   :  { %v1206_v11 = vpop.f32.mrf.mxu0 }
 0x71b   :  { %v1207_v13 = vadd.f32 %v3729_v56, %v1206_v11 }
 0x71d   :  { %v1221_v15 = vmul.f32 %v1207_v13, %v1207_v13 }
 0x71f   :  { %v1227_v18 = vmul.f32 %v1221_v15, %v1207_v13 }
 0x721   :  { %v1233_v34 = vmul.f32 0.044715, %v1227_v18 }
 0x722   :  { %v1208_v51 = vpop.f32.mrf.mxu0 }
 0x723   :  { %v1239_v2 = vadd.f32 %v1233_v34, %v1207_v13  ;;  %v1209_v27 = vadd.f32 %v3729_v56, %v1208_v51 }
 0x725   :  { %v1245_v36 = vmul.f32 0.7978846, %v1239_v2  ;;  %v1222_v40 = vmul.f32 %v1209_v27, %v1209_v27 }
 0x727   :  { %v1228_v21 = vmul.f32 %v1222_v40, %v1209_v27  ;;  %3021 = vtanh.f32 %v1245_v36 }
 0x729   :  { %v1234_v22 = vmul.f32 0.044715, %v1228_v21 }
 0x72b   :  { %v1240_v17 = vadd.f32 %v1234_v22, %v1209_v27 }
 0x72d   :  { %v1246_v24 = vmul.f32 0.7978846, %v1240_v17  ;;  %v3022_v16 = vpop.eup %3021 }
 0x72e   :  { %v1257_v29 = vadd.f32 1.0, %v3022_v16 }
 0x72f   :  { %3023 = vtanh.f32 %v1246_v24 }
 0x730   :  { %v1263_v6 = vmul.f32 0.5, %v1257_v29 }
 0x732   :  { %v1211_v31 = vpop.f32.mrf.mxu0  ;;  %v1269_v62 = vmul.f32 %v1263_v6, %v1207_v13 }
 0x733   :  { %v1212_v19 = vadd.f32 %v3729_v56, %v1211_v31 }
 0x735   :  { %v3024_v45 = vpop.eup %3023  ;;  %v1223_v39 = vmul.f32 %v1212_v19, %v1212_v19 }
 0x736   :  { %v1258_v9 = vadd.f32 1.0, %v3024_v45 }
 0x737   :  { %v1229_v53 = vmul.f32 %v1223_v39, %v1212_v19 }
 0x738   :  { %v1264_v25 = vmul.f32 0.5, %v1258_v9 }
 0x739   :  { %v1235_v4 = vmul.f32 0.044715, %v1229_v53 }
 0x73a   :  { %v1270_v8 = vmul.f32 %v1264_v25, %v1209_v27  ;;  %v1213_v46 = vpop.f32.mrf.mxu0 }
 0x73b   :  { %v1241_v49 = vadd.f32 %v1235_v4, %v1212_v19  ;;  %v1214_v30 = vadd.f32 %v3729_v56, %v1213_v46 }
 0x73c   :  { %v1275_v14 = vpack.c.bf16 %v1270_v8, %v1269_v62 }
 0x73d   :  { %v1247_v61 = vmul.f32 0.7978846, %v1241_v49  ;;  %v1224_v5 = vmul.f32 %v1214_v30, %v1214_v30 }
 0x73e   :  { %2736 = vmatmul.msk.bf16.vlgmr.msrb.gmra.mxu2 %vm1314_vm0, %v1275_v14 }
 0x73f   :  { %v1230_v41 = vmul.f32 %v1224_v5, %v1214_v30  ;;  %3025 = vtanh.f32 %v1247_v61 }
 0x741   :  { %v1236_v28 = vmul.f32 0.044715, %v1230_v41 }
 0x743   :  { %v1242_v20 = vadd.f32 %v1236_v28, %v1214_v30 }
 0x745   :  { %v1248_v54 = vmul.f32 0.7978846, %v1242_v20  ;;  %v3026_v55 = vpop.eup %3025 }
 0x746   :  { %v1259_v33 = vadd.f32 1.0, %v3026_v55 }
 0x747   :  { %3027 = vtanh.f32 %v1248_v54 }
 0x748   :  { %v1265_v59 = vmul.f32 0.5, %v1259_v33 }
 0x74a   :  { %v1271_v63 = vmul.f32 %v1265_v59, %v1212_v19 }
 0x74d   :  { %v3028_v57 = vpop.eup %3027 }
 0x74e   :  { %v1260_v44 = vadd.f32 1.0, %v3028_v57 }
 0x750   :  { %v1266_v50 = vmul.f32 0.5, %v1260_v44 }
 0x752   :  { %v1272_v32 = vmul.f32 %v1266_v50, %v1214_v30 }
 0x754   :  { %v1216_v0 = vpop.f32.mrf.mxu0  ;;  %v1276_v3 = vpack.c.bf16 %v1272_v32, %v1271_v63 }
 0x755   :  { %v1217_v1 = vadd.f32 %v3729_v56, %v1216_v0 }
 0x756   :  { %2737 = vmatmul.msk.bf16.gmra.mxu2 %vm1314_vm0, %v1276_v3 }
 0x757   :  { %v1225_v35 = vmul.f32 %v1217_v1, %v1217_v1 }
 0x759   :  { %v1231_v37 = vmul.f32 %v1225_v35, %v1217_v1 }
 0x75b   :  { %v1237_v7 = vmul.f32 0.044715, %v1231_v37 }
 0x75c   :  { %v1218_v38 = vpop.f32.mrf.mxu0 }
 0x75d   :  { %v1243_v10 = vadd.f32 %v1237_v7, %v1217_v1  ;;  %v1219_v47 = vadd.f32 %v3729_v56, %v1218_v38  ;;  %v2936_v56 = vld [vmem:[%s4228_s13] ss:$0 sm:$0xff] }
 0x75f   :  { %v1249_v11 = vmul.f32 0.7978846, %v1243_v10  ;;  %v1226_v12 = vmul.f32 %v1219_v47, %v1219_v47  ;;  %v2859_v10 = vld [vmem:[%s4220_s5 + $0x10] sm:$0xff] }
 0x761   :  { %v1232_v13 = vmul.f32 %v1226_v12, %v1219_v47  ;;  %3029 = vtanh.f32 %v1249_v11 }
 0x763   :  { %v1238_v15 = vmul.f32 0.044715, %v1232_v13 }
 0x765   :  { %v1244_v18 = vadd.f32 %v1238_v15, %v1219_v47 }
 0x767   :  { %v1250_v34 = vmul.f32 0.7978846, %v1244_v18  ;;  %v3030_v51 = vpop.eup %3029 }
 0x768   :  { %v1261_v2 = vadd.f32 1.0, %v3030_v51 }
 0x769   :  { %3031 = vtanh.f32 %v1250_v34 }
 0x76a   :  { %v1267_v40 = vmul.f32 0.5, %v1261_v2 }
 0x76c   :  { %v1273_v22 = vmul.f32 %v1267_v40, %v1217_v1 }
 0x76f   :  { %v3032_v27 = vpop.eup %3031 }
 0x770   :  { %v1262_v36 = vadd.f32 1.0, %v3032_v27 }
 0x772   :  { %v1268_v21 = vmul.f32 0.5, %v1262_v36 }
 0x774   :  { %v1274_v17 = vmul.f32 %v1268_v21, %v1219_v47 }
 0x776   :  { %v1277_v24 = vpack.c.bf16 %v1274_v17, %v1273_v22 }
 0x778   :  { %2738 = vmatmul.msk.bf16.gmra.mxu2 %vm1314_vm0, %v1277_v24 }
 0x7c1   :  { %v1333_v16 = vpop.f32.mrf.mxu2 }
 0x7c2   :  { %v1334_v29 = vadd.f32 %v2936_v56, %v1333_v16 }
 0x7c4   :  { %v3747_v31 = vadd.f32 %v1334_v29, %v3621_v42 }
 0x7c6   :  { %v1358_v19 = vsel %vm152_vm1, %v3747_v31, 0.0  ;;  %v1382_v45 = vmul.f32 %v3747_v31, %v3747_v31 }
 0x7c7   :  { %1359 = vadd.xlane.f32.xlu1 %v1358_v19 }
 0x7c8   :  { %v1388_v39 = vsel %vm152_vm1, %v1382_v45, 0.0 }
 0x7c9   :  { %v1335_v6 = vpop.f32.mrf.mxu2  ;;  %1389 = vadd.xlane.f32.xlu2 %v1388_v39 }
 0x7ca   :  { %v1336_v9 = vadd.f32 %v2936_v56, %v1335_v6 }
 0x7cc   :  { %v3755_v53 = vadd.f32 %v1336_v9, %v3629_v43 }
 0x7ce   :  { %v1361_v25 = vsel %vm152_vm1, %v3755_v53, 0.0  ;;  %v1383_v42 = vmul.f32 %v3755_v53, %v3755_v53 }
 0x7cf   :  { %1362 = vadd.xlane.f32.xlu0 %v1361_v25 }
 0x7d0   :  { %v1391_v4 = vsel %vm152_vm1, %v1383_v42, 0.0 }
 0x7d1   :  { %1392 = vadd.xlane.f32.xlu1 %v1391_v4  ;;  %v3810_v4 = vld [vmem:[%s4218_s3 + $0x1] ss:$0 sm:$0xff] }
 0x7d9   :  { %v1338_v62 = vpop.f32.mrf.mxu2 }
 0x7da   :  { %v1339_v8 = vadd.f32 %v2936_v56, %v1338_v62 }
 0x7dc   :  { %v3763_v46 = vadd.f32 %v1339_v8, %v3637_v60 }
 0x7de   :  { %v1364_v49 = vsel %vm152_vm1, %v3763_v46, 0.0  ;;  %v1384_v43 = vmul.f32 %v3763_v46, %v3763_v46 }
 0x7df   :  { %1365 = vadd.xlane.f32.xlu0 %v1364_v49 }
 0x7e0   :  { %v1394_v30 = vsel %vm152_vm1, %v1384_v43, 0.0 }
 0x7e1   :  { %v1340_v14 = vpop.f32.mrf.mxu2  ;;  %1395 = vadd.xlane.f32.xlu1 %v1394_v30 }
 0x7e2   :  { %v1341_v61 = vadd.f32 %v2936_v56, %v1340_v14 }
 0x7e4   :  { %v3771_v5 = vadd.f32 %v1341_v61, %v3642_v23 }
 0x7e6   :  { %v1367_v41 = vsel %vm152_vm1, %v3771_v5, 0.0  ;;  %v1385_v60 = vmul.f32 %v3771_v5, %v3771_v5 }
 0x7e7   :  { %1368 = vadd.xlane.f32.xlu2 %v1367_v41 }
 0x7e8   :  { %v1397_v28 = vsel %vm152_vm1, %v1385_v60, 0.0 }
 0x7e9   :  { %1398 = vadd.xlane.f32.xlu0 %v1397_v28 }
 0x7fb   :  { %v1343_v20 = vpop.f32.mrf.mxu2 }
 0x7fc   :  { %v1344_v54 = vadd.f32 %v2936_v56, %v1343_v20 }
 0x7fe   :  { %v3779_v55 = vadd.f32 %v1344_v54, %v3653_v26 }
 0x800   :  { %v1370_v33 = vsel %vm152_vm1, %v3779_v55, 0.0  ;;  %v1386_v23 = vmul.f32 %v3779_v55, %v3779_v55 }
 0x801   :  { %1371 = vadd.xlane.f32.xlu2 %v1370_v33  ;;  %v3819_v33 = vld [vmem:[%s4219_s4 + $0x1] ss:$0 sm:$0xff] }
 0x802   :  { %v1400_v57 = vsel %vm152_vm1, %v1386_v23, 0.0 }
 0x803   :  { %v1345_v44 = vpop.f32.mrf.mxu2  ;;  %1401 = vadd.xlane.f32.xlu0 %v1400_v57 }
 0x804   :  { %v1346_v59 = vadd.f32 %v2936_v56, %v1345_v44 }
 0x806   :  { %v3787_v50 = vadd.f32 %v1346_v59, %v3661_v52  ;;  %v2860_v52 = vld [vmem:[%s4220_s5 + $0x18] sm:$0xff] }
 0x807   :  { %1555 = vmatpush.bf16.msra.mxu3 %v2860_v52 }
 0x808   :  { %v1373_v63 = vsel %vm152_vm1, %v3787_v50, 0.0  ;;  %v1387_v26 = vmul.f32 %v3787_v50, %v3787_v50 }
 0x809   :  { %1374 = vadd.xlane.f32.xlu1 %v1373_v63 }
 0x80a   :  { %v1403_v32 = vsel %vm152_vm1, %v1387_v26, 0.0 }
 0x80b   :  { %1404 = vadd.xlane.f32.xlu2 %v1403_v32  ;;  %1556 = vmatpush.bf16.msra.mxu3 %v2859_v10 }
 0x83a   :  { %v1360_v0 = vpop.xlane.xlu1 %1359 }
 0x83b   :  { %v1376_v1 = vmul.f32 %v1360_v0, %v3325_v48 }
 0x83c   :  { %v1390_v3 = vpop.xlane.xlu2 %1389 }
 0x83d   :  { %v1412_v35 = vmul.f32 %v1376_v1, %v1376_v1  ;;  %v1406_v37 = vmul.f32 %v1390_v3, %v3325_v48  ;;  %v1424_v9 = vsub.f32 %v3747_v31, %v1376_v1 }
 0x83f   :  { %v1418_v7 = vsub.f32 %v1406_v37, %v1412_v35 }
 0x841   :  { %v1430_v38 = vadd.f32 1e-05, %v1418_v7 }
 0x842   :  { %v1363_v47 = vpop.xlane.xlu0 %1362 }
 0x843   :  { %3033 = vrsqrt.f32 %v1430_v38  ;;  %v1377_v11 = vmul.f32 %v1363_v47, %v3325_v48  ;;  %vm1442_vm3 = vweird.f32 %v1430_v38 }
 0x844   :  { %v1393_v12 = vpop.xlane.xlu1 %1392 }
 0x845   :  { %v1413_v13 = vmul.f32 %v1377_v11, %v1377_v11  ;;  %v1407_v15 = vmul.f32 %v1393_v12, %v3325_v48  ;;  %v1425_v30 = vsub.f32 %v3755_v53, %v1377_v11 }
 0x847   :  { %v1419_v18 = vsub.f32 %v1407_v15, %v1413_v13 }
 0x849   :  { %v3034_v34 = vpop.eup %3033  ;;  %v1431_v51 = vadd.f32 1e-05, %v1419_v18 }
 0x84a   :  { %v1437_v2 = vmul.f32 %v3034_v34, %v1430_v38  ;;  %vm1443_vm2 = vweird.f32 %v3034_v34 }
 0x84b   :  { %3035 = vrsqrt.f32 %v1431_v51  ;;  %vm1444_vm4 = vmor %vm1442_vm3, %vm1443_vm2  ;;  %vm1452_vm7 = vweird.f32 %v1431_v51 }
 0x84c   :  { %v1438_v27 = vmul.f32 %v3034_v34, %v1437_v2 }
 0x84e   :  { %v1439_v36 = vmul.f32 0.5, %v1438_v27 }
 0x850   :  { %v1440_v40 = vsub.f32 1.5, %v1439_v36 }
 0x851   :  { %v3036_v21 = vpop.eup %3035 }
 0x852   :  { %v1441_v22 = vmul.f32 %v3034_v34, %v1440_v40  ;;  %v1447_v17 = vmul.f32 %v3036_v21, %v1431_v51  ;;  %v1366_v24 = vpop.xlane.xlu0 %1365  ;;  %vm1453_vm5 = vweird.f32 %v3036_v21 }
 0x853   :  { %v1378_v56 = vmul.f32 %v1366_v24, %v3325_v48  ;;  %vm1454_vm10 = vmor %vm1452_vm7, %vm1453_vm5 }
 0x854   :  { %v1448_v16 = vmul.f32 %v3036_v21, %v1447_v17  ;;  %v1396_v29 = vpop.xlane.xlu1 %1395  ;;  %v1445_v39 = vsel %vm1444_vm4, %v3034_v34, %v1441_v22 }
 0x855   :  { %v1414_v19 = vmul.f32 %v1378_v56, %v1378_v56  ;;  %v1408_v45 = vmul.f32 %v1396_v29, %v3325_v48  ;;  %v1496_v62 = vmul.f32 %v1445_v39, %v1424_v9  ;;  %v1426_v11 = vsub.f32 %v3763_v46, %v1378_v56 }
 0x856   :  { %v1449_v6 = vmul.f32 0.5, %v1448_v16 }
 0x857   :  { %v1420_v25 = vsub.f32 %v1408_v45, %v1414_v19  ;;  %v1505_v60 = vmul.f32 %v3810_v4, %v1496_v62 }
 0x858   :  { %v1450_v42 = vsub.f32 1.5, %v1449_v6 }
 0x859   :  { %v1432_v8 = vadd.f32 1e-05, %v1420_v25  ;;  %v1514_v63 = vadd.f32 %v3819_v33, %v1505_v60 }
 0x85a   :  { %v1451_v49 = vmul.f32 %v3036_v21, %v1450_v42  ;;  %v1369_v43 = vpop.xlane.xlu2 %1368 }
 0x85b   :  { %3037 = vrsqrt.f32 %v1432_v8  ;;  %v1379_v14 = vmul.f32 %v1369_v43, %v3325_v48  ;;  %vm1462_vm12 = vweird.f32 %v1432_v8 }
 0x85c   :  { %v1455_v61 = vsel %vm1454_vm10, %v3036_v21, %v1451_v49  ;;  %v1399_v41 = vpop.xlane.xlu0 %1398 }
 0x85d   :  { %v1497_v28 = vmul.f32 %v1455_v61, %v1425_v30  ;;  %v1415_v20 = vmul.f32 %v1379_v14, %v1379_v14  ;;  %v1409_v54 = vmul.f32 %v1399_v41, %v3325_v48  ;;  %v1427_v18 = vsub.f32 %v3771_v5, %v1379_v14 }
 0x85f   :  { %v1506_v23 = vmul.f32 %v3810_v4, %v1497_v28  ;;  %v1421_v57 = vsub.f32 %v1409_v54, %v1415_v20 }
 0x861   :  { %v3038_v44 = vpop.eup %3037  ;;  %v1433_v59 = vadd.f32 1e-05, %v1421_v57  ;;  %v1515_v26 = vadd.f32 %v3819_v33, %v1506_v23 }
 0x862   :  { %v1457_v32 = vmul.f32 %v3038_v44, %v1432_v8  ;;  %vm1463_vm11 = vweird.f32 %v3038_v44 }
 0x863   :  { %3039 = vrsqrt.f32 %v1433_v59  ;;  %v1520_v0 = vpack.c.bf16 %v1515_v26, %v1514_v63  ;;  %vm1464_vm13 = vmor %vm1462_vm12, %vm1463_vm11  ;;  %vm1472_vm15 = vweird.f32 %v1433_v59 }
 0x864   :  { %v1458_v1 = vmul.f32 %v3038_v44, %v1457_v32 }
 0x865   :  { %2753 = vmatmul.msk.bf16.vlgmr.msra.gmra.mxu3 %vm152_vm1, %v1520_v0 }
 0x866   :  { %v1459_v3 = vmul.f32 0.5, %v1458_v1 }
 0x868   :  { %v1460_v35 = vsub.f32 1.5, %v1459_v3 }
 0x869   :  { %v3040_v37 = vpop.eup %3039 }
 0x86a   :  { %v1461_v52 = vmul.f32 %v3038_v44, %v1460_v35  ;;  %v1467_v7 = vmul.f32 %v3040_v37, %v1433_v59  ;;  %vm1473_vm14 = vweird.f32 %v3040_v37 }
 0x86b   :  { %vm1474_vm2 = vmor %vm1472_vm15, %vm1473_vm14 }
 0x86c   :  { %v1468_v38 = vmul.f32 %v3040_v37, %v1467_v7  ;;  %v1465_v10 = vsel %vm1464_vm13, %v3038_v44, %v1461_v52 }
 0x86d   :  { %v1498_v13 = vmul.f32 %v1465_v10, %v1426_v11 }
 0x86e   :  { %v1469_v47 = vmul.f32 0.5, %v1468_v38 }
 0x86f   :  { %v1507_v40 = vmul.f32 %v3810_v4, %v1498_v13 }
 0x870   :  { %v1470_v12 = vsub.f32 1.5, %v1469_v47 }
 0x871   :  { %v1516_v56 = vadd.f32 %v3819_v33, %v1507_v40 }
 0x872   :  { %v1471_v15 = vmul.f32 %v3040_v37, %v1470_v12 }
 0x874   :  { %v1372_v34 = vpop.xlane.xlu2 %1371  ;;  %v1475_v51 = vsel %vm1474_vm2, %v3040_v37, %v1471_v15 }
 0x875   :  { %v1380_v2 = vmul.f32 %v1372_v34, %v3325_v48  ;;  %v1499_v36 = vmul.f32 %v1475_v51, %v1427_v18 }
 0x876   :  { %v1402_v27 = vpop.xlane.xlu0 %1401 }
 0x877   :  { %v1416_v21 = vmul.f32 %v1380_v2, %v1380_v2  ;;  %v1410_v22 = vmul.f32 %v1402_v27, %v3325_v48  ;;  %v1508_v17 = vmul.f32 %v3810_v4, %v1499_v36  ;;  %v1428_v23 = vsub.f32 %v3779_v55, %v1380_v2 }
 0x879   :  { %v1422_v24 = vsub.f32 %v1410_v22, %v1416_v21  ;;  %v1517_v16 = vadd.f32 %v3819_v33, %v1508_v17 }
 0x87b   :  { %v1434_v29 = vadd.f32 1e-05, %v1422_v24  ;;  %v1521_v45 = vpack.c.bf16 %v1517_v16, %v1516_v56 }
 0x87c   :  { %v1375_v19 = vpop.xlane.xlu1 %1374 }
 0x87d   :  { %3041 = vrsqrt.f32 %v1434_v29  ;;  %v1381_v39 = vmul.f32 %v1375_v19, %v3325_v48  ;;  %2754 = vmatmul.msk.bf16.gmra.mxu3 %vm152_vm1, %v1521_v45  ;;  %vm1482_vm4 = vweird.f32 %v1434_v29 }
 0x87e   :  { %v1405_v6 = vpop.xlane.xlu2 %1404 }
 0x87f   :  { %v1417_v9 = vmul.f32 %v1381_v39, %v1381_v39  ;;  %v1411_v25 = vmul.f32 %v1405_v6, %v3325_v48  ;;  %v1429_v63 = vsub.f32 %v3787_v50, %v1381_v39 }
 0x881   :  { %v1423_v42 = vsub.f32 %v1411_v25, %v1417_v9 }
 0x883   :  { %v3042_v62 = vpop.eup %3041  ;;  %v1435_v8 = vadd.f32 1e-05, %v1423_v42 }
 0x884   :  { %v1477_v49 = vmul.f32 %v3042_v62, %v1434_v29  ;;  %vm1483_vm3 = vweird.f32 %v3042_v62 }
 0x885   :  { %3043 = vrsqrt.f32 %v1435_v8  ;;  %vm1484_vm5 = vmor %vm1482_vm4, %vm1483_vm3  ;;  %vm1492_vm10 = vweird.f32 %v1435_v8 }
 0x886   :  { %v1478_v43 = vmul.f32 %v3042_v62, %v1477_v49 }
 0x888   :  { %v1479_v30 = vmul.f32 0.5, %v1478_v43 }
 0x88a   :  { %v1480_v14 = vsub.f32 1.5, %v1479_v30 }
 0x88b   :  { %v3044_v61 = vpop.eup %3043 }
 0x88c   :  { %v1481_v41 = vmul.f32 %v3042_v62, %v1480_v14  ;;  %v1487_v60 = vmul.f32 %v3044_v61, %v1435_v8  ;;  %vm1493_vm7 = vweird.f32 %v3044_v61 }
 0x88d   :  { %vm1494_vm11 = vmor %vm1492_vm10, %vm1493_vm7 }
 0x88e   :  { %v1488_v28 = vmul.f32 %v3044_v61, %v1487_v60  ;;  %v1485_v20 = vsel %vm1484_vm5, %v3042_v62, %v1481_v41 }
 0x88f   :  { %v1500_v44 = vmul.f32 %v1485_v20, %v1428_v23 }
 0x890   :  { %v1489_v54 = vmul.f32 0.5, %v1488_v28 }
 0x891   :  { %v1509_v0 = vmul.f32 %v3810_v4, %v1500_v44 }
 0x892   :  { %v1490_v57 = vsub.f32 1.5, %v1489_v54 }
 0x893   :  { %v1518_v3 = vadd.f32 %v3819_v33, %v1509_v0 }
 0x894   :  { %v1491_v59 = vmul.f32 %v3044_v61, %v1490_v57 }
 0x896   :  { %v1495_v26 = vsel %vm1494_vm11, %v3044_v61, %v1491_v59 }
 0x897   :  { %v1501_v32 = vmul.f32 %v1495_v26, %v1429_v63 }
 0x899   :  { %v1510_v1 = vmul.f32 %v3810_v4, %v1501_v32 }
 0x89b   :  { %v1519_v35 = vadd.f32 %v3819_v33, %v1510_v1 }
 0x89d   :  { %v1522_v37 = vpack.c.bf16 %v1519_v35, %v1518_v3 }
 0x89f   :  { %2755 = vmatmul.msk.bf16.gmra.mxu3 %vm152_vm1, %v1522_v37 }
 0x8e8   :  { %v1558_v52 = vpop.f32.mrf.mxu3 }
 0x8e9   :  { %v1597_v7 = vpack.c.bf16 %v1558_v52, %v1558_v52 }
 0x8eb   :  { %v1612_v11 = vunpack.c.l.b16 %v1597_v7 }
 0x8f0   :  { %v1560_v38 = vpop.f32.mrf.mxu3 }
 0x8f1   :  { %v2905_v10 = vpack.i.bf16 %v1560_v38, %v1558_v52  ;;  %v1598_v47 = vpack.c.bf16 %v1560_v38, %v1560_v38 }
 0x8f3   :  { %v1613_v12 = vunpack.c.l.b16 %v1598_v47  ;;  %2906 = vrot.lane.b32.xlu0 %v2905_v10, %s3146_s19 }
 0x8f5   :  { %v3844_v13 = vpack.c.b16 %v1613_v12, %v1612_v11 }
 0x900   :  { %v1563_v15 = vpop.f32.mrf.mxu3 }
 0x901   :  { %1580 = vrot.lane.b32.xlu1 %v1563_v15, %s3146_s19  ;;  %v1599_v19 = vpack.c.bf16 %v1563_v15, %v1563_v15 }
 0x903   :  { %v1614_v39 = vunpack.c.l.b16 %v1599_v19 }
 0x905   :  { %v3855_v9 = vpack.c.b16 %v1614_v39, %v1614_v39 }
 0x908   :  { %v1565_v4 = vpop.f32.mrf.mxu3 }
 0x909   :  { %v1603_v18 = vpack.c.bf16 %v1565_v4, %v1565_v4 }
 0x90b   :  { %v1696_v2 = vunpack.c.l.b16 %v1603_v18 }
 0x922   :  { %v1568_v33 = vpop.f32.mrf.mxu3 }
 0x923   :  { %v2910_v34 = vpack.i.bf16 %v1568_v33, %v1565_v4  ;;  %v1604_v51 = vpack.c.bf16 %v1568_v33, %v1568_v33 }
 0x925   :  { %v1697_v27 = vunpack.c.l.b16 %v1604_v51  ;;  %2911 = vrot.lane.b32.xlu0 %v2910_v34, %s3146_s19 }
 0x927   :  { %v3848_v36 = vpack.c.b16 %v1697_v27, %v1696_v2 }
 0x92a   :  { %v1570_v40 = vpop.f32.mrf.mxu3 }
 0x92b   :  { %1592 = vrot.lane.b32.xlu2 %v1570_v40, %s3146_s19  ;;  %v1605_v23 = vpack.c.bf16 %v1570_v40, %v1570_v40 }
 0x92d   :  { %v1698_v44 = vunpack.c.l.b16 %v1605_v23 }
 0x92f   :  { %v3875_v59 = vpack.c.b16 %v1698_v44, %v1698_v44 }
 0x965   :  { %v2907_v21 = vpop.permute.xlu0 %2906 }
 0x966   :  { %v2909_v22 = vunpack.i.h.bf16 %v2907_v21  ;;  %v2908_v17 = vunpack.i.l.bf16 %v2907_v21 }
 0x968   :  { %v1601_v24 = vpack.c.bf16 %v2909_v22, %v2909_v22  ;;  %v1600_v56 = vpack.c.bf16 %v2908_v17, %v2908_v17 }
 0x96a   :  { %v1655_v16 = vunpack.c.l.b16 %v1601_v24  ;;  %v1654_v29 = vunpack.c.l.b16 %v1600_v56 }
 0x96c   :  { %v3851_v45 = vpack.c.b16 %v1655_v16, %v1654_v29 }
 0x96e   :  { %1659 = vrot.lane.b32.xlu2 %v3851_v45, %s3147_s1 }
 0x973   :  { %v1581_v6 = vpop.permute.xlu1 %1580 }
 0x974   :  { %v1602_v25 = vpack.c.bf16 %v1581_v6, %v1581_v6 }
 0x976   :  { %v1656_v42 = vunpack.c.l.b16 %v1602_v25  ;;  %1619 = vrot.lane.b32.xlu2 %v3855_v9, %s3147_s1 }
 0x978   :  { %v3859_v62 = vpack.c.b16 %v1656_v42, %v1656_v42 }
 0x97a   :  { %1661 = vrot.lane.b32.xlu1 %v3859_v62, %s3147_s1 }
 0x97e   :  { %1701 = vrot.lane.b32.xlu2 %v3848_v36, %s3147_s1 }
 0x985   :  { %v1593_v8 = vpop.permute.xlu2 %1592 }
 0x986   :  { %v1608_v49 = vpack.c.bf16 %v1593_v8, %v1593_v8 }
 0x988   :  { %v1740_v43 = vunpack.c.l.b16 %v1608_v49 }
 0x98a   :  { %v3865_v30 = vpack.c.b16 %v1740_v43, %v1740_v43 }
 0x98c   :  { %1745 = vrot.lane.b32.xlu0 %v3865_v30, %s3147_s1 }
 0x994   :  { %1617 = vrot.lane.b32.xlu0 %v3844_v13, %s3147_s1 }
 0x997   :  { %v2912_v14 = vpop.permute.xlu0 %2911 }
 0x998   :  { %v2914_v61 = vunpack.i.h.bf16 %v2912_v14  ;;  %v2913_v41 = vunpack.i.l.bf16 %v2912_v14 }
 0x99a   :  { %v1607_v60 = vpack.c.bf16 %v2914_v61, %v2914_v61  ;;  %v1606_v28 = vpack.c.bf16 %v2913_v41, %v2913_v41 }
 0x99c   :  { %v1739_v20 = vunpack.c.l.b16 %v1607_v60  ;;  %v1738_v54 = vunpack.c.l.b16 %v1606_v28 }
 0x99e   :  { %v3871_v57 = vpack.c.b16 %v1739_v20, %v1738_v54 }
 0x9a0   :  { %1743 = vrot.lane.b32.xlu1 %v3871_v57, %s3147_s1 }
 0x9a8   :  { %1703 = vrot.lane.b32.xlu1 %v3875_v59, %s3147_s1 }
 0x9c8   :  { %v1660_v63 = vpop.permute.xlu2 %1659 }
 0x9c9   :  { %v1670_v3 = vsel %vm422_vm6, %v1660_v63, 0 }
 0x9d0   :  { %v1620_v26 = vpop.permute.xlu2 %1619 }
 0x9d1   :  { %v1631_v32 = vsel %vm422_vm6, %v1620_v26, 0 }
 0x9d2   :  { %1639 = vmatpush.bf16.xpose.msrb.mxu1 %v1631_v32 }
 0x9d8   :  { %v1702_v12 = vpop.permute.xlu2 %1701 }
 0x9d9   :  { %v1712_v15 = vsel %vm422_vm6, %v1702_v12, 0 }
 0x9ec   :  { %v1662_v0 = vpop.permute.xlu1 %1661 }
 0x9ed   :  { %v1673_v1 = vsel %vm422_vm6, %v1662_v0, 0 }
 0x9ee   :  { %1681 = vmatpush.bf16.xpose.msrb.mxu0 %v1673_v1 }
 0x9f6   :  { %1682 = vmatpush.bf16.xpose.msrb.mxu0 %v1670_v3 }
 0x9fd   :  { %2758 = vmatmul.msk.bf16.vlgmr.msrb.gmra.mxu0 %vm422_vm6, %v3851_v45 }
 0x9fe   :  { %v1746_v35 = vpop.permute.xlu0 %1745 }
 0x9ff   :  { %v1757_v37 = vsel %vm422_vm6, %v1746_v35, 0 }
 0xa00   :  { %1765 = vmatpush.bf16.xpose.msrb.mxu3 %v1757_v37 }
 0xa06   :  { %v1618_v52 = vpop.permute.xlu0 %1617 }
 0xa07   :  { %v1628_v7 = vsel %vm422_vm6, %v1618_v52, 0 }
 0xa08   :  { %1640 = vmatpush.bf16.xpose.msrb.mxu1 %v1628_v7 }
 0xa0d   :  { %2759 = vmatmul.msk.bf16.gmra.mxu0 %vm422_vm6, %v3859_v62 }
 0xa0f   :  { %2756 = vmatmul.msk.bf16.vlgmr.msrb.gmra.mxu1 %vm422_vm6, %v3844_v13 }
 0xa12   :  { %v1744_v38 = vpop.permute.xlu1 %1743 }
 0xa13   :  { %v1754_v10 = vsel %vm422_vm6, %v1744_v38, 0 }
 0xa14   :  { %1766 = vmatpush.bf16.xpose.msrb.mxu3 %v1754_v10 }
 0xa1a   :  { %v1704_v47 = vpop.permute.xlu1 %1703 }
 0xa1b   :  { %v1715_v11 = vsel %vm422_vm6, %v1704_v47, 0  ;;  %2762 = vmatmul.msk.bf16.vlgmr.msrb.gmra.mxu3 %vm422_vm6, %v3871_v57 }
 0xa1c   :  { %1723 = vmatpush.bf16.xpose.msra.mxu2 %v1715_v11 }
 0xa1f   :  { %2757 = vmatmul.msk.bf16.gmra.mxu1 %vm422_vm6, %v3855_v9 }
 0xa24   :  { %1724 = vmatpush.bf16.xpose.msra.mxu2 %v1712_v15 }
 0xa2b   :  { %2760 = vmatmul.msk.bf16.vlgmr.msra.gmra.mxu2 %vm422_vm6, %v3848_v36  ;;  %2763 = vmatmul.msk.bf16.gmra.mxu3 %vm422_vm6, %v3865_v30 }
 0xa3b   :  { %2761 = vmatmul.msk.bf16.gmra.mxu2 %vm422_vm6, %v3875_v59 }
 0xa7a   :  { %v1684_v4 = vpop.f32.mrf.mxu0 }
 0xa7b   :  { %v1780_v14 = vmul.f32 0.25, %v1684_v4 }
 0xa7d   :  { %v1792_v20 = vadd.f32 %v1780_v14, %v3436_v58 }
 0xa7f   :  { %v1810_v44 = vsel %vm603_vm8, %v1792_v20, -inf }
 0xa82   :  { %v1686_v18 = vpop.f32.mrf.mxu0 }
 0xa83   :  { %v1781_v26 = vmul.f32 0.25, %v1686_v18 }
 0xa85   :  { %v1793_v1 = vadd.f32 %v1781_v26, %v3436_v58 }
 0xa87   :  { %v1813_v52 = vsel %vm603_vm8, %v1793_v1, -inf }
 0xa8a   :  { %v1689_v33 = vpop.f32.mrf.mxu0 }
 0xa8b   :  { %v1782_v37 = vmul.f32 0.25, %v1689_v33 }
 0xa8c   :  { %v1642_v34 = vpop.f32.mrf.mxu1 }
 0xa8d   :  { %v1777_v51 = vmul.f32 0.25, %v1642_v34  ;;  %v1794_v38 = vadd.f32 %v1782_v37, %v3436_v58 }
 0xa8f   :  { %v3904_v2 = vadd.f32 %v1777_v51, %v3436_v58  ;;  %v1816_v47 = vsel %vm603_vm8, %v1794_v38, -inf }
 0xa91   :  { %v1801_v27 = vsel %vm603_vm8, %v3904_v2, -inf }
 0xa92   :  { %1802 = vmax.xlane.f32.xlu2 %v1801_v27  ;;  %v1691_v40 = vpop.f32.mrf.mxu0 }
 0xa94   :  { %v1644_v21 = vpop.f32.mrf.mxu1 }
 0xa95   :  { %v1778_v22 = vmul.f32 0.25, %v1644_v21 }
 0xa97   :  { %v1790_v17 = vadd.f32 %v1778_v22, %v3436_v58 }
 0xa99   :  { %v1804_v24 = vsel %vm603_vm8, %v1790_v17, -inf }
 0xa9a   :  { %1805 = vmax.xlane.f32.xlu0 %v1804_v24 }
 0xa9c   :  { %v1647_v56 = vpop.f32.mrf.mxu1 }
 0xa9d   :  { %v1779_v23 = vmul.f32 0.25, %v1647_v56 }
 0xa9e   :  { %v1768_v16 = vpop.f32.mrf.mxu3 }
 0xa9f   :  { %v1786_v29 = vmul.f32 0.25, %v1768_v16  ;;  %v3931_v0 = vadd.f32 %v1779_v23, %v3436_v58 }
 0xaa1   :  { %v1798_v19 = vadd.f32 %v1786_v29, %v3436_v58  ;;  %v1807_v35 = vsel %vm603_vm8, %v3931_v0, -inf }
 0xaa3   :  { %v1828_v39 = vsel %vm603_vm8, %v1798_v19, -inf }
 0xaa4   :  { %1829 = vmax.xlane.f32.xlu2 %v1828_v39  ;;  %v1649_v6 = vpop.f32.mrf.mxu1 }
 0xaa6   :  { %v1770_v25 = vpop.f32.mrf.mxu3 }
 0xaa7   :  { %v1787_v3 = vmul.f32 0.25, %v1770_v25 }
 0xaae   :  { %v1726_v42 = vpop.f32.mrf.mxu2  ;;  %v3912_v8 = vpop.f32.mrf.mxu3 }
 0xaaf   :  { %v1783_v49 = vmul.f32 0.25, %v1726_v42 }
 0xab1   :  { %v3915_v43 = vadd.f32 %v1783_v49, %v3436_v58 }
 0xab3   :  { %v1819_v61 = vsel %vm603_vm8, %v3915_v43, -inf }
 0xab4   :  { %1820 = vmax.xlane.f32.xlu0 %v1819_v61 }
 0xab6   :  { %v1728_v41 = vpop.f32.mrf.mxu2  ;;  %v1775_v60 = vpop.f32.mrf.mxu3 }
 0xab7   :  { %v1784_v28 = vmul.f32 0.25, %v1728_v41 }
 0xab9   :  { %v3921_v54 = vadd.f32 %v1784_v28, %v3436_v58 }
 0xabb   :  { %v1822_v63 = vsel %vm603_vm8, %v3921_v54, -inf }
 0xabc   :  { %1995 = vrot.lane.b32.xlu2 %v3859_v62, %s3148_s20  ;;  %1811 = vmax.xlane.f32.xlu0 %v1810_v44  ;;  %v1799_v62 = vadd.f32 %v1787_v3, %v3436_v58 }
 0xabd   :  { %1823 = vmax.xlane.f32.xlu1 %v1822_v63 }
 0xabe   :  { %v3928_v32 = vpop.f32.mrf.mxu2  ;;  %v1831_v10 = vsel %vm603_vm8, %v1799_v62, -inf }
 0xac4   :  { %1808 = vmax.xlane.f32.xlu0 %v1807_v35 }
 0xac5   :  { %1814 = vmax.xlane.f32.xlu1 %v1813_v52 }
 0xac6   :  { %v1733_v7 = vpop.f32.mrf.mxu2 }
 0xacc   :  { %1832 = vmax.xlane.f32.xlu0 %v1831_v10 }
 0xacd   :  { %1817 = vmax.xlane.f32.xlu1 %v1816_v47 }
 0xae0   :  { %2075 = vrot.lane.b32.xlu0 %v3865_v30, %s3148_s20 }
 0xae6   :  { %1993 = vrot.lane.b32.xlu1 %v3851_v45, %s3148_s20 }
 0xb05   :  { %v3945_v15 = vpop.xlane.xlu2 %1802 }
 0xb0d   :  { %v1806_v11 = vpop.xlane.xlu0 %1805 }
 0xb0e   :  { %v1838_v12 = vsub.f32 %v1790_v17, %v1806_v11  ;;  %v1837_v11 = vsub.f32 %v3904_v2, %v3945_v15 }
 0xb10   :  { %v1851_v4 = vmul.f32 1.442695, %v1838_v12  ;;  %v1849_v12 = vmul.f32 1.442695, %v1837_v11 }
 0xb12   :  { %3045 = vpow2.f32 %v1851_v4 }
 0xb17   :  { %v1830_v18 = vpop.xlane.xlu2 %1829 }
 0xb18   :  { %v3947_v33 = vpop.eup %3045  ;;  %v1846_v34 = vsub.f32 %v1798_v19, %v1830_v18 }
 0xb19   :  { %v1876_v51 = vsel %vm603_vm8, %v3947_v33, 0.0 }
 0xb1a   :  { %v1867_v27 = vmul.f32 1.442695, %v1846_v34  ;;  %1877 = vadd.xlane.f32.xlu0 %v1876_v51 }
 0xb1c   :  { %3047 = vpow2.f32 %v1867_v27 }
 0xb1f   :  { %v1996_v30 = vpop.permute.xlu2 %1995 }
 0xb20   :  { %v2005_v40 = vsel %vm767_vm9, %v1996_v30, 0 }
 0xb21   :  { %2013 = vmatpush.bf16.msra.mxu0 %v2005_v40 }
 0xb22   :  { %v3952_v45 = vpop.eup %3047 }
 0xb23   :  { %v1900_v21 = vsel %vm603_vm8, %v3952_v45, 0.0 }
 0xb24   :  { %1901 = vadd.xlane.f32.xlu0 %v1900_v21 }
 0xb27   :  { %v1821_v22 = vpop.xlane.xlu0 %1820 }
 0xb28   :  { %v1843_v60 = vsub.f32 %v3915_v43, %v1821_v22 }
 0xb2a   :  { %v1861_v63 = vmul.f32 1.442695, %v1843_v60 }
 0xb2f   :  { %v1812_v17 = vpop.xlane.xlu0 %1811 }
 0xb30   :  { %v1840_v24 = vsub.f32 %v1792_v20, %v1812_v17  ;;  %v1824_v56 = vpop.xlane.xlu1 %1823 }
 0xb31   :  { %v1844_v4 = vsub.f32 %v3921_v54, %v1824_v56  ;;  %v1788_v56 = vmul.f32 0.25, %v3912_v8 }
 0xb32   :  { %v1855_v16 = vmul.f32 1.442695, %v1840_v24 }
 0xb33   :  { %v1863_v34 = vmul.f32 1.442695, %v1844_v4 }
 0xb34   :  { %3049 = vpow2.f32 %v1855_v16 }
 0xb37   :  { %v1809_v29 = vpop.xlane.xlu0 %1808 }
 0xb38   :  { %v1815_v19 = vpop.xlane.xlu1 %1814 }
 0xb39   :  { %v1841_v39 = vsub.f32 %v1793_v1, %v1815_v19  ;;  %v1839_v1 = vsub.f32 %v3931_v0, %v1809_v29 }
 0xb3a   :  { %v3956_v6 = vpop.eup %3049 }
 0xb3b   :  { %v1857_v25 = vmul.f32 1.442695, %v1841_v39  ;;  %v1882_v42 = vsel %vm603_vm8, %v3956_v6, 0.0  ;;  %v1853_v37 = vmul.f32 1.442695, %v1839_v1  ;;  %v4005_v39 = vadd.f32 %v1788_v56, %v3436_v58 }
 0xb3c   :  { %1883 = vadd.xlane.f32.xlu1 %v1882_v42 }
 0xb3d   :  { %3051 = vpow2.f32 %v1857_v25 }
 0xb3f   :  { %v1833_v49 = vpop.xlane.xlu0 %1832 }
 0xb40   :  { %v1847_v14 = vsub.f32 %v1799_v62, %v1833_v49  ;;  %v1818_v61 = vpop.xlane.xlu1 %1817 }
 0xb41   :  { %v1842_v41 = vsub.f32 %v1794_v38, %v1818_v61 }
 0xb42   :  { %v1869_v28 = vmul.f32 1.442695, %v1847_v14 }
 0xb43   :  { %v3052_v20 = vpop.eup %3051  ;;  %v1859_v23 = vmul.f32 1.442695, %v1842_v41 }
 0xb44   :  { %3053 = vpow2.f32 %v1869_v28  ;;  %v1885_v44 = vsel %vm603_vm8, %v3052_v20, 0.0 }
 0xb45   :  { %3055 = vpow2.f32 %v1859_v23  ;;  %1886 = vadd.xlane.f32.xlu2 %v1885_v44 }
 0xb46   :  { %3057 = vpow2.f32 %v1861_v63 }
 0xb47   :  { %3059 = vpow2.f32 %v1853_v37 }
 0xb48   :  { %3061 = vpow2.f32 %v1849_v12 }
 0xb49   :  { %3063 = vpow2.f32 %v1863_v34 }
 0xb4a   :  { %v3962_v26 = vpop.eup %3053 }
 0xb4b   :  { %v3965_v3 = vpop.eup %3055  ;;  %v1903_v35 = vsel %vm603_vm8, %v3962_v26, 0.0 }
 0xb4c   :  { %1904 = vadd.xlane.f32.xlu0 %v1903_v35  ;;  %v1888_v43 = vsel %vm603_vm8, %v3965_v3, 0.0  ;;  %v3971_v52 = vpop.eup %3057 }
 0xb4d   :  { %1889 = vadd.xlane.f32.xlu2 %v1888_v43  ;;  %v1891_v0 = vsel %vm603_vm8, %v3971_v52, 0.0  ;;  %v3978_v38 = vpop.eup %3059 }
 0xb4e   :  { %v1879_v47 = vsel %vm603_vm8, %v3978_v38, 0.0 }
 0xb52   :  { %v2076_v7 = vpop.permute.xlu0 %2075 }
 0xb53   :  { %v2085_v62 = vsel %vm767_vm9, %v2076_v7, 0 }
 0xb54   :  { %1892 = vadd.xlane.f32.xlu0 %v1891_v0  ;;  %2093 = vmatpush.bf16.msra.mxu3 %v2085_v62 }
 0xb55   :  { %2073 = vrot.lane.b32.xlu1 %v3871_v57, %s3148_s20  ;;  %v3988_v57 = vpop.eup %3061 }
 0xb56   :  { %v1873_v18 = vsel %vm603_vm8, %v3988_v57, 0.0  ;;  %v3993_v51 = vpop.eup %3063 }
 0xb58   :  { %v1994_v10 = vpop.permute.xlu1 %1993 }
 0xb59   :  { %2014 = vmatpush.bf16.msra.mxu0 %v1994_v10 }
 0xb5c   :  { %1880 = vadd.xlane.f32.xlu0 %v1879_v47 }
 0xb65   :  { %1955 = vrot.lane.b32.xlu2 %v3855_v9, %s3148_s20  ;;  %v1894_v9 = vsel %vm603_vm8, %v3993_v51, 0.0 }
 0xb70   :  { %2033 = vrot.lane.b32.xlu0 %v3848_v36, %s3148_s20 }
 0xb7f   :  { %1874 = vadd.xlane.f32.xlu1 %v1873_v18 }
 0xb8d   :  { %v1878_v36 = vpop.xlane.xlu0 %1877 }
 0xb8e   :  { %1895 = vadd.xlane.f32.xlu2 %v1894_v9 }
 0xb97   :  { %v1902_v54 = vpop.xlane.xlu0 %1901 }
 0xb98   :  { %1953 = vrot.lane.b32.xlu1 %v3844_v13, %s3148_s20 }
 0xba0   :  { %2035 = vrot.lane.b32.xlu1 %v3875_v59, %s3148_s20 }
 0xbaf   :  { %v1884_v2 = vpop.xlane.xlu1 %1883 }
 0xbb0   :  { %3065 = vrcp.f32 %v1884_v2 }
 0xbb6   :  { %v3066_v27 = vpop.eup %3065 }
 0xbb7   :  { %v1924_v30 = vmul.f32 %v3066_v27, %v3956_v6 }
 0xbb8   :  { %v1887_v15 = vpop.xlane.xlu2 %1886 }
 0xbb9   :  { %3067 = vrcp.f32 %v1887_v15  ;;  %v1936_v17 = vpack.c.bf16 %v1924_v30, %v1924_v30 }
 0xbba   :  { %3069 = vrcp.f32 %v1902_v54 }
 0xbbb   :  { %v1988_v29 = vunpack.c.l.b16 %v1936_v17 }
 0xbbf   :  { %v3068_v40 = vpop.eup %3067  ;;  %v1905_v21 = vpop.xlane.xlu0 %1904 }
 0xbc0   :  { %v3070_v22 = vpop.eup %3069  ;;  %v1925_v24 = vmul.f32 %v3068_v40, %v3052_v20  ;;  %3071 = vrcp.f32 %v1905_v21  ;;  %v1890_v13 = vpop.xlane.xlu2 %1889 }
 0xbc1   :  { %3073 = vrcp.f32 %v1890_v13  ;;  %v1930_v16 = vmul.f32 %v3070_v22, %v3952_v45  ;;  %v1834_v45 = vsel %vm603_vm8, %v4005_v39, -inf }
 0xbc2   :  { %v1937_v59 = vpack.c.bf16 %v1925_v24, %v1925_v24 }
 0xbc3   :  { %v1942_v49 = vpack.c.bf16 %v1930_v16, %v1930_v16 }
 0xbc4   :  { %v1989_v19 = vunpack.c.l.b16 %v1937_v59 }
 0xbc5   :  { %v2068_v20 = vunpack.c.l.b16 %v1942_v49 }
 0xbc6   :  { %v3072_v25 = vpop.eup %3071  ;;  %v1991_v6 = vpack.c.b16 %v1989_v19, %v1988_v29 }
 0xbc7   :  { %v3074_v42 = vpop.eup %3073  ;;  %v1931_v14 = vmul.f32 %v3072_v25, %v3962_v26  ;;  %v2074_v61 = vpop.permute.xlu1 %2073 }
 0xbc8   :  { %v1956_v41 = vpop.permute.xlu2 %1955  ;;  %2766 = vmatmul.msk.bf16.vlgmr.msra.gmra.mxu0 %vm603_vm8, %v1991_v6  ;;  %2094 = vmatpush.bf16.msra.mxu3 %v2074_v61  ;;  %v1926_v28 = vmul.f32 %v3074_v42, %v3965_v3  ;;  %v1893_v43 = vpop.xlane.xlu0 %1892 }
 0xbc9   :  { %v1943_v8 = vpack.c.bf16 %v1931_v14, %v1931_v14  ;;  %v1965_v60 = vsel %vm767_vm9, %v1956_v41, 0  ;;  %v1785_v41 = vmul.f32 0.25, %v3928_v32 }
 0xbca   :  { %1973 = vmatpush.bf16.msra.mxu1 %v1965_v60  ;;  %1835 = vmax.xlane.f32.xlu1 %v1834_v45  ;;  %v1938_v63 = vpack.c.bf16 %v1926_v28, %v1926_v28 }
 0xbcb   :  { %v2069_v23 = vunpack.c.l.b16 %v1943_v8 }
 0xbcc   :  { %v1990_v26 = vunpack.c.l.b16 %v1938_v63 }
 0xbcd   :  { %v2071_v44 = vpack.c.b16 %v2069_v23, %v2068_v20  ;;  %v2862_v20 = vld [vmem:[%s4221_s6 + $0x18] sm:$0xff] }
 0xbce   :  { %v1992_v1 = vpack.c.b16 %v1990_v26, %v1990_v26 }
 0xbcf   :  { %2770 = vmatmul.msk.bf16.vlgmr.msra.gmra.mxu3 %vm603_vm8, %v2071_v44  ;;  %v2861_v44 = vld [vmem:[%s4221_s6 + $0x10] sm:$0xff] }
 0xbd0   :  { %v1881_v10 = vpop.xlane.xlu0 %1880 }
 0xbd8   :  { %2767 = vmatmul.msk.bf16.gmra.mxu0 %vm603_vm8, %v1992_v1 }
 0xbe2   :  { %v2034_v24 = vpop.permute.xlu0 %2033 }
 0xbf2   :  { %v1875_v35 = vpop.xlane.xlu1 %1874 }
 0xbf3   :  { %3075 = vrcp.f32 %v1875_v35 }
 0xbf4   :  { %3077 = vrcp.f32 %v1878_v36 }
 0xbf9   :  { %v3076_v37 = vpop.eup %3075 }
 0xbfa   :  { %v3078_v7 = vpop.eup %3077  ;;  %v1921_v62 = vmul.f32 %v3076_v37, %v3988_v57 }
 0xbfb   :  { %v1922_v3 = vmul.f32 %v3078_v7, %v3947_v33 }
 0xbfc   :  { %v1933_v47 = vpack.c.bf16 %v1921_v62, %v1921_v62 }
 0xbfd   :  { %v1934_v11 = vpack.c.bf16 %v1922_v3, %v1922_v3 }
 0xbfe   :  { %v1948_v12 = vunpack.c.l.b16 %v1933_v47 }
 0xbff   :  { %v1949_v18 = vunpack.c.l.b16 %v1934_v11 }
 0xc01   :  { %v1896_v0 = vpop.xlane.xlu2 %1895  ;;  %v1951_v36 = vpack.c.b16 %v1949_v18, %v1948_v12 }
 0xc02   :  { %3079 = vrcp.f32 %v1896_v0 }
 0xc03   :  { %3081 = vrcp.f32 %v1893_v43 }
 0xc04   :  { %3083 = vrcp.f32 %v1881_v10 }
 0xc08   :  { %v3080_v4 = vpop.eup %3079 }
 0xc09   :  { %v3082_v9 = vpop.eup %3081  ;;  %v1928_v54 = vmul.f32 %v3080_v4, %v3993_v51 }
 0xc0a   :  { %v1954_v34 = vpop.permute.xlu1 %1953  ;;  %v3084_v2 = vpop.eup %3083  ;;  %v1927_v33 = vmul.f32 %v3082_v9, %v3971_v52 }
 0xc0b   :  { %1974 = vmatpush.bf16.msra.mxu1 %v1954_v34  ;;  %v1923_v57 = vmul.f32 %v3084_v2, %v3978_v38  ;;  %v1940_v15 = vpack.c.bf16 %v1928_v54, %v1928_v54 }
 0xc0c   :  { %v1939_v30 = vpack.c.bf16 %v1927_v33, %v1927_v33 }
 0xc0d   :  { %v1935_v21 = vpack.c.bf16 %v1923_v57, %v1923_v57  ;;  %v2029_v22 = vunpack.c.l.b16 %v1940_v15  ;;  %v4048_v57 = vld [vmem:[%s4222_s7 + $0x1] ss:$0 sm:$0xff] }
 0xc0e   :  { %2764 = vmatmul.msk.bf16.vlgmr.msra.gmra.mxu1 %vm603_vm8, %v1951_v36  ;;  %v2028_v17 = vunpack.c.l.b16 %v1939_v30 }
 0xc0f   :  { %v1950_v13 = vunpack.c.l.b16 %v1935_v21  ;;  %2175 = vmatpush.bf16.msrb.mxu1 %v2862_v20 }
 0xc10   :  { %v2031_v56 = vpack.c.b16 %v2029_v22, %v2028_v17 }
 0xc11   :  { %v1952_v51 = vpack.c.b16 %v1950_v13, %v1950_v13 }
 0xc12   :  { %v2036_v27 = vpop.permute.xlu1 %2035 }
 0xc13   :  { %v2045_v40 = vsel %vm767_vm9, %v2036_v27, 0  ;;  %2176 = vmatpush.bf16.msrb.mxu1 %v2861_v44 }
 0xc14   :  { %2053 = vmatpush.bf16.msrb.mxu2 %v2045_v40 }
 0xc18   :  { %2054 = vmatpush.bf16.msrb.mxu2 %v2034_v24 }
 0xc1b   :  { %2768 = vmatmul.msk.bf16.vlgmr.msrb.gmra.mxu2 %vm603_vm8, %v2031_v56 }
 0xc1e   :  { %2765 = vmatmul.msk.bf16.gmra.mxu1 %vm603_vm8, %v1952_v51 }
 0xc3d   :  { %v1836_v52 = vpop.xlane.xlu1 %1835 }
 0xc3e   :  { %v1848_v38 = vsub.f32 %v4005_v39, %v1836_v52  ;;  %v1797_v39 = vadd.f32 %v1785_v41, %v3436_v58 }
 0xc40   :  { %v1871_v59 = vmul.f32 1.442695, %v1848_v38  ;;  %v1825_v8 = vsel %vm603_vm8, %v1797_v39, -inf }
 0xc42   :  { %3085 = vpow2.f32 %v1871_v59 }
 0xc45   :  { %v2016_v16 = vpop.f32.mrf.mxu0 }
 0xc48   :  { %v3086_v29 = vpop.eup %3085 }
 0xc49   :  { %v1906_v19 = vsel %vm603_vm8, %v3086_v29, 0.0 }
 0xc4a   :  { %1907 = vadd.xlane.f32.xlu1 %v1906_v19 }
 0xc4d   :  { %v2018_v25 = vpop.f32.mrf.mxu0 }
 0xc4e   :  { %v2915_v6 = vpack.i.bf16 %v2018_v25, %v2016_v16 }
 0xc50   :  { %2916 = vrot.lane.b32.xlu0 %v2915_v6, %s3150_s21 }
 0xc52   :  { %v2096_v42 = vpop.f32.mrf.mxu3 }
 0xc55   :  { %v2021_v49 = vpop.f32.mrf.mxu0 }
 0xc56   :  { %v2920_v14 = vpack.i.bf16 %v2096_v42, %v2021_v49 }
 0xc58   :  { %2921 = vrot.lane.b32.xlu2 %v2920_v14, %s3150_s21 }
 0xc5a   :  { %v2098_v30 = vpop.f32.mrf.mxu3 }
 0xc5d   :  { %v2023_v61 = vpop.f32.mrf.mxu0 }
 0xc7a   :  { %1826 = vmax.xlane.f32.xlu0 %v1825_v8 }
 0xc8b   :  { %v1976_v60 = vpop.f32.mrf.mxu1 }
 0xc93   :  { %v1978_v45 = vpop.f32.mrf.mxu1 }
 0xc9b   :  { %v1981_v28 = vpop.f32.mrf.mxu1 }
 0xc9e   :  { %v2056_v12 = vpop.f32.mrf.mxu2 }
 0xca3   :  { %v1983_v23 = vpop.f32.mrf.mxu1 }
 0xcb2   :  { %v2922_v10 = vpop.permute.xlu2 %2921 }
 0xcb3   :  { %v2924_v47 = vunpack.i.h.bf16 %v2922_v10  ;;  %v2923_v11 = vunpack.i.l.bf16 %v2922_v10 }
 0xcb5   :  { %v2119_v4 = vsel %vm422_vm6, %v1981_v28, %v2923_v11  ;;  %v2132_v18 = vsel %vm422_vm6, %v2056_v12, %v2924_v47 }
 0xcb6   :  { %v2136_v34 = vpack.c.bf16 %v2132_v18, %v2119_v4 }
 0xcbd   :  { %v1908_v32 = vpop.xlane.xlu1 %1907 }
 0xcbe   :  { %3087 = vrcp.f32 %v1908_v32 }
 0xcc2   :  { %v2917_v58 = vpop.permute.xlu0 %2916 }
 0xcc3   :  { %v2919_v63 = vunpack.i.h.bf16 %v2917_v58  ;;  %v2918_v26 = vunpack.i.l.bf16 %v2917_v58 }
 0xcc4   :  { %v3088_v1 = vpop.eup %3087 }
 0xcc5   :  { %v1932_v35 = vmul.f32 %v3088_v1, %v3086_v29  ;;  %v2117_v43 = vsel %vm422_vm6, %v1976_v60, %v2918_v26  ;;  %v2118_v37 = vsel %vm422_vm6, %v1978_v45, %v2919_v63 }
 0xcc6   :  { %v2135_v7 = vpack.c.bf16 %v2118_v37, %v2117_v43  ;;  %v2864_v43 = vld [vmem:[%s4225_s10 + $0x18] sm:$0xff]  ;;  %v2863_v37 = vld [vmem:[%s4225_s10 + $0x10] sm:$0xff] }
 0xcc7   :  { %v1944_v62 = vpack.c.bf16 %v1932_v35, %v1932_v35  ;;  %2405 = vmatpush.bf16.msrb.mxu0 %v2864_v43 }
 0xcc8   :  { %2785 = vmatmul.msk.bf16.vlgmr.msrb.gmra.mxu1 %vm152_vm1, %v2135_v7 }
 0xcc9   :  { %v2070_v0 = vunpack.c.l.b16 %v1944_v62 }
 0xccb   :  { %v2072_v3 = vpack.c.b16 %v2070_v0, %v2070_v0  ;;  %2406 = vmatpush.bf16.msrb.mxu0 %v2863_v37 }
 0xccd   :  { %2771 = vmatmul.msk.bf16.gmra.mxu3 %vm603_vm8, %v2072_v3 }
 0xcd8   :  { %2786 = vmatmul.msk.bf16.gmra.mxu1 %vm152_vm1, %v2136_v34 }
 0xced   :  { %v1827_v9 = vpop.xlane.xlu0 %1826 }
 0xcee   :  { %v1845_v36 = vsub.f32 %v1797_v39, %v1827_v9 }
 0xcf0   :  { %v1865_v2 = vmul.f32 1.442695, %v1845_v36 }
 0xcf2   :  { %3089 = vpow2.f32 %v1865_v2 }
 0xcf8   :  { %v3090_v54 = vpop.eup %3089 }
 0xcf9   :  { %v1897_v33 = vsel %vm603_vm8, %v3090_v54, 0.0 }
 0xcfa   :  { %1898 = vadd.xlane.f32.xlu2 %v1897_v33 }
 0xd45   :  { %v2178_v15 = vpop.f32.mrf.mxu1 }
 0xd46   :  { %v2179_v27 = vadd.f32 %v4048_v57, %v2178_v15 }
 0xd48   :  { %v4052_v40 = vadd.f32 %v2179_v27, %v3747_v31 }
 0xd4a   :  { %v2203_v21 = vsel %vm152_vm1, %v4052_v40, 0.0  ;;  %v2227_v22 = vmul.f32 %v4052_v40, %v4052_v40 }
 0xd4b   :  { %2204 = vadd.xlane.f32.xlu1 %v2203_v21 }
 0xd4c   :  { %v2233_v17 = vsel %vm152_vm1, %v2227_v22, 0.0 }
 0xd4d   :  { %v2180_v24 = vpop.f32.mrf.mxu1  ;;  %2234 = vadd.xlane.f32.xlu0 %v2233_v17 }
 0xd4e   :  { %v2181_v13 = vadd.f32 %v4048_v57, %v2180_v24 }
 0xd50   :  { %v4061_v56 = vadd.f32 %v2181_v13, %v3755_v53  ;;  %v2101_v51 = vpop.f32.mrf.mxu3 }
 0xd51   :  { %v2925_v52 = vpack.i.bf16 %v2101_v51, %v2098_v30 }
 0xd52   :  { %v2206_v31 = vsel %vm152_vm1, %v4061_v56, 0.0  ;;  %v2228_v16 = vmul.f32 %v4061_v56, %v4061_v56 }
 0xd53   :  { %2207 = vadd.xlane.f32.xlu1 %v2206_v31  ;;  %2926 = vrot.lane.b32.xlu2 %v2925_v52, %s3150_s21 }
 0xd54   :  { %v2236_v53 = vsel %vm152_vm1, %v2228_v16, 0.0 }
 0xd55   :  { %v2183_v38 = vpop.f32.mrf.mxu1 }
 0xd56   :  { %v2184_v59 = vadd.f32 %v4048_v57, %v2183_v38 }
 0xd58   :  { %v4070_v29 = vadd.f32 %v2184_v59, %v3763_v46  ;;  %v2103_v19 = vpop.f32.mrf.mxu3 }
 0xd5a   :  { %v2209_v25 = vsel %vm152_vm1, %v4070_v29, 0.0  ;;  %v2229_v49 = vmul.f32 %v4070_v29, %v4070_v29 }
 0xd5b   :  { %2237 = vadd.xlane.f32.xlu1 %v2236_v53  ;;  %2210 = vadd.xlane.f32.xlu0 %v2209_v25 }
 0xd5c   :  { %v2239_v61 = vsel %vm152_vm1, %v2229_v49, 0.0 }
 0xd5d   :  { %v2185_v6 = vpop.f32.mrf.mxu1 }
 0xd5e   :  { %v2186_v42 = vadd.f32 %v4048_v57, %v2185_v6  ;;  %v4110_v6 = vld [vmem:[%s4223_s8 + $0x1] ss:$0 sm:$0xff] }
 0xd60   :  { %v4079_v14 = vadd.f32 %v2186_v42, %v3771_v5 }
 0xd62   :  { %v2212_v46 = vsel %vm152_vm1, %v4079_v14, 0.0  ;;  %v2230_v41 = vmul.f32 %v4079_v14, %v4079_v14 }
 0xd63   :  { %2213 = vadd.xlane.f32.xlu1 %v2212_v46  ;;  %2240 = vadd.xlane.f32.xlu0 %v2239_v61 }
 0xd64   :  { %v2242_v39 = vsel %vm152_vm1, %v2230_v41, 0.0 }
 0xd6b   :  { %2243 = vadd.xlane.f32.xlu1 %v2242_v39 }
 0xd6d   :  { %v1899_v8 = vpop.xlane.xlu2 %1898 }
 0xd6e   :  { %3091 = vrcp.f32 %v1899_v8 }
 0xd74   :  { %v3092_v60 = vpop.eup %3091 }
 0xd75   :  { %v1929_v45 = vmul.f32 %v3092_v60, %v3090_v54  ;;  %v4116_v60 = vld [vmem:[%s4224_s9 + $0x1] ss:$0 sm:$0xff] }
 0xd77   :  { %v1941_v28 = vpack.c.bf16 %v1929_v45, %v1929_v45 }
 0xd79   :  { %v2030_v5 = vunpack.c.l.b16 %v1941_v28 }
 0xd7b   :  { %v2032_v20 = vpack.c.b16 %v2030_v5, %v2030_v5 }
 0xd7d   :  { %2769 = vmatmul.msk.bf16.gmra.mxu2 %vm603_vm8, %v2032_v20 }
 0xdbe   :  { %v2205_v23 = vpop.xlane.xlu1 %2204 }
 0xdbf   :  { %v2221_v44 = vmul.f32 %v2205_v23, %v3325_v48 }
 0xdc0   :  { %v2235_v32 = vpop.xlane.xlu0 %2234 }
 0xdc1   :  { %v2257_v58 = vmul.f32 %v2221_v44, %v2221_v44  ;;  %v2251_v63 = vmul.f32 %v2235_v32, %v3325_v48  ;;  %v2269_v16 = vsub.f32 %v4052_v40, %v2221_v44 }
 0xdc3   :  { %v2263_v26 = vsub.f32 %v2251_v63, %v2257_v58 }
 0xdc5   :  { %v2275_v1 = vadd.f32 1e-05, %v2263_v26 }
 0xdc6   :  { %v2208_v35 = vpop.xlane.xlu1 %2207 }
 0xdc7   :  { %3093 = vrsqrt.f32 %v2275_v1  ;;  %v2222_v7 = vmul.f32 %v2208_v35, %v3325_v48  ;;  %vm2287_vm9 = vweird.f32 %v2275_v1 }
 0xdc9   :  { %v2258_v47 = vmul.f32 %v2222_v7, %v2222_v7  ;;  %v2270_v41 = vsub.f32 %v4061_v56, %v2222_v7 }
 0xdcd   :  { %v3094_v62 = vpop.eup %3093 }
 0xdce   :  { %v2282_v0 = vmul.f32 %v3094_v62, %v2275_v1  ;;  %v2238_v3 = vpop.xlane.xlu1 %2237  ;;  %v2211_v10 = vpop.xlane.xlu0 %2210  ;;  %vm2288_vm8 = vweird.f32 %v3094_v62 }
 0xdcf   :  { %v2252_v11 = vmul.f32 %v2238_v3, %v3325_v48  ;;  %v4099_v34 = vmul.f32 %v2211_v10, %v3325_v48  ;;  %vm2289_vm12 = vmor %vm2287_vm9, %vm2288_vm8 }
 0xdd0   :  { %v2283_v12 = vmul.f32 %v3094_v62, %v2282_v0 }
 0xdd1   :  { %v2264_v4 = vsub.f32 %v2252_v11, %v2258_v47  ;;  %v2259_v54 = vmul.f32 %v4099_v34, %v4099_v34  ;;  %v2271_v37 = vsub.f32 %v4070_v29, %v4099_v34 }
 0xdd2   :  { %v2284_v9 = vmul.f32 0.5, %v2283_v12  ;;  %v2058_v12 = vpop.f32.mrf.mxu2 }
 0xdd3   :  { %v2276_v18 = vadd.f32 1e-05, %v2264_v4 }
 0xdd4   :  { %v2285_v15 = vsub.f32 1.5, %v2284_v9 }
 0xdd5   :  { %3095 = vrsqrt.f32 %v2276_v18  ;;  %vm2297_vm14 = vweird.f32 %v2276_v18 }
 0xdd6   :  { %v2214_v36 = vpop.xlane.xlu1 %2213  ;;  %v2241_v2 = vpop.xlane.xlu0 %2240  ;;  %v2286_v17 = vmul.f32 %v3094_v62, %v2285_v15 }
 0xdd7   :  { %v2253_v33 = vmul.f32 %v2241_v2, %v3325_v48  ;;  %v2224_v21 = vmul.f32 %v2214_v36, %v3325_v48 }
 0xdd8   :  { %v2290_v38 = vsel %vm2289_vm12, %v3094_v62, %v2286_v17  ;;  %v2866_v17 = vld [vmem:[%s4227_s12 + $0x28] sm:$0xff] }
 0xdd9   :  { %v2265_v27 = vsub.f32 %v2253_v33, %v2259_v54  ;;  %v2260_v52 = vmul.f32 %v2224_v21, %v2224_v21  ;;  %v2341_v42 = vmul.f32 %v2290_v38, %v2269_v16  ;;  %v2272_v3 = vsub.f32 %v4079_v14, %v2224_v21  ;;  %v2868_v21 = vld [vmem:[%s4227_s12 + $0x38] sm:$0xff] }
 0xdda   :  { %2531 = vmatpush.bf16.msra.mxu2 %v2868_v21 }
 0xddb   :  { %v3096_v30 = vpop.eup %3095  ;;  %v2277_v22 = vadd.f32 1e-05, %v2265_v27  ;;  %v2350_v45 = vmul.f32 %v4110_v6, %v2341_v42 }
 0xddc   :  { %v2292_v24 = vmul.f32 %v3096_v30, %v2276_v18  ;;  %vm2298_vm13 = vweird.f32 %v3096_v30  ;;  %v2927_v18 = vpop.permute.xlu2 %2926 }
 0xddd   :  { %3097 = vrsqrt.f32 %v2277_v22  ;;  %vm2299_vm15 = vmor %vm2297_vm14, %vm2298_vm13  ;;  %v2359_v32 = vadd.f32 %v4116_v60, %v2350_v45  ;;  %vm2307_vm3 = vweird.f32 %v2277_v22  ;;  %v2928_v34 = vunpack.i.l.bf16 %v2927_v18 }
 0xdde   :  { %v2293_v13 = vmul.f32 %v3096_v30, %v2292_v24  ;;  %v2244_v51 = vpop.xlane.xlu1 %2243  ;;  %v2929_v2 = vunpack.i.h.bf16 %v2927_v18  ;;  %v4146_v24 = vld [vmem:[%s4226_s11 + $0x1] ss:$0 sm:$0xff]  ;;  %vm2552_vm14 = vcmask 1040384  }
 0xddf   :  { %v2254_v31 = vmul.f32 %v2244_v51, %v3325_v48  ;;  %v2133_v33 = vsel %vm422_vm6, %v2058_v12, %v2928_v34 }
 0xde0   :  { %v2294_v59 = vmul.f32 0.5, %v2293_v13  ;;  %v2865_v13 = vld [vmem:[%s4227_s12 + $0x20] sm:$0xff] }
 0xde1   :  { %v2266_v19 = vsub.f32 %v2254_v31, %v2260_v52 }
 0xde2   :  { %v2295_v53 = vsub.f32 1.5, %v2294_v59 }
 0xde3   :  { %v3098_v25 = vpop.eup %3097  ;;  %v2278_v49 = vadd.f32 1e-05, %v2266_v19 }
 0xde4   :  { %v2296_v46 = vmul.f32 %v3096_v30, %v2295_v53  ;;  %v2302_v61 = vmul.f32 %v3098_v25, %v2277_v22  ;;  %vm2308_vm2 = vweird.f32 %v3098_v25  ;;  %v2867_v22 = vld [vmem:[%s4227_s12 + $0x30] sm:$0xff] }
 0xde5   :  { %3099 = vrsqrt.f32 %v2278_v49  ;;  %vm2309_vm4 = vmor %vm2307_vm3, %vm2308_vm2  ;;  %vm2317_vm7 = vweird.f32 %v2278_v49  ;;  %2532 = vmatpush.bf16.msra.mxu2 %v2867_v22 }
 0xde6   :  { %v2300_v39 = vsel %vm2299_vm15, %v3096_v30, %v2296_v46  ;;  %v2303_v8 = vmul.f32 %v3098_v25, %v2302_v61  ;;  %vm2556_vm15 = vcmask 254976  }
 0xde7   :  { %v2342_v28 = vmul.f32 %v2300_v39, %v2270_v41 }
 0xde8   :  { %v2304_v5 = vmul.f32 0.5, %v2303_v8 }
 0xde9   :  { %v2351_v20 = vmul.f32 %v4110_v6, %v2342_v28  ;;  %2533 = vmatpush.bf16.msra.mxu2 %v2866_v17 }
 0xdea   :  { %v2305_v23 = vsub.f32 1.5, %v2304_v5 }
 0xdeb   :  { %v3100_v44 = vpop.eup %3099  ;;  %v2360_v56 = vadd.f32 %v4116_v60, %v2351_v20 }
 0xdec   :  { %v2306_v58 = vmul.f32 %v3098_v25, %v2305_v23  ;;  %v2312_v63 = vmul.f32 %v3100_v44, %v2278_v49  ;;  %vm2318_vm5 = vweird.f32 %v3100_v44 }
 0xded   :  { %v2365_v26 = vpack.c.bf16 %v2360_v56, %v2359_v32  ;;  %vm2319_vm10 = vmor %vm2317_vm7, %vm2318_vm5  ;;  %2534 = vmatpush.bf16.msra.mxu2 %v2865_v13  ;;  %vm2626_vm5 = vcmask 74752  }
 0xdee   :  { %v2313_v1 = vmul.f32 %v3100_v44, %v2312_v63  ;;  %v2310_v35 = vsel %vm2309_vm4, %v3098_v25, %v2306_v58 }
 0xdef   :  { %2803 = vmatmul.msk.bf16.vlgmr.msrb.gmra.mxu0 %vm152_vm1, %v2365_v26  ;;  %v2343_v62 = vmul.f32 %v2310_v35, %v2271_v37 }
 0xdf0   :  { %v2314_v43 = vmul.f32 0.5, %v2313_v1 }
 0xdf1   :  { %v2352_v11 = vmul.f32 %v4110_v6, %v2343_v62 }
 0xdf2   :  { %v2315_v7 = vsub.f32 1.5, %v2314_v43 }
 0xdf3   :  { %v2361_v9 = vadd.f32 %v4116_v60, %v2352_v11 }
 0xdf4   :  { %v2316_v0 = vmul.f32 %v3100_v44, %v2315_v7 }
 0xdf6   :  { %v2320_v10 = vsel %vm2319_vm10, %v3100_v44, %v2316_v0 }
 0xdf7   :  { %v2344_v47 = vmul.f32 %v2320_v10, %v2272_v3 }
 0xdf9   :  { %v2353_v4 = vmul.f32 %v4110_v6, %v2344_v47 }
 0xdfb   :  { %v2362_v29 = vadd.f32 %v4116_v60, %v2353_v4 }
 0xdfd   :  { %v2366_v36 = vpack.c.bf16 %v2362_v29, %v2361_v9 }
 0xdff   :  { %2804 = vmatmul.msk.bf16.gmra.mxu0 %vm152_vm1, %v2366_v36 }
 0xe00   :  { %v2061_v54 = vpop.f32.mrf.mxu2 }
 0xe01   :  { %v2134_v15 = vsel %vm422_vm6, %v2061_v54, %v2929_v2 }
 0xe02   :  { %v2137_v27 = vpack.c.bf16 %v2134_v15, %v2133_v33 }
 0xe04   :  { %2787 = vmatmul.msk.bf16.gmra.mxu1 %vm152_vm1, %v2137_v27 }
 0xe08   :  { %v2063_v30 = vpop.f32.mrf.mxu2 }
 0xe6c   :  { %v2408_v51 = vpop.f32.mrf.mxu0 }
 0xe6d   :  { %v2409_v52 = vadd.f32 %v4146_v24, %v2408_v51 }
 0xe6f   :  { %v2423_v31 = vmul.f32 %v2409_v52, %v2409_v52 }
 0xe71   :  { %v2429_v38 = vmul.f32 %v2423_v31, %v2409_v52 }
 0xe73   :  { %v2435_v59 = vmul.f32 0.044715, %v2429_v38 }
 0xe74   :  { %v2410_v16 = vpop.f32.mrf.mxu0 }
 0xe75   :  { %v2441_v19 = vadd.f32 %v2435_v59, %v2409_v52  ;;  %v2411_v53 = vadd.f32 %v4146_v24, %v2410_v16 }
 0xe77   :  { %v2447_v25 = vmul.f32 0.7978846, %v2441_v19  ;;  %v2424_v42 = vmul.f32 %v2411_v53, %v2411_v53 }
 0xe79   :  { %v2430_v49 = vmul.f32 %v2424_v42, %v2411_v53  ;;  %3101 = vtanh.f32 %v2447_v25 }
 0xe7b   :  { %v2436_v46 = vmul.f32 0.044715, %v2430_v49 }
 0xe7c   :  { %v2413_v61 = vpop.f32.mrf.mxu0 }
 0xe7d   :  { %v2442_v41 = vadd.f32 %v2436_v46, %v2411_v53  ;;  %v2414_v39 = vadd.f32 %v4146_v24, %v2413_v61 }
 0xe7f   :  { %v2448_v8 = vmul.f32 0.7978846, %v2442_v41  ;;  %v2425_v45 = vmul.f32 %v2414_v39, %v2414_v39  ;;  %v3102_v28 = vpop.eup %3101 }
 0xe80   :  { %v2459_v32 = vadd.f32 1.0, %v3102_v28 }
 0xe81   :  { %3103 = vtanh.f32 %v2448_v8  ;;  %v2431_v5 = vmul.f32 %v2425_v45, %v2414_v39  ;;  %v2188_v20 = vpop.f32.mrf.mxu1 }
 0xe82   :  { %v2189_v23 = vadd.f32 %v4048_v57, %v2188_v20  ;;  %v2465_v7 = vmul.f32 0.5, %v2459_v32 }
 0xe83   :  { %v2437_v44 = vmul.f32 0.044715, %v2431_v5 }
 0xe84   :  { %v4156_v56 = vadd.f32 %v2189_v23, %v3779_v55  ;;  %v2415_v58 = vpop.f32.mrf.mxu0  ;;  %v2471_v12 = vmul.f32 %v2465_v7, %v2409_v52 }
 0xe85   :  { %v2443_v63 = vadd.f32 %v2437_v44, %v2414_v39  ;;  %v2416_v26 = vadd.f32 %v4146_v24, %v2415_v58 }
 0xe86   :  { %v2215_v1 = vsel %vm152_vm1, %v4156_v56, 0.0  ;;  %v2231_v55 = vmul.f32 %v4156_v56, %v4156_v56 }
 0xe87   :  { %v3104_v35 = vpop.eup %3103  ;;  %v2449_v43 = vmul.f32 0.7978846, %v2443_v63  ;;  %v2426_v37 = vmul.f32 %v2416_v26, %v2416_v26  ;;  %2216 = vadd.xlane.f32.xlu0 %v2215_v1 }
 0xe88   :  { %v2460_v62 = vadd.f32 1.0, %v3104_v35  ;;  %v2245_v36 = vsel %vm152_vm1, %v2231_v55, 0.0 }
 0xe89   :  { %v2432_v0 = vmul.f32 %v2426_v37, %v2416_v26  ;;  %v2190_v3 = vpop.f32.mrf.mxu1  ;;  %3105 = vtanh.f32 %v2449_v43 }
 0xe8a   :  { %v2466_v10 = vmul.f32 0.5, %v2460_v62  ;;  %v2191_v47 = vadd.f32 %v4048_v57, %v2190_v3 }
 0xe8b   :  { %v2438_v11 = vmul.f32 0.044715, %v2432_v0 }
 0xe8c   :  { %v2472_v4 = vmul.f32 %v2466_v10, %v2411_v53  ;;  %v4165_v18 = vadd.f32 %v2191_v47, %v3787_v50 }
 0xe8d   :  { %v2444_v9 = vadd.f32 %v2438_v11, %v2416_v26 }
 0xe8e   :  { %v2477_v29 = vpack.c.bf16 %v2472_v4, %v2471_v12  ;;  %v2218_v34 = vsel %vm152_vm1, %v4165_v18, 0.0  ;;  %v2232_v54 = vmul.f32 %v4165_v18, %v4165_v18 }
 0xe8f   :  { %v2450_v2 = vmul.f32 0.7978846, %v2444_v9  ;;  %2219 = vadd.xlane.f32.xlu1 %v2218_v34  ;;  %2246 = vadd.xlane.f32.xlu0 %v2245_v36  ;;  %v3106_v57 = vpop.eup %3105 }
 0xe90   :  { %2831 = vmatmul.msk.bf16.vlgmr.msra.gmra.mxu2 %vm1314_vm0, %v2477_v29  ;;  %v2461_v33 = vadd.f32 1.0, %v3106_v57  ;;  %v2248_v50 = vsel %vm152_vm1, %v2232_v54, 0.0 }
 0xe91   :  { %3107 = vtanh.f32 %v2450_v2 }
 0xe92   :  { %v2467_v27 = vmul.f32 0.5, %v2461_v33  ;;  %v2870_v33 = vld [vmem:[%s4231_s16 + $0x8] sm:$0xff] }
 0xe93   :  { %2619 = vmatpush.bf16.msrb.mxu3 %v2870_v33 }
 0xe94   :  { %v2473_v22 = vmul.f32 %v2467_v27, %v2414_v39 }
 0xe97   :  { %v3108_v15 = vpop.eup %3107  ;;  %2249 = vadd.xlane.f32.xlu1 %v2248_v50 }
 0xe98   :  { %v2462_v30 = vadd.f32 1.0, %v3108_v15 }
 0xe9a   :  { %v2468_v21 = vmul.f32 0.5, %v2462_v30 }
 0xe9c   :  { %v2474_v17 = vmul.f32 %v2468_v21, %v2416_v26 }
 0xe9e   :  { %v2478_v13 = vpack.c.bf16 %v2474_v17, %v2473_v22 }
 0xea0   :  { %2832 = vmatmul.msk.bf16.gmra.mxu2 %vm1314_vm0, %v2478_v13 }
 0xefa   :  { %v2217_v51 = vpop.xlane.xlu0 %2216 }
 0xefb   :  { %v2225_v52 = vmul.f32 %v2217_v51, %v3325_v48 }
 0xefd   :  { %v2261_v59 = vmul.f32 %v2225_v52, %v2225_v52  ;;  %v2273_v35 = vsub.f32 %v4156_v56, %v2225_v52  ;;  %v2943_v56 = vld [vmem:[%s4228_s13 + $0x1] ss:$0 sm:$0xff] }
 0xf02   :  { %v2220_v31 = vpop.xlane.xlu1 %2219  ;;  %v2247_v38 = vpop.xlane.xlu0 %2246 }
 0xf03   :  { %v2255_v16 = vmul.f32 %v2247_v38, %v3325_v48  ;;  %v2226_v53 = vmul.f32 %v2220_v31, %v3325_v48 }
 0xf05   :  { %v2267_v19 = vsub.f32 %v2255_v16, %v2261_v59  ;;  %v2262_v49 = vmul.f32 %v2226_v53, %v2226_v53  ;;  %v2274_v62 = vsub.f32 %v4165_v18, %v2226_v53 }
 0xf07   :  { %v2279_v25 = vadd.f32 1e-05, %v2267_v19 }
 0xf09   :  { %3109 = vrsqrt.f32 %v2279_v25  ;;  %vm2327_vm11 = vweird.f32 %v2279_v25 }
 0xf0a   :  { %v2250_v42 = vpop.xlane.xlu1 %2249 }
 0xf0b   :  { %v2256_v46 = vmul.f32 %v2250_v42, %v3325_v48 }
 0xf0d   :  { %v2268_v61 = vsub.f32 %v2256_v46, %v2262_v49 }
 0xf0f   :  { %v3110_v41 = vpop.eup %3109  ;;  %v2280_v39 = vadd.f32 1e-05, %v2268_v61 }
 0xf10   :  { %v2322_v8 = vmul.f32 %v3110_v41, %v2279_v25  ;;  %vm2328_vm6 = vweird.f32 %v3110_v41 }
 0xf11   :  { %3111 = vrsqrt.f32 %v2280_v39  ;;  %vm2329_vm8 = vmor %vm2327_vm11, %vm2328_vm6  ;;  %vm2337_vm12 = vweird.f32 %v2280_v39 }
 0xf12   :  { %v2323_v45 = vmul.f32 %v3110_v41, %v2322_v8 }
 0xf13   :  { %v2536_v28 = vpop.f32.mrf.mxu2 }
 0xf14   :  { %v2324_v5 = vmul.f32 0.5, %v2323_v45  ;;  %v2537_v9 = vadd.f32 %v2943_v56, %v2536_v28 }
 0xf16   :  { %v2325_v20 = vsub.f32 1.5, %v2324_v5  ;;  %v2547_v36 = vadd.f32 %v2537_v9, %v4052_v40 }
 0xf17   :  { %v3112_v23 = vpop.eup %3111 }
 0xf18   :  { %v2326_v44 = vmul.f32 %v3110_v41, %v2325_v20  ;;  %v2332_v32 = vmul.f32 %v3112_v23, %v2280_v39  ;;  %vm2338_vm9 = vweird.f32 %v3112_v23 }
 0xf19   :  { %vm2339_vm13 = vmor %vm2337_vm12, %vm2338_vm9 }
 0xf1a   :  { %v2333_v58 = vmul.f32 %v3112_v23, %v2332_v32  ;;  %v2330_v26 = vsel %vm2329_vm8, %v3110_v41, %v2326_v44  ;;  %v2945_v44 = vld [vmem:[%s4230_s15] ss:$0 sm:$0xff]  ;;  %s3151_s15 = smov [#allocation2]  }
 0xf1b   :  { %v2538_v63 = vpop.f32.mrf.mxu2  ;;  %v2345_v37 = vmul.f32 %v2330_v26, %v2273_v35  ;;  %s2633_s22 = sshll.u32 %s3151_s15, 4  ;;  %s2634_s22 = int_to_ptr.vmem [resolvable:$true] %s2633_s22 }
 0xf1c   :  { %v2334_v1 = vmul.f32 0.5, %v2333_v58 }
 0xf1d   :  { %v2354_v47 = vmul.f32 %v4110_v6, %v2345_v37 }
 0xf1e   :  { %v2335_v43 = vsub.f32 1.5, %v2334_v1 }
 0xf1f   :  { %v2363_v11 = vadd.f32 %v4116_v60, %v2354_v47 }
 0xf20   :  { %v2336_v7 = vmul.f32 %v3112_v23, %v2335_v43 }
 0xf22   :  { %v2340_v0 = vsel %vm2339_vm13, %v3112_v23, %v2336_v7 }
 0xf23   :  { %v2346_v3 = vmul.f32 %v2340_v0, %v2274_v62  ;;  %v2540_v10 = vpop.f32.mrf.mxu2 }
 0xf25   :  { %v2355_v55 = vmul.f32 %v4110_v6, %v2346_v3  ;;  %v2946_v3 = vld [vmem:[%s4232_s17] ss:$0 sm:$0xff] }
 0xf27   :  { %v2364_v12 = vadd.f32 %v4116_v60, %v2355_v55 }
 0xf29   :  { %v2367_v4 = vpack.c.bf16 %v2364_v12, %v2363_v11 }
 0xf2b   :  { %2805 = vmatmul.msk.bf16.gmra.mxu0 %vm152_vm1, %v2367_v4  ;;  %v2541_v18 = vpop.f32.mrf.mxu2 }
 0xf2c   :  { %v2542_v29 = vadd.f32 %v2943_v56, %v2541_v18 }
 0xf2e   :  { %v2548_v34 = vadd.f32 %v2542_v29, %v4079_v14  ;;  %v2869_v14 = vld [vmem:[%s4231_s16] sm:$0xff] }
 0xf2f   :  { %2620 = vmatpush.bf16.msrb.mxu3 %v2869_v14 }
 0xf30   :  { %v2550_v6 = vrot.slane %v2548_v34, 7 }
 0xf32   :  { %v2553_v2 = vsel %vm2552_vm14, %v2547_v36, %v2550_v6 }
 0xf33   :  { %v2557_v57 = vsel %vm2556_vm15, %v2553_v2, 0.0  ;;  %v2561_v60 = vmul.f32 %v2553_v2, %v2553_v2 }
 0xf34   :  { %2558 = vadd.xlane.f32.xlu0 %v2557_v57 }
 0xf35   :  { %v2562_v54 = vsel %vm2556_vm15, %v2561_v60, 0.0 }
 0xf36   :  { %2563 = vadd.xlane.f32.xlu1 %v2562_v54 }
 0xfa7   :  { %v2559_v50 = vpop.xlane.xlu0 %2558 }
 0xfa8   :  { %v2560_v40 = vmul.f32 %v2559_v50, %v3325_v48  ;;  %v2418_v15 = vpop.f32.mrf.mxu0 }
 0xfa9   :  { %v2419_v27 = vadd.f32 %v4146_v24, %v2418_v15  ;;  %v2564_v30 = vpop.xlane.xlu1 %2563 }
 0xfaa   :  { %v2566_v21 = vmul.f32 %v2560_v40, %v2560_v40  ;;  %v2565_v22 = vmul.f32 %v2564_v30, %v3325_v48  ;;  %v2568_v5 = vsub.f32 %v2553_v2, %v2560_v40 }
 0xfab   :  { %v2427_v17 = vmul.f32 %v2419_v27, %v2419_v27 }
 0xfac   :  { %v2567_v13 = vsub.f32 %v2565_v22, %v2566_v21 }
 0xfad   :  { %v2433_v51 = vmul.f32 %v2427_v17, %v2419_v27 }
 0xfae   :  { %v2569_v52 = vadd.f32 1e-05, %v2567_v13 }
 0xfaf   :  { %v2439_v31 = vmul.f32 0.044715, %v2433_v51 }
 0xfb0   :  { %3113 = vrsqrt.f32 %v2569_v52  ;;  %v2420_v38 = vpop.f32.mrf.mxu0  ;;  %vm2576_vm3 = vweird.f32 %v2569_v52 }
 0xfb1   :  { %v2445_v59 = vadd.f32 %v2439_v31, %v2419_v27  ;;  %v2421_v16 = vadd.f32 %v4146_v24, %v2420_v38  ;;  %v2944_v24 = vld [vmem:[%s4229_s14] ss:$0 sm:$0xff] }
 0xfb3   :  { %v2451_v19 = vmul.f32 0.7978846, %v2445_v59  ;;  %v2428_v53 = vmul.f32 %v2421_v16, %v2421_v16 }
 0xfb5   :  { %v2434_v25 = vmul.f32 %v2428_v53, %v2421_v16  ;;  %3115 = vtanh.f32 %v2451_v19 }
 0xfb6   :  { %v3114_v42 = vpop.eup %3113 }
 0xfb7   :  { %v2571_v49 = vmul.f32 %v3114_v42, %v2569_v52  ;;  %v2440_v46 = vmul.f32 0.044715, %v2434_v25  ;;  %vm2577_vm2 = vweird.f32 %v3114_v42 }
 0xfb8   :  { %vm2578_vm4 = vmor %vm2576_vm3, %vm2577_vm2 }
 0xfb9   :  { %v2572_v61 = vmul.f32 %v3114_v42, %v2571_v49  ;;  %v2446_v41 = vadd.f32 %v2440_v46, %v2421_v16 }
 0xfbb   :  { %v2573_v48 = vmul.f32 0.5, %v2572_v61  ;;  %v2452_v39 = vmul.f32 0.7978846, %v2446_v41  ;;  %v3116_v8 = vpop.eup %3115 }
 0xfbc   :  { %v2463_v20 = vadd.f32 1.0, %v3116_v8 }
 0xfbd   :  { %v2574_v45 = vsub.f32 1.5, %v2573_v48  ;;  %3117 = vtanh.f32 %v2452_v39 }
 0xfbe   :  { %v2469_v63 = vmul.f32 0.5, %v2463_v20 }
 0xfbf   :  { %v2575_v28 = vmul.f32 %v3114_v42, %v2574_v45 }
 0xfc0   :  { %v2475_v37 = vmul.f32 %v2469_v63, %v2419_v27 }
 0xfc1   :  { %v2579_v23 = vsel %vm2578_vm4, %v3114_v42, %v2575_v28 }
 0xfc2   :  { %v2580_v32 = vmul.f32 %v2579_v23, %v2568_v5 }
 0xfc3   :  { %v3118_v58 = vpop.eup %3117 }
 0xfc4   :  { %v2584_v26 = vmul.f32 %v2944_v24, %v2580_v32  ;;  %v2464_v1 = vadd.f32 1.0, %v3118_v58 }
 0xfc6   :  { %v2588_v35 = vadd.f32 %v2945_v44, %v2584_v26  ;;  %v2470_v43 = vmul.f32 0.5, %v2464_v1 }
 0xfc8   :  { %v2589_v7 = vpack.c.bf16 %v2588_v35, %v2588_v35  ;;  %v2476_v62 = vmul.f32 %v2470_v43, %v2421_v16 }
 0xfca   :  { %2842 = vmatmul.msk.bf16.vlgmr.msrb.gmra.mxu3 %vm152_vm1, %v2589_v7  ;;  %v2479_v0 = vpack.c.bf16 %v2476_v62, %v2475_v37 }
 0xfcc   :  { %2833 = vmatmul.msk.bf16.gmra.mxu2 %vm1314_vm0, %v2479_v0 }
0x104d   :  { %v2622_v10 = vpop.f32.mrf.mxu3 }
0x104e   :  { %v2623_v47 = vadd.f32 %v2946_v3, %v2622_v10 }
0x104f   :  { %v2544_v55 = vpop.f32.mrf.mxu2 }
0x1050   :  { %2627 = vst.msk [vmem:[#allocation2] sm:$0x3] %vm2626_vm5, %v2623_v47 }
0x1051   :  { %2638 = dma.vmem_to_hbm [thread:$0]  %s2634_s22, 32, %s2636_s23, [#allocation3]  }
0x1055   :  { %v2624_v11 = vpop.f32.mrf.mxu3 }
0x1057   :  { %v2545_v12 = vpop.f32.mrf.mxu2 }
0x1058   :  { %3143 = dma.done.wait [#allocation3], 32  }
0x1059   :  { %3144 = vsyncadd [#allocation3], 4294967264 }
0x105a   :  { %2643 = vsyncpa [#allocation3], 1 }

</bundles_post_ra>
